<compile_context>
chip_gen: v5e
topology: v5e:2x2
jax: 0.10.0
libtpu: 0.0.40
codegen_flags: <defaults>
</compile_context>

<pallas_src>
import functools

import jax
import jax.numpy as jnp
from jax.experimental import pallas as pl
from jax.experimental.pallas import tpu as pltpu

HIDDEN = 500        # fixed by the module architecture
HIDDEN_PAD = 512    # padded to a multiple of 128 lanes / MXU tile edge
LANE = 128


def _round_up(n, m):
    return ((n + m - 1) // m) * m


def _swish(x):
    return x * jax.nn.sigmoid(x)


def _pick_batch_tile():
    """M-tile for the matmuls: 256 fills the v6e/v7x 2x256x256 MXU, 128 fills
    the v5e 4x128x128 MXU at half the activation footprint."""
    try:
        kind = jax.devices()[0].device_kind.lower()
    except Exception:  # pragma: no cover - defensive
        kind = ""
    if "v5" in kind:
        return 128
    return 256


def _ensemble_kernel(output_size,
                     x_ref, mu_ref, inv_sigma_ref,
                     w0_ref, b0_ref, w1_ref, b1_ref,
                     w2_ref, b2_ref, w3_ref, b3_ref,
                     maxlv_ref, minlv_ref,
                     out_ref):
    # Input standardization in f32, then bf16 for the MXU.
    xs = (x_ref[0] - mu_ref[...]) * inv_sigma_ref[...]          # (TB, D_in) f32
    h = xs.astype(jnp.bfloat16)

    def dense(h_bf16, w_ref, b_ref):
        # bf16 x bf16 -> f32 accumulation on the MXU; bias add in f32.
        return jnp.dot(h_bf16, w_ref[0],
                       preferred_element_type=jnp.float32) + b_ref[0]

    # Swish in f32, cast to bf16 at the layer boundary (live value is bf16).
    h = _swish(dense(h, w0_ref, b0_ref)).astype(jnp.bfloat16)   # (TB, 512)
    h = _swish(dense(h, w1_ref, b1_ref)).astype(jnp.bfloat16)   # (TB, 512)
    h = _swish(dense(h, w2_ref, b2_ref)).astype(jnp.bfloat16)   # (TB, 512)
    y = dense(h, w3_ref, b3_ref)                                # (TB, OUT_PAD) f32

    # Double-softplus bound applied on the full lane-dense slab, then selected
    # only for the logvar columns (keeps VPU/EUP ops 128-lane dense).
    maxlv = maxlv_ref[...]                                      # (1, OUT_PAD)
    minlv = minlv_ref[...]
    bounded = maxlv - jax.nn.softplus(maxlv - y)
    bounded = minlv + jax.nn.softplus(bounded - minlv)

    col = jax.lax.broadcasted_iota(jnp.int32, y.shape, 1)
    is_logvar = jnp.logical_and(col >= output_size, col < 2 * output_size)
    out_ref[0] = jnp.where(is_logvar, bounded, y)


def prepare_params(params, output_size):
    """Pad to MXU-friendly shapes, cast weights to bf16, precompute 1/sigma.

    Do this ONCE per set of weights (not per forward call).
    """
    (mu, sigma, w0, b0, w1, b1, w2, b2, w3, b3, maxlv, minlv) = params
    out2 = 2 * output_size
    out_pad = _round_up(out2, LANE)

    def pad_to(a, axis, target):
        pad = [(0, 0)] * a.ndim
        pad[axis] = (0, target - a.shape[axis])
        return jnp.pad(a, pad)

    w0p = pad_to(w0, 2, HIDDEN_PAD).astype(jnp.bfloat16)
    w1p = pad_to(pad_to(w1, 1, HIDDEN_PAD), 2, HIDDEN_PAD).astype(jnp.bfloat16)
    w2p = pad_to(pad_to(w2, 1, HIDDEN_PAD), 2, HIDDEN_PAD).astype(jnp.bfloat16)
    w3p = pad_to(pad_to(w3, 1, HIDDEN_PAD), 2, out_pad).astype(jnp.bfloat16)
    b0p = pad_to(b0, 2, HIDDEN_PAD)
    b1p = pad_to(b1, 2, HIDDEN_PAD)
    b2p = pad_to(b2, 2, HIDDEN_PAD)
    b3p = pad_to(b3, 2, out_pad)

    # PETS guard: sigma < 1e-12 behaves as 1.0 (module default sigma is zero).
    sigma_safe = jnp.where(sigma < 1e-12, 1.0, sigma)
    inv_sigma = 1.0 / sigma_safe   # multiply in-kernel instead of divide

    # logvar bound slabs aligned with the fused [mean | logvar | pad] layout.
    maxlv_slab = jnp.zeros((1, out_pad), jnp.float32)
    maxlv_slab = maxlv_slab.at[:, output_size:out2].set(maxlv)
    minlv_slab = jnp.zeros((1, out_pad), jnp.float32)
    minlv_slab = minlv_slab.at[:, output_size:out2].set(minlv)

    return (mu, inv_sigma, w0p, b0p, w1p, b1p, w2p, b2p, w3p, b3p,
            maxlv_slab, minlv_slab)


def ensemble_forward(x, prepared, output_size):
    """x: (E, B, D_in) f32; prepared: output of prepare_params.
    Returns (mean, logvar), each (E, B, output_size) f32.

    NOTE: fold MPC particle/candidate dimensions into B before calling so the
    per-member ~1.2 MiB weight stream is amortized over a large batch.
    """
    E, B, D_in = x.shape
    (mu, inv_sigma, w0, b0, w1, b1, w2, b2, w3, b3, maxlv, minlv) = prepared
    out_pad = w3.shape[2]

    # Batch tiling: TB matched to the MXU generation, clamped for tiny batches.
    TB = min(_pick_batch_tile(), _round_up(B, 8))
    B_pad = _round_up(B, TB)
    if B_pad != B:
        x = jnp.pad(x, ((0, 0), (0, B_pad - B), (0, 0)))
    nb = B_pad // TB

    batch_tiled = lambda e, j: (e, j, 0)   # x / output: varies with batch tile
    per_member = lambda e, j: (e, 0, 0)    # weights/biases: IGNORE batch index
    shared2d = lambda e, j: (0, 0)         # stats / logvar bounds

    grid_spec = pltpu.PrefetchScalarGridSpec(
        num_scalar_prefetch=0,
        grid=(E, nb),                      # batch innermost -> weight residency
        in_specs=[
            pl.BlockSpec((1, TB, D_in), batch_tiled),                 # x
            pl.BlockSpec((1, D_in), shared2d),                        # inputs_mu
            pl.BlockSpec((1, D_in), shared2d),                        # 1/inputs_sigma
            pl.BlockSpec((1, D_in, HIDDEN_PAD), per_member),          # w0 (bf16)
            pl.BlockSpec((1, 1, HIDDEN_PAD), per_member),             # b0
            pl.BlockSpec((1, HIDDEN_PAD, HIDDEN_PAD), per_member),    # w1 (bf16)
            pl.BlockSpec((1, 1, HIDDEN_PAD), per_member),             # b1
            pl.BlockSpec((1, HIDDEN_PAD, HIDDEN_PAD), per_member),    # w2 (bf16)
            pl.BlockSpec((1, 1, HIDDEN_PAD), per_member),             # b2
            pl.BlockSpec((1, HIDDEN_PAD, out_pad), per_member),       # w3 (bf16)
            pl.BlockSpec((1, 1, out_pad), per_member),                # b3
            pl.BlockSpec((1, out_pad), shared2d),                     # max_logvar slab
            pl.BlockSpec((1, out_pad), shared2d),                     # min_logvar slab
        ],
        out_specs=pl.BlockSpec((1, TB, out_pad), batch_tiled),        # [mean|logvar|pad]
    )

    # Advisory cost estimate for XLA's scheduler around this custom call.
    flops = 2 * E * B_pad * (D_in * HIDDEN_PAD
                             + 2 * HIDDEN_PAD * HIDDEN_PAD
                             + HIDDEN_PAD * out_pad)
    transcendentals = E * B_pad * (3 * HIDDEN_PAD + 2 * out_pad)
    weight_bytes = sum(int(a.size) * a.dtype.itemsize
                       for a in (w0, b0, w1, b1, w2, b2, w3, b3))
    io_bytes = (int(x.size) * 4 + E * B_pad * out_pad * 4
                + int(mu.size) * 4 + int(inv_sigma.size) * 4
                + int(maxlv.size) * 4 + int(minlv.size) * 4)
    cost = pl.CostEstimate(flops=int(flops),
                           transcendentals=int(transcendentals),
                           bytes_accessed=int(weight_bytes + io_bytes))

    kernel = functools.partial(_ensemble_kernel, output_size)
    y = pl.pallas_call(
        kernel,
        out_shape=jax.ShapeDtypeStruct((E, B_pad, out_pad), jnp.float32),
        grid_spec=grid_spec,
        compiler_params=pltpu.CompilerParams(
            # Megacore splits on the ensemble axis (per-core weight residency
            # on v7x); the batch axis is a sequential reuse axis.
            dimension_semantics=("parallel", "arbitrary"),
        ),
        cost_estimate=cost,
    )(x, mu, inv_sigma, w0, b0, w1, b1, w2, b2, w3, b3, maxlv, minlv)

    mean = y[:, :B, :output_size]
    logvar = y[:, :B, output_size:2 * output_size]
    return mean, logvar


def init_params(key, ensemble_size, input_size, output_size):
    """Deterministic init mirroring the PyTorch module's __init__ (unpadded f32)."""
    def get_w_b(key, e, din, dout):
        std = 1.0 / (2.0 * jnp.sqrt(jnp.float32(din)))
        w = jax.random.truncated_normal(key, -2.0, 2.0, (e, din, dout),
                                        dtype=jnp.float32) * std
        b = jnp.zeros((e, 1, dout), jnp.float32)
        return w, b

    k0, k1, k2, k3 = jax.random.split(key, 4)
    w0, b0 = get_w_b(k0, ensemble_size, input_size, HIDDEN)
    w1, b1 = get_w_b(k1, ensemble_size, HIDDEN, HIDDEN)
    w2, b2 = get_w_b(k2, ensemble_size, HIDDEN, HIDDEN)
    w3, b3 = get_w_b(k3, ensemble_size, HIDDEN, 2 * output_size)

    # inputs_mu / inputs_sigma default to 0 in the module, but sigma==0 would
    # divide by zero; use identity stats (mu=0, sigma=1) as after get_input_stats.
    mu = jnp.zeros((1, input_size), jnp.float32)
    sigma = jnp.ones((1, input_size), jnp.float32)
    maxlv = jnp.ones((1, output_size), jnp.float32) / 2.0
    minlv = -jnp.ones((1, output_size), jnp.float32) * 10.0
    return (mu, sigma, w0, b0, w1, b1, w2, b2, w3, b3, maxlv, minlv)


def reference_forward(x, params, output_size):
    """Pure-JAX f32 reference mirroring the PyTorch forward exactly."""
    (mu, sigma, w0, b0, w1, b1, w2, b2, w3, b3, maxlv, minlv) = params
    h = (x - mu) / sigma
    h = _swish(jnp.einsum('ebi,eio->ebo', h, w0) + b0)
    h = _swish(jnp.einsum('ebi,eio->ebo', h, w1) + b1)
    h = _swish(jnp.einsum('ebi,eio->ebo', h, w2) + b2)
    y = jnp.einsum('ebi,eio->ebo', h, w3) + b3
    mean = y[:, :, :output_size]
    logvar = y[:, :, output_size:]
    logvar = maxlv - jax.nn.softplus(maxlv - logvar)
    logvar = minlv + jax.nn.softplus(logvar - minlv)
    return mean, logvar


def reference_forward_mixed(x, params, output_size):
    """Pure-JAX reference mirroring the kernel's mixed precision (bf16 matmul
    inputs/activations, f32 accumulation) — used for the tight check.
    TODO(synk): bf16 streaming is a deliberate precision change vs the f32
    module; keep f32 weights if this forward is reused for training gradients."""
    (mu, sigma, w0, b0, w1, b1, w2, b2, w3, b3, maxlv, minlv) = params
    inv_sigma = 1.0 / jnp.where(sigma < 1e-12, 1.0, sigma)

    def dense(h, w, b):
        return jnp.einsum('ebi,eio->ebo', h.astype(jnp.bfloat16),
                          w.astype(jnp.bfloat16),
                          preferred_element_type=jnp.float32) + b

    h = (x - mu) * inv_sigma
    h = _swish(dense(h, w0, b0))
    h = _swish(dense(h, w1, b1))
    h = _swish(dense(h, w2, b2))
    y = dense(h, w3, b3)
    mean = y[:, :, :output_size]
    logvar = y[:, :, output_size:]
    logvar = maxlv - jax.nn.softplus(maxlv - logvar)
    logvar = minlv + jax.nn.softplus(logvar - minlv)
    return mean, logvar


if __name__ == "__main__":
    ensemble_size, batch, input_size, output_size = 4, 8, 32, 8

    key = jax.random.PRNGKey(0)
    k_params, k_x = jax.random.split(key)
    params = init_params(k_params, ensemble_size, input_size, output_size)
    x = jax.random.normal(k_x, (ensemble_size, batch, input_size), jnp.float32)

    prepared = prepare_params(params, output_size)
    mean, logvar = ensemble_forward(x, prepared, output_size)
    jax.block_until_ready((mean, logvar))

    assert mean.shape == (ensemble_size, batch, output_size)
    assert logvar.shape == (ensemble_size, batch, output_size)

    # Tight check against a pure-JAX reference with the same mixed precision.
    mm, ml = reference_forward_mixed(x, params, output_size)
    assert jnp.allclose(mean, mm, atol=2e-3, rtol=2e-3)
    assert jnp.allclose(logvar, ml, atol=2e-3, rtol=2e-3)

    # Loose check against the full-f32 module semantics (bf16 streaming error only).
    fm, fl = reference_forward(x, params, output_size)
    assert jnp.allclose(mean, fm, atol=5e-2, rtol=5e-2)
    assert jnp.allclose(logvar, fl, atol=5e-2, rtol=5e-2)

    print("KERNEL_OK")
</pallas_src>

<mosaic_0001>
module attributes {stable_mosaic.version = 11 : i64} {
  func.func @_ensemble_kernel(%arg0: i32, %arg1: i32, %arg2: memref<1x8x32xf32, #tpu.memory_space<vmem>>, %arg3: memref<1x32xf32, #tpu.memory_space<vmem>>, %arg4: memref<1x32xf32, #tpu.memory_space<vmem>>, %arg5: memref<1x32x512xbf16, #tpu.memory_space<vmem>>, %arg6: memref<1x1x512xf32, #tpu.memory_space<vmem>>, %arg7: memref<1x512x512xbf16, #tpu.memory_space<vmem>>, %arg8: memref<1x1x512xf32, #tpu.memory_space<vmem>>, %arg9: memref<1x512x512xbf16, #tpu.memory_space<vmem>>, %arg10: memref<1x1x512xf32, #tpu.memory_space<vmem>>, %arg11: memref<1x512x128xbf16, #tpu.memory_space<vmem>>, %arg12: memref<1x1x128xf32, #tpu.memory_space<vmem>>, %arg13: memref<1x128xf32, #tpu.memory_space<vmem>>, %arg14: memref<1x128xf32, #tpu.memory_space<vmem>>, %arg15: memref<1x8x128xf32, #tpu.memory_space<vmem>>) attributes {dimension_semantics = [#tpu.dimension_semantics<parallel>, #tpu.dimension_semantics<arbitrary>], iteration_bounds = array<i64: 4, 1>, scalar_prefetch = 0 : i64, scratch_operands = 0 : i64, tpu.core_type = #tpu.core_type<tc>, window_params = [{transform_indices = @transform_0, window_bounds = array<i64: 1, 8, 32>}, {pipeline_mode = #tpu.pipeline_mode<synchronous>, transform_indices = @transform_1, window_bounds = array<i64: 1, 32>}, {pipeline_mode = #tpu.pipeline_mode<synchronous>, transform_indices = @transform_2, window_bounds = array<i64: 1, 32>}, {transform_indices = @transform_3, window_bounds = array<i64: 1, 32, 512>}, {transform_indices = @transform_4, window_bounds = array<i64: 1, 1, 512>}, {transform_indices = @transform_5, window_bounds = array<i64: 1, 512, 512>}, {transform_indices = @transform_6, window_bounds = array<i64: 1, 1, 512>}, {transform_indices = @transform_7, window_bounds = array<i64: 1, 512, 512>}, {transform_indices = @transform_8, window_bounds = array<i64: 1, 1, 512>}, {transform_indices = @transform_9, window_bounds = array<i64: 1, 512, 128>}, {transform_indices = @transform_10, window_bounds = array<i64: 1, 1, 128>}, {pipeline_mode = #tpu.pipeline_mode<synchronous>, transform_indices = @transform_11, window_bounds = array<i64: 1, 128>}, {pipeline_mode = #tpu.pipeline_mode<synchronous>, transform_indices = @transform_12, window_bounds = array<i64: 1, 128>}, {transform_indices = @transform_13, window_bounds = array<i64: 1, 8, 128>}]} {
    %c0 = arith.constant 0 : index
    %c0_0 = arith.constant 0 : index
    %c0_1 = arith.constant 0 : index
    %0 = vector.load %arg2[%c0, %c0_0, %c0_1] : memref<1x8x32xf32, #tpu.memory_space<vmem>>, vector<1x8x32xf32>
    %1 = vector.shape_cast %0 : vector<1x8x32xf32> to vector<8x32xf32>
    %c0_2 = arith.constant 0 : index
    %c0_3 = arith.constant 0 : index
    %2 = vector.load %arg3[%c0_2, %c0_3] : memref<1x32xf32, #tpu.memory_space<vmem>>, vector<1x32xf32>
    %3 = vector.broadcast %2 : vector<1x32xf32> to vector<8x32xf32>
    %4 = arith.subf %1, %3 : vector<8x32xf32>
    %c0_4 = arith.constant 0 : index
    %c0_5 = arith.constant 0 : index
    %5 = vector.load %arg4[%c0_4, %c0_5] : memref<1x32xf32, #tpu.memory_space<vmem>>, vector<1x32xf32>
    %6 = vector.broadcast %5 : vector<1x32xf32> to vector<8x32xf32>
    %7 = arith.mulf %4, %6 : vector<8x32xf32>
    %8 = arith.truncf %7 : vector<8x32xf32> to vector<8x32xbf16>
    %c0_6 = arith.constant 0 : index
    %c0_7 = arith.constant 0 : index
    %c0_8 = arith.constant 0 : index
    %9 = vector.load %arg5[%c0_6, %c0_7, %c0_8] : memref<1x32x512xbf16, #tpu.memory_space<vmem>>, vector<1x32x512xbf16>
    %10 = vector.shape_cast %9 : vector<1x32x512xbf16> to vector<32x512xbf16>
    %cst = arith.constant dense<0.000000e+00> : vector<8x512xf32>
    %11 = tpu.matmul %8, %10, %cst {dimension_numbers = #tpu.dot_dimension_numbers<[1], [0], [0], [1], [0, 0, 1, 1], [], []>} : vector<8x32xbf16>, vector<32x512xbf16>, vector<8x512xf32> -> vector<8x512xf32>
    %c0_9 = arith.constant 0 : index
    %c0_10 = arith.constant 0 : index
    %c0_11 = arith.constant 0 : index
    %12 = vector.load %arg6[%c0_9, %c0_10, %c0_11] : memref<1x1x512xf32, #tpu.memory_space<vmem>>, vector<1x1x512xf32>
    %13 = vector.shape_cast %12 : vector<1x1x512xf32> to vector<1x512xf32>
    %14 = vector.broadcast %13 : vector<1x512xf32> to vector<8x512xf32>
    %15 = arith.addf %11, %14 : vector<8x512xf32>
    %16 = arith.negf %15 : vector<8x512xf32>
    %17 = math.exp %16 : vector<8x512xf32>
    %cst_12 = arith.constant 1.000000e+00 : f32
    %18 = vector.broadcast %cst_12 : f32 to vector<8x512xf32>
    %19 = arith.addf %18, %17 : vector<8x512xf32>
    %20 = arith.divf %18, %19 : vector<8x512xf32>
    %21 = arith.mulf %15, %20 : vector<8x512xf32>
    %22 = arith.truncf %21 : vector<8x512xf32> to vector<8x512xbf16>
    %c0_13 = arith.constant 0 : index
    %c0_14 = arith.constant 0 : index
    %c0_15 = arith.constant 0 : index
    %23 = vector.load %arg7[%c0_13, %c0_14, %c0_15] : memref<1x512x512xbf16, #tpu.memory_space<vmem>>, vector<1x512x512xbf16>
    %24 = vector.shape_cast %23 : vector<1x512x512xbf16> to vector<512x512xbf16>
    %cst_16 = arith.constant dense<0.000000e+00> : vector<8x512xf32>
    %25 = tpu.matmul %22, %24, %cst_16 {dimension_numbers = #tpu.dot_dimension_numbers<[1], [0], [0], [1], [0, 0, 1, 1], [], []>} : vector<8x512xbf16>, vector<512x512xbf16>, vector<8x512xf32> -> vector<8x512xf32>
    %c0_17 = arith.constant 0 : index
    %c0_18 = arith.constant 0 : index
    %c0_19 = arith.constant 0 : index
    %26 = vector.load %arg8[%c0_17, %c0_18, %c0_19] : memref<1x1x512xf32, #tpu.memory_space<vmem>>, vector<1x1x512xf32>
    %27 = vector.shape_cast %26 : vector<1x1x512xf32> to vector<1x512xf32>
    %28 = vector.broadcast %27 : vector<1x512xf32> to vector<8x512xf32>
    %29 = arith.addf %25, %28 : vector<8x512xf32>
    %30 = arith.negf %29 : vector<8x512xf32>
    %31 = math.exp %30 : vector<8x512xf32>
    %cst_20 = arith.constant 1.000000e+00 : f32
    %32 = vector.broadcast %cst_20 : f32 to vector<8x512xf32>
    %33 = arith.addf %32, %31 : vector<8x512xf32>
    %34 = arith.divf %32, %33 : vector<8x512xf32>
    %35 = arith.mulf %29, %34 : vector<8x512xf32>
    %36 = arith.truncf %35 : vector<8x512xf32> to vector<8x512xbf16>
    %c0_21 = arith.constant 0 : index
    %c0_22 = arith.constant 0 : index
    %c0_23 = arith.constant 0 : index
    %37 = vector.load %arg9[%c0_21, %c0_22, %c0_23] : memref<1x512x512xbf16, #tpu.memory_space<vmem>>, vector<1x512x512xbf16>
    %38 = vector.shape_cast %37 : vector<1x512x512xbf16> to vector<512x512xbf16>
    %cst_24 = arith.constant dense<0.000000e+00> : vector<8x512xf32>
    %39 = tpu.matmul %36, %38, %cst_24 {dimension_numbers = #tpu.dot_dimension_numbers<[1], [0], [0], [1], [0, 0, 1, 1], [], []>} : vector<8x512xbf16>, vector<512x512xbf16>, vector<8x512xf32> -> vector<8x512xf32>
    %c0_25 = arith.constant 0 : index
    %c0_26 = arith.constant 0 : index
    %c0_27 = arith.constant 0 : index
    %40 = vector.load %arg10[%c0_25, %c0_26, %c0_27] : memref<1x1x512xf32, #tpu.memory_space<vmem>>, vector<1x1x512xf32>
    %41 = vector.shape_cast %40 : vector<1x1x512xf32> to vector<1x512xf32>
    %42 = vector.broadcast %41 : vector<1x512xf32> to vector<8x512xf32>
    %43 = arith.addf %39, %42 : vector<8x512xf32>
    %44 = arith.negf %43 : vector<8x512xf32>
    %45 = math.exp %44 : vector<8x512xf32>
    %cst_28 = arith.constant 1.000000e+00 : f32
    %46 = vector.broadcast %cst_28 : f32 to vector<8x512xf32>
    %47 = arith.addf %46, %45 : vector<8x512xf32>
    %48 = arith.divf %46, %47 : vector<8x512xf32>
    %49 = arith.mulf %43, %48 : vector<8x512xf32>
    %50 = arith.truncf %49 : vector<8x512xf32> to vector<8x512xbf16>
    %c0_29 = arith.constant 0 : index
    %c0_30 = arith.constant 0 : index
    %c0_31 = arith.constant 0 : index
    %51 = vector.load %arg11[%c0_29, %c0_30, %c0_31] : memref<1x512x128xbf16, #tpu.memory_space<vmem>>, vector<1x512x128xbf16>
    %52 = vector.shape_cast %51 : vector<1x512x128xbf16> to vector<512x128xbf16>
    %cst_32 = arith.constant dense<0.000000e+00> : vector<8x128xf32>
    %53 = tpu.matmul %50, %52, %cst_32 {dimension_numbers = #tpu.dot_dimension_numbers<[1], [0], [0], [1], [0, 0, 1, 1], [], []>} : vector<8x512xbf16>, vector<512x128xbf16>, vector<8x128xf32> -> vector<8x128xf32>
    %c0_33 = arith.constant 0 : index
    %c0_34 = arith.constant 0 : index
    %c0_35 = arith.constant 0 : index
    %54 = vector.load %arg12[%c0_33, %c0_34, %c0_35] : memref<1x1x128xf32, #tpu.memory_space<vmem>>, vector<1x1x128xf32>
    %55 = vector.shape_cast %54 : vector<1x1x128xf32> to vector<1x128xf32>
    %56 = vector.broadcast %55 : vector<1x128xf32> to vector<8x128xf32>
    %57 = arith.addf %53, %56 : vector<8x128xf32>
    %c0_36 = arith.constant 0 : index
    %c0_37 = arith.constant 0 : index
    %58 = vector.load %arg13[%c0_36, %c0_37] : memref<1x128xf32, #tpu.memory_space<vmem>>, vector<1x128xf32>
    %c0_38 = arith.constant 0 : index
    %c0_39 = arith.constant 0 : index
    %59 = vector.load %arg14[%c0_38, %c0_39] : memref<1x128xf32, #tpu.memory_space<vmem>>, vector<1x128xf32>
    %60 = vector.broadcast %58 : vector<1x128xf32> to vector<8x128xf32>
    %61 = arith.subf %60, %57 : vector<8x128xf32>
    %cst_40 = arith.constant 0.000000e+00 : f32
    %62 = vector.broadcast %cst_40 : f32 to vector<8x128xf32>
    %63 = arith.maximumf %61, %62 : vector<8x128xf32>
    %64 = vector.broadcast %cst_40 : f32 to vector<8x128xf32>
    %65 = arith.subf %61, %64 : vector<8x128xf32>
    %66 = arith.cmpf one, %65, %65 : vector<8x128xf32>
    %67 = vector.broadcast %cst_40 : f32 to vector<8x128xf32>
    %68 = arith.addf %61, %67 : vector<8x128xf32>
    %69 = math.absf %65 : vector<8x128xf32>
    %cst_41 = arith.constant 0.000000e+00 : f32
    %70 = vector.broadcast %cst_41 : f32 to vector<8x128xf32>
    %71 = arith.subf %70, %69 : vector<8x128xf32>
    %72 = math.exp %71 : vector<8x128xf32>
    %73 = math.log1p %72 : vector<8x128xf32>
    %74 = arith.addf %63, %73 : vector<8x128xf32>
    %75 = arith.select %66, %68, %74 : vector<8x128xi1>, vector<8x128xf32>
    %76 = vector.broadcast %58 : vector<1x128xf32> to vector<8x128xf32>
    %77 = arith.subf %76, %75 : vector<8x128xf32>
    %78 = vector.broadcast %59 : vector<1x128xf32> to vector<8x128xf32>
    %79 = arith.subf %77, %78 : vector<8x128xf32>
    %cst_42 = arith.constant 0.000000e+00 : f32
    %80 = vector.broadcast %cst_42 : f32 to vector<8x128xf32>
    %81 = arith.maximumf %79, %80 : vector<8x128xf32>
    %82 = vector.broadcast %cst_42 : f32 to vector<8x128xf32>
    %83 = arith.subf %79, %82 : vector<8x128xf32>
    %84 = arith.cmpf one, %83, %83 : vector<8x128xf32>
    %85 = vector.broadcast %cst_42 : f32 to vector<8x128xf32>
    %86 = arith.addf %79, %85 : vector<8x128xf32>
    %87 = math.absf %83 : vector<8x128xf32>
    %cst_43 = arith.constant 0.000000e+00 : f32
    %88 = vector.broadcast %cst_43 : f32 to vector<8x128xf32>
    %89 = arith.subf %88, %87 : vector<8x128xf32>
    %90 = math.exp %89 : vector<8x128xf32>
    %91 = math.log1p %90 : vector<8x128xf32>
    %92 = arith.addf %81, %91 : vector<8x128xf32>
    %93 = arith.select %84, %86, %92 : vector<8x128xi1>, vector<8x128xf32>
    %94 = vector.broadcast %59 : vector<1x128xf32> to vector<8x128xf32>
    %95 = arith.addf %94, %93 : vector<8x128xf32>
    %96 = tpu.iota {dimensions = array<i32: 1>} : vector<8x128xi32>
    %c8_i32 = arith.constant 8 : i32
    %97 = vector.broadcast %c8_i32 : i32 to vector<8x128xi32>
    %98 = arith.cmpi sge, %96, %97 : vector<8x128xi32>
    %c16_i32 = arith.constant 16 : i32
    %99 = vector.broadcast %c16_i32 : i32 to vector<8x128xi32>
    %100 = arith.cmpi slt, %96, %99 : vector<8x128xi32>
    %101 = arith.andi %98, %100 : vector<8x128xi1>
    %102 = arith.select %101, %95, %57 : vector<8x128xi1>, vector<8x128xf32>
    %c0_44 = arith.constant 0 : index
    %c0_45 = arith.constant 0 : index
    %c0_46 = arith.constant 0 : index
    %103 = vector.load %arg15[%c0_44, %c0_45, %c0_46] : memref<1x8x128xf32, #tpu.memory_space<vmem>>, vector<1x8x128xf32>
    %104 = vector.shape_cast %103 : vector<1x8x128xf32> to vector<8x128xf32>
    %105 = vector.shape_cast %102 : vector<8x128xf32> to vector<1x8x128xf32>
    tpu.vector_store %arg15[%c0_44, %c0_45, %c0_46], %105 {strides = array<i32>} : memref<1x8x128xf32, #tpu.memory_space<vmem>>, vector<1x8x128xf32>,
    return
  }
  func.func @transform_0(%arg0: i32, %arg1: i32) -> (i32, i32, i32) {
    %c0_i32 = arith.constant 0 : i32
    %c0_i32_0 = arith.constant 0 : i32
    return %arg0, %arg1, %c0_i32 : i32, i32, i32
  }
  func.func @transform_1(%arg0: i32, %arg1: i32) -> (i32, i32) {
    %c0_i32 = arith.constant 0 : i32
    %c0_i32_0 = arith.constant 0 : i32
    %c0_i32_1 = arith.constant 0 : i32
    return %c0_i32, %c0_i32_0 : i32, i32
  }
  func.func @transform_2(%arg0: i32, %arg1: i32) -> (i32, i32) {
    %c0_i32 = arith.constant 0 : i32
    %c0_i32_0 = arith.constant 0 : i32
    %c0_i32_1 = arith.constant 0 : i32
    return %c0_i32, %c0_i32_0 : i32, i32
  }
  func.func @transform_3(%arg0: i32, %arg1: i32) -> (i32, i32, i32) {
    %c0_i32 = arith.constant 0 : i32
    %c0_i32_0 = arith.constant 0 : i32
    %c0_i32_1 = arith.constant 0 : i32
    return %arg0, %c0_i32, %c0_i32_0 : i32, i32, i32
  }
  func.func @transform_4(%arg0: i32, %arg1: i32) -> (i32, i32, i32) {
    %c0_i32 = arith.constant 0 : i32
    %c0_i32_0 = arith.constant 0 : i32
    %c0_i32_1 = arith.constant 0 : i32
    return %arg0, %c0_i32, %c0_i32_0 : i32, i32, i32
  }
  func.func @transform_5(%arg0: i32, %arg1: i32) -> (i32, i32, i32) {
    %c0_i32 = arith.constant 0 : i32
    %c0_i32_0 = arith.constant 0 : i32
    %c0_i32_1 = arith.constant 0 : i32
    return %arg0, %c0_i32, %c0_i32_0 : i32, i32, i32
  }
  func.func @transform_6(%arg0: i32, %arg1: i32) -> (i32, i32, i32) {
    %c0_i32 = arith.constant 0 : i32
    %c0_i32_0 = arith.constant 0 : i32
    %c0_i32_1 = arith.constant 0 : i32
    return %arg0, %c0_i32, %c0_i32_0 : i32, i32, i32
  }
  func.func @transform_7(%arg0: i32, %arg1: i32) -> (i32, i32, i32) {
    %c0_i32 = arith.constant 0 : i32
    %c0_i32_0 = arith.constant 0 : i32
    %c0_i32_1 = arith.constant 0 : i32
    return %arg0, %c0_i32, %c0_i32_0 : i32, i32, i32
  }
  func.func @transform_8(%arg0: i32, %arg1: i32) -> (i32, i32, i32) {
    %c0_i32 = arith.constant 0 : i32
    %c0_i32_0 = arith.constant 0 : i32
    %c0_i32_1 = arith.constant 0 : i32
    return %arg0, %c0_i32, %c0_i32_0 : i32, i32, i32
  }
  func.func @transform_9(%arg0: i32, %arg1: i32) -> (i32, i32, i32) {
    %c0_i32 = arith.constant 0 : i32
    %c0_i32_0 = arith.constant 0 : i32
    %c0_i32_1 = arith.constant 0 : i32
    return %arg0, %c0_i32, %c0_i32_0 : i32, i32, i32
  }
  func.func @transform_10(%arg0: i32, %arg1: i32) -> (i32, i32, i32) {
    %c0_i32 = arith.constant 0 : i32
    %c0_i32_0 = arith.constant 0 : i32
    %c0_i32_1 = arith.constant 0 : i32
    return %arg0, %c0_i32, %c0_i32_0 : i32, i32, i32
  }
  func.func @transform_11(%arg0: i32, %arg1: i32) -> (i32, i32) {
    %c0_i32 = arith.constant 0 : i32
    %c0_i32_0 = arith.constant 0 : i32
    %c0_i32_1 = arith.constant 0 : i32
    return %c0_i32, %c0_i32_0 : i32, i32
  }
  func.func @transform_12(%arg0: i32, %arg1: i32) -> (i32, i32) {
    %c0_i32 = arith.constant 0 : i32
    %c0_i32_0 = arith.constant 0 : i32
    %c0_i32_1 = arith.constant 0 : i32
    return %c0_i32, %c0_i32_0 : i32, i32
  }
  func.func @transform_13(%arg0: i32, %arg1: i32) -> (i32, i32, i32) {
    %c0_i32 = arith.constant 0 : i32
    %c0_i32_0 = arith.constant 0 : i32
    return %arg0, %arg1, %c0_i32 : i32, i32, i32
  }
}

</mosaic_0001>

<bundles_post_ra>
// kernel: tpu_custom_call.1
= control target key start
LH: loop header
LB: loop body
LE: loop exit
PB: predicated region body
PF: predicated region fallthrough
CT: control target
= control target key end

     0   :  { %s7237_s0 = inlined_call_operand.hbm [shape: f32[4,8,32], index: 0, kind: input, shape index: {}]   ;;  %s7238_s1 = inlined_call_operand.hbm [shape: f32[1,32], index: 1, kind: input, shape index: {}]   ;;  %s7239_s2 = inlined_call_operand.hbm [shape: f32[1,32], index: 2, kind: input, shape index: {}]   ;;  %s7240_s3 = inlined_call_operand.hbm [shape: bf16[4,32,512], index: 3, kind: input, shape index: {}]   ;;  %s7241_s4 = inlined_call_operand.hbm [shape: f32[4,1,512], index: 4, kind: input, shape index: {}]   ;;  %s7242_s5 = inlined_call_operand.hbm [shape: bf16[4,512,512], index: 5, kind: input, shape index: {}]   ;;  %s7243_s6 = inlined_call_operand.hbm [shape: f32[4,1,512], index: 6, kind: input, shape index: {}]   ;;  %s7244_s7 = inlined_call_operand.hbm [shape: bf16[4,512,512], index: 7, kind: input, shape index: {}]   ;;  %s7245_s8 = inlined_call_operand.hbm [shape: f32[4,1,512], index: 8, kind: input, shape index: {}]   ;;  %s7246_s9 = inlined_call_operand.hbm [shape: bf16[4,512,128], index: 9, kind: input, shape index: {}]   ;;  %s7247_s10 = inlined_call_operand.hbm [shape: f32[4,1,128], index: 10, kind: input, shape index: {}]   ;;  %s7248_s11 = inlined_call_operand.hbm [shape: f32[1,128], index: 11, kind: input, shape index: {}]   ;;  %s7249_s12 = inlined_call_operand.hbm [shape: f32[1,128], index: 12, kind: input, shape index: {}]   ;;  %s7250_s13 = inlined_call_operand.hbm [shape: f32[4,8,128], index: 13, kind: output, shape index: {}]  }
   0x1   :  { %7267 = sst [smem:[#allocation43_spill]] %s7237_s0 }
   0x2   :  { %7268 = sst [smem:[#allocation44_spill]] %s7238_s1 }
   0x3   :  { %7269 = sst [smem:[#allocation45_spill]] %s7240_s3 }
   0x4   :  { %7270 = sst [smem:[#allocation46_spill]] %s7242_s5 }
   0x5   :  { %7271 = sst [smem:[#allocation47_spill]] %s7247_s10 }
   0x6   :  { %7272 = sst [smem:[#allocation48_spill]] %s7248_s11 }
   0x7   :  { %7273 = sst [smem:[#allocation49_spill]] %s7250_s13 }
   0x8   :  { %18 = vsyncpa [#allocation3], 0 }
   0x9   :  { %20 = vsyncpa [#allocation3 + $0x1], 0 }
   0xa   :  { %21 = vsyncpa [#allocation6], 0 }
   0xb   :  { %22 = vsyncpa [#allocation9], 0 }
   0xc   :  { %24 = vsyncpa [#allocation9 + $0x1], 0 }
   0xd   :  { %25 = vsyncpa [#allocation12], 0 }
   0xe   :  { %27 = vsyncpa [#allocation12 + $0x1], 0 }
   0xf   :  { %28 = vsyncpa [#allocation15], 0 }
  0x10   :  { %30 = vsyncpa [#allocation15 + $0x1], 0 }
  0x11   :  { %31 = vsyncpa [#allocation18], 0 }
  0x12   :  { %33 = vsyncpa [#allocation18 + $0x1], 0 }
  0x13   :  { %34 = vsyncpa [#allocation21], 0 }
  0x14   :  { %35 = vsyncpa [#allocation4], 0 }
  0x15   :  { %37 = vsyncpa [#allocation4 + $0x1], 0  ;;  %s6192_s25 = smov 0   ;;  %s6194_s26 = smov 0  }
  0x16   :  { %s6196_s27 = smov 0   ;;  %s6198_s28 = smov 0  }
  0x17   :  { %s6200_s29 = smov 0   ;;  %s6202_s30 = smov 0  }
  0x18 LB: > { %7274 = sst [smem:[#allocation32_spill]] %s6092_s25  ;;  %s6223_s14 = sadd.s32 4294967295, %s6112_s30   ;;  %s6112_s30 = sphi %s6202_s30, %s43_s30   ;;  %s6108_s29 = sphi %s6200_s29, %s7317_s29   ;;  %s6104_s28 = sphi %s6198_s28, %s7316_s28   ;;  %s6100_s27 = sphi %s6196_s27, %s7315_s27   ;;  %s6096_s26 = sphi %s6194_s26, %s7314_s26   ;;  %s6092_s25 = sphi %s6192_s25, %s7311_s25  }
  0x19   : > { %7275 = sst [smem:[#allocation33_spill]] %s6096_s26  ;;  %s3863_s15 = sadd.s32 4294967294, %s6112_s30  }
  0x1a   : > { %7276 = sst [smem:[#allocation34_spill]] %s6104_s28  ;;  %p71_p0 = scmp.ne.s32.totalorder %s6100_s27, %s6096_s26 }
  0x1b   : > { %7277 = sst [smem:[#allocation35_spill]] %s6112_s30  ;;  %p72_p1 = scmp.eq.s32.totalorder %s6112_s30, 0 }
  0x1c   : > { %7278 = sst [smem:[#allocation36_spill]] %s6223_s14  ;;  %p77_p2 = scmp.ne.s32.totalorder %s6096_s26, %s6092_s25 }
  0x1d   : > { %p78_p3 = scmp.eq.s32.totalorder %s6223_s14, 0  ;;  %p395_p4 = scmp.eq.s32.totalorder %s6223_s14, 3 }
  0x1e   : > { %p6234_p5 = por %p72_p1, %p71_p0  ;;  %p401_p6 = scmp.eq.s32.totalorder %s3863_s15, 3 }
  0x1f   : > { %p6240_p7 = por %p78_p3, %p77_p2  ;;  %p6244_p8 = por %p395_p4, %p71_p0 }
  0x20   : > { %p6248_p9 = por %p401_p6, %p77_p2  ;;  %p3864_p10 = scmp.ge.s32.totalorder %s6112_s30, 1 }
  0x21   : > { %s7280_s18 = scalar_select %p6240_p7, 1, 0 }
  0x22   : > { %s7282_s19 = scalar_select %p6244_p8, 1, 0 }
  0x23   : > { %7281 = sst [smem:[#allocation37_spill]] %s7280_s18  ;;  %p408_p11 = scmp.lt.s32.totalorder %s6112_s30, 5 }
  0x24   : > { %7283 = sst [smem:[#allocation38_spill]] %s7282_s19  ;;  %s6114_s15 = smov [#allocation5]  }
  0x25   : > { %s7284_s20 = scalar_select %p6248_p9, 1, 0 }
  0x26   : > { %s7286_s1 = sld [smem:[#allocation44_spill]]  ;;  %p6257_p12 = pnand %p3864_p10, %p408_p11 }
  0x27   : > { %7285 = sst [smem:[#allocation39_spill]] %s7284_s20  ;;  %s422_s16 = sshll.u32 %s6114_s15, 4  ;;  %s423_s16 = int_to_ptr.vmem [resolvable:$true] %s422_s16 }
  0x28   : > { %s7287_s24 = scalar_select %p6257_p12, 1, 0 }
  0x29   : > { %p5444_p13 = pneg %p6257_p12  ;;  %p5493_p0 = scmp.lt.s32.totalorder %s6112_s30, 4 }
  0x2a   : > { %7288 = sst [smem:[#allocation40_spill]] %s7287_s24  ;;  %s6284_s25 = sand.u32 1, %s6100_s27  }
  0x2b   : > { %s7289_s11 = sld [smem:[#allocation48_spill]]  ;;  %p6269_p1 = pnand %p5444_p13, %p78_p3 }
  0x2c   : > { %s420_s23 = sshll.u32 %s7286_s1, 4  ;;  %p6275_p2 = pnand %p5493_p0, %p6234_p5  ;;  %s421_s23 = int_to_ptr.hbm [resolvable:$true] %s420_s23 }
  0x2d   : > { %s6115_s1 = smov [#allocation20]   ;;  %s6287_s20 = sand.u32 1, %s6112_s30  }
  0x2e   : > { %s446_s19 = sshll.u32 %s6115_s1, 4  ;;  %s55_s17 = sadd.s32 1, %s6108_s29  ;;  %s447_s19 = int_to_ptr.vmem [resolvable:$true] %s446_s19 }
  0x2f   : > { %5447 = dma.hbm_to_vmem [thread:$0]  (!%p6269_p1), %s421_s23, 16, %s423_s16, [#allocation6]  }
  0x30   : > { %p57_p4 = scmp.ge.s32.totalorder %s55_s17, 4  ;;  %s5108_s1 = sshll.u32 %s6108_s29, 6 }
  0x31   : > { %s444_s21 = sshll.u32 %s7289_s11, 4  ;;  %s3872_s11 = sshll.u32 %s6284_s25, 6  ;;  %s445_s21 = int_to_ptr.hbm [resolvable:$true] %s444_s21 }
  0x32   : > { %5453 = dma.hbm_to_vmem [thread:$0]  (!%p6269_p1), %s445_s21, 16, %s447_s19, [#allocation21]  }
  0x33   : > { %s7319_s17 = smov (%p57_p4, %s55_s17), 0  ;;  %s7293_s3 = sld [smem:[#allocation45_spill]] }
  0x34   : > { %7292 = sst [smem:[#allocation41_spill]] %s7319_s17  ;;  %s493_s21 = scalar_lea.vmem [#allocation8], %s3872_s11 }
  0x35   : > { %s501_s13 = sshll.u32 %s493_s21, 4  ;;  %s59_s30 = ssub.s32 %s6108_s29, %s7319_s17  ;;  %s502_s13 = int_to_ptr.vmem [resolvable:$true] %s501_s13 }
  0x36   : > { %p62_p5 = scmp.eq.s32.totalorder %s59_s30, 0  ;;  %s7294_s14 = sadd.s32 1, %s6100_s27 }
  0x37   : > { %s7264_s26 = scalar_lea.sflag [#allocation9], %s6287_s20  ;;  %s6116_s24 = smov 256  }
  0x38   : > { %s6302_s18 = scalar_select %p62_p5, %s6100_s27, %s7294_s14  }
  0x39   : > { %s498_s23 = scalar_lea.hbm %s7293_s3, %s5108_s1  ;;  %s6117_s10 = smov 16  }
  0x3a   : > { %s499_s28 = sshll.u32 %s498_s23, 4  ;;  %7295 = sst [smem:[#allocation42_spill]] %s6302_s18  ;;  %s500_s28 = int_to_ptr.hbm [resolvable:$true] %s499_s28 }
  0x3b   : > { %5463 = dma.hbm_to_vmem [thread:$0]  (!%p6275_p2), %s500_s28, 1024, %s502_s13, %s7264_s26, %s6116_s24, %s6116_s24, %s6117_s10  }
  0x3c   : > { %s3877_s1 = sshll.u32 %s6284_s25, 10  ;;  %s5109_s11 = sshll.u32 %s6108_s29, 10 }
  0x3d   : > { %s7296_s5 = sld [smem:[#allocation46_spill]]  ;;  %s534_s14 = scalar_lea.vmem [#allocation11], %s3877_s1 }
  0x3e   : > { %s542_s21 = sshll.u32 %s534_s14, 4  ;;  %s531_s3 = scalar_lea.sflag [#allocation12], %s6287_s20  ;;  %s543_s21 = int_to_ptr.vmem [resolvable:$true] %s542_s21 }
  0x3f   : > { %s580_s26 = scalar_lea.hbm %s7244_s7, %s5109_s11  ;;  %s575_s16 = scalar_lea.vmem [#allocation14], %s3877_s1 }
  0x40   : > { %s583_s19 = sshll.u32 %s575_s16, 4  ;;  %s581_s17 = sshll.u32 %s580_s26, 4  ;;  %s584_s19 = int_to_ptr.vmem [resolvable:$true] %s583_s19  ;;  %s582_s17 = int_to_ptr.hbm [resolvable:$true] %s581_s17 }
  0x41   : > { %s3887_s14 = sshll.u32 %s6284_s25, 8  ;;  %s7266_s26 = scalar_lea.sflag [#allocation18], %s6287_s20 }
  0x42   : > { %s616_s13 = scalar_lea.vmem [#allocation17], %s3887_s14  ;;  %s6118_s28 = smov 64  }
  0x43   : > { %s539_s30 = scalar_lea.hbm %s7296_s5, %s5109_s11  ;;  %s5111_s5 = sshll.u32 %s6108_s29, 8 }
  0x44   : > { %s540_s23 = sshll.u32 %s539_s30, 4  ;;  %s572_s30 = scalar_lea.sflag [#allocation15], %s6287_s20  ;;  %s541_s23 = int_to_ptr.hbm [resolvable:$true] %s540_s23 }
  0x45   : > { %5469 = dma.hbm_to_vmem [thread:$0]  (!%p6275_p2), %s541_s23, 16384, %s543_s21, %s531_s3, %s6116_s24, %s6116_s24, %s6117_s10  }
  0x46   : > { %5475 = dma.hbm_to_vmem [thread:$0]  (!%p6275_p2), %s582_s17, 16384, %s584_s19, %s572_s30, %s6116_s24, %s6116_s24, %s6117_s10  }
  0x47   : > { %s621_s21 = scalar_lea.hbm %s7246_s9, %s5111_s5  ;;  %s624_s1 = sshll.u32 %s616_s13, 4  ;;  %s625_s1 = int_to_ptr.vmem [resolvable:$true] %s624_s1 }
  0x48   : > { %s622_s11 = sshll.u32 %s621_s21, 4  ;;  %s6119_s16 = smov 4   ;;  %s623_s11 = int_to_ptr.hbm [resolvable:$true] %s622_s11 }
  0x49   : > { %5481 = dma.hbm_to_vmem [thread:$0]  (!%p6275_p2), %s623_s11, 4096, %s625_s1, %s7266_s26, %s6118_s28, %s6118_s28, %s6119_s16  }
  0x4a   : > { %s432_s18 = sshll.u32 %s7239_s2, 4  ;;  %s6120_s5 = smov [#allocation7]   ;;  %s433_s18 = int_to_ptr.hbm [resolvable:$true] %s432_s18 }
  0x4b   : > { %s434_s17 = sshll.u32 %s6120_s5, 4  ;;  %s456_s23 = sshll.u32 %s7249_s12, 4  ;;  %s435_s17 = int_to_ptr.vmem [resolvable:$true] %s434_s17  ;;  %s457_s23 = int_to_ptr.hbm [resolvable:$true] %s456_s23 }
  0x4c   : > { %5450 = dma.hbm_to_vmem [thread:$0]  (!%p6269_p1), %s433_s18, 16, %s435_s17, [#allocation6]  }
  0x4d   : > { %s6121_s21 = smov [#allocation22]   ;;  %s3870_s13 = sshll.u32 %s6284_s25, 3 }
  0x4e   : > { %s458_s11 = sshll.u32 %s6121_s21, 4  ;;  %s3871_s1 = sshll.u32 %s6108_s29, 3  ;;  %s459_s11 = int_to_ptr.vmem [resolvable:$true] %s458_s11 }
  0x4f   : > { %5456 = dma.hbm_to_vmem [thread:$0]  (!%p6269_p1), %s457_s23, 16, %s459_s11, [#allocation21]  }
  0x50   : > { %s7297_s0 = sld [smem:[#allocation43_spill]]  ;;  %s473_s24 = scalar_lea.vmem [#allocation2], %s3870_s13 }
  0x51   : > { %s482_s5 = sshll.u32 %s473_s24, 4  ;;  %s3875_s18 = sshll.u32 %s6284_s25, 2  ;;  %s483_s5 = int_to_ptr.vmem [resolvable:$true] %s482_s5 }
  0x52   : > { %s470_s17 = scalar_lea.sflag [#allocation3], %s6284_s25  ;;  %s3876_s22 = sshll.u32 %s6108_s29, 2 }
  0x53   : > { %s519_s21 = scalar_lea.hbm %s7241_s4, %s3876_s22  ;;  %s515_s11 = scalar_lea.vmem [#allocation10], %s3875_s18 }
  0x54   : > { %s521_s28 = sshll.u32 %s519_s21, 4  ;;  %s7298_s13 = scalar_lea.sflag [#allocation9], %s6287_s20  ;;  %s522_s28 = int_to_ptr.hbm [resolvable:$true] %s521_s28 }
  0x55   : > { %s560_s24 = scalar_lea.hbm %s7243_s6, %s3876_s22  ;;  %s601_s21 = scalar_lea.hbm %s7245_s8, %s3876_s22 }
  0x56   : > { %s478_s10 = scalar_lea.hbm %s7297_s0, %s3871_s1  ;;  %s523_s1 = sshll.u32 %s515_s11, 4  ;;  %s524_s1 = int_to_ptr.vmem [resolvable:$true] %s523_s1 }
  0x57   : > { %s480_s19 = sshll.u32 %s478_s10, 4  ;;  %s597_s11 = scalar_lea.vmem [#allocation16], %s3875_s18  ;;  %s481_s19 = int_to_ptr.hbm [resolvable:$true] %s480_s19 }
  0x58   : > { %5460 = dma.hbm_to_vmem [thread:$0]  (!%p6275_p2), %s481_s19, 128, %s483_s5, %s470_s17  }
  0x59   : > { %5466 = dma.hbm_to_vmem [thread:$0]  (!%p6275_p2), %s522_s28, 64, %s524_s1, %s7298_s13  }
  0x5a   : > { %s556_s5 = scalar_lea.vmem [#allocation13], %s3875_s18  ;;  %s562_s17 = sshll.u32 %s560_s24, 4  ;;  %s563_s17 = int_to_ptr.hbm [resolvable:$true] %s562_s17 }
  0x5b   : > { %s564_s19 = sshll.u32 %s556_s5, 4  ;;  %s605_s1 = sshll.u32 %s597_s11, 4  ;;  %s565_s19 = int_to_ptr.vmem [resolvable:$true] %s564_s19  ;;  %s606_s1 = int_to_ptr.vmem [resolvable:$true] %s605_s1 }
  0x5c   : > { %5472 = dma.hbm_to_vmem [thread:$0]  (!%p6275_p2), %s563_s17, 64, %s565_s19, %s531_s3  }
  0x5d   : > { %s603_s28 = sshll.u32 %s601_s21, 4  ;;  %s7299_s10 = sld [smem:[#allocation47_spill]]  ;;  %s604_s28 = int_to_ptr.hbm [resolvable:$true] %s603_s28 }
  0x5e   : > { %5478 = dma.hbm_to_vmem [thread:$0]  (!%p6275_p2), %s604_s28, 64, %s606_s1, %s572_s30  }
  0x5f   : > { %s637_s5 = scalar_lea.vmem [#allocation19], %s6284_s25  ;;  %s7300_s3 = scalar_lea.sflag [#allocation18], %s6287_s20 }
  0x60   : > { %s644_s26 = sshll.u32 %s637_s5, 4  ;;  %s7302_s22 = sld [smem:[#allocation33_spill]] (!%p6257_p12)  ;;  %s645_s26 = int_to_ptr.vmem [resolvable:$true] %s644_s26 }
  0x61   : > { %653 = sbr.rel (%p6257_p12) target bundleno = 972 (0x3cc), region = 72 }
  0x63   : > { %s640_s24 = scalar_lea.hbm %s7299_s10, %s6108_s29 }
  0x64   : > { %s642_s0 = sshll.u32 %s640_s24, 4  ;;  %s643_s0 = int_to_ptr.hbm [resolvable:$true] %s642_s0 }
  0x65   : > { %5484 = dma.hbm_to_vmem [thread:$0]  (!%p6275_p2), %s643_s0, 16, %s645_s26, %s7300_s3  }
  0x66   : > { %s6390_s17 = sand.u32 1, %s7302_s22  }
  0x67   : > { %s3891_s30 = sshll.u32 %s6390_s17, 3  ;;  %s656_s14 = scalar_lea.sflag [#allocation3], %s6390_s17 }
  0x68   : > { %s6396_s25 = scalar_lea.vmem [#allocation2], %s3891_s30 }
  0x69   : > { %6059 = dma.done.wait (%p6240_p7), %s656_s14, 128  }
  0x6a   : > { %6061 = vsyncadd (%p6240_p7), %s656_s14, 4294967168  ;;  %s7304_s0 = sld [smem:[#allocation36_spill]] }
  0x6b   : > { %6063 = dma.done.wait (%p78_p3), [#allocation6], 32  }
  0x6c   : > { %6065 = vsyncadd (%p78_p3), [#allocation6], 4294967264  ;;  %s3894_s20 = sshll.u32 %s6390_s17, 6 }
  0x6d   : > { %s6408_s23 = scalar_lea.vmem [#allocation8], %s3894_s20 }
  0x70   : > { %s675_s15 = sand.u32 1, %s7304_s0  }
  0x71   : > { %s676_s26 = scalar_lea.sflag [#allocation9], %s675_s15 }
  0x72   : > { %6067 = dma.done.wait (%p6240_p7), %s676_s26, 1088  }
  0x73   : > { %6069 = vsyncadd (%p6240_p7), %s676_s26, 4294966208  ;;  %s6415_s21 = sshll.u32 %s6390_s17, 2  ;;  %s3896_s11 = sshll.u32 %s6390_s17, 10 }
  0x74   : > { %s689_s1 = scalar_lea.vmem [#allocation10], %s6415_s21  ;;  %s696_s28 = scalar_lea.sflag [#allocation12], %s675_s15 }
  0x75   : > { %s6419_s13 = scalar_lea.vmem [#allocation11], %s3896_s11 }
  0x76   : > { %6071 = dma.done.wait (%p6240_p7), %s696_s28, 16448  }
  0x77   : > { %6073 = vsyncadd (%p6240_p7), %s696_s28, 4294950848  ;;  %s709_s16 = scalar_lea.vmem [#allocation13], %s6415_s21  ;;  %s716_s10 = scalar_lea.sflag [#allocation15], %s675_s15 }
  0x78   : > { %s6426_s24 = scalar_lea.vmem [#allocation14], %s3896_s11 }
  0x79   : > { %6075 = dma.done.wait (%p6240_p7), %s716_s10, 16448  }
  0x7a   : > { %6077 = vsyncadd (%p6240_p7), %s716_s10, 4294950848  ;;  %s3900_s5 = sshll.u32 %s6390_s17, 8  ;;  %s729_s3 = scalar_lea.vmem [#allocation16], %s6415_s21 }
  0x7b   : > { %s736_s18 = scalar_lea.sflag [#allocation18], %s675_s15  ;;  %s6434_s22 = scalar_lea.vmem [#allocation17], %s3900_s5 }
  0x7c   : > { %6079 = dma.done.wait (%p6240_p7), %s736_s18, 4112  }
  0x7d   : > { %6081 = vsyncadd (%p6240_p7), %s736_s18, 4294963184  ;;  %s748_s14 = scalar_lea.vmem [#allocation19], %s6390_s17 }
  0x7e   : > { %6083 = dma.done.wait (%p78_p3), [#allocation21], 32  }
  0x7f   : > { %6085 = vsyncadd (%p78_p3), [#allocation21], 4294967264  ;;  %v3922_v0 = vld [vmem:[%s6408_s23 + $0x20] sm:$0xf]  ;;  %v5118_v1 = vld [vmem:[%s6408_s23 + $0x2c] sm:$0xf0] }
  0x80   : > { %v5116_v2 = vld [vmem:[%s6408_s23 + $0x24] sm:$0xf]  ;;  %v3923_v3 = vor.u32 %v5118_v1, %v3922_v0  ;;  %v3924_v4 = vld [vmem:[%s6408_s23 + $0x30] sm:$0xf0]  ;;  %v3930_v5 = vld [vmem:[%s6408_s23 + $0x28] sm:$0xf] }
  0x81   : > { %v5119_v6 = vld [vmem:[%s6408_s23 + $0x34] sm:$0xf0]  ;;  %v3927_v7 = vor.u32 %v5116_v2, %v3924_v4  ;;  %v5117_v9 = vld [vmem:[%s6408_s23 + $0x2c] sm:$0xf]  ;;  %v3932_v10 = vld [vmem:[%s6408_s23 + $0x38] sm:$0xf0] }
  0x82   : > { %v3931_v8 = vor.u32 %v5119_v6, %v3930_v5  ;;  %v3906_v11 = vld [vmem:[%s6408_s23] sm:$0xf]  ;;  %922 = vmatpush.bf16.msra.mxu0 %v3923_v3  ;;  %v3935_v12 = vor.u32 %v5117_v9, %v3932_v10  ;;  %v5114_v13 = vld [vmem:[%s6408_s23 + $0xc] sm:$0xf0]  ;;  %v5112_v14 = vld [vmem:[%s6408_s23 + $0x4] sm:$0xf] }
  0x83   : > { %v3908_v15 = vld [vmem:[%s6408_s23 + $0x10] sm:$0xf0]  ;;  %935 = vmatpush.bf16.msra.mxu1 %v3927_v7  ;;  %v3907_v16 = vor.u32 %v5114_v13, %v3906_v11  ;;  %v3914_v18 = vld [vmem:[%s6408_s23 + $0x8] sm:$0xf]  ;;  %v5115_v19 = vld [vmem:[%s6408_s23 + $0x14] sm:$0xf0] }
  0x84   : > { %948 = vmatpush.bf16.msra.mxu2 %v3931_v8  ;;  %v3911_v17 = vor.u32 %v5112_v14, %v3908_v15  ;;  %v5113_v20 = vld [vmem:[%s6408_s23 + $0xc] sm:$0xf]  ;;  %961 = vmatpush.bf16.msra.mxu3 %v3935_v12  ;;  %v3915_v21 = vor.u32 %v5115_v19, %v3914_v18  ;;  %v3916_v22 = vld [vmem:[%s6408_s23 + $0x18] sm:$0xf0]  ;;  %v4058_v27 = vld [vmem:[%s6419_s13 + $0xe0] sm:$0xf] }
  0x85   : > { %v842_v23 = vld [vmem:[%s6396_s25] sm:$0xff]  ;;  %v3919_v24 = vor.u32 %v5113_v20, %v3916_v22  ;;  %v5555_v25 = vld [vmem:[#allocation5] ss:$0 sm:$0xff]  ;;  %v5556_v26 = vld [vmem:[#allocation7] ss:$0 sm:$0xff]  ;;  %vm912_vm0 = vcmask 261120  }
  0x86   : > { %923 = vmatpush.bf16.msra.mxu0 %v3907_v16  ;;  %v5150_v28 = vld [vmem:[%s6419_s13 + $0xec] sm:$0xf0]  ;;  %v4186_v29 = vld [vmem:[%s6419_s13 + $0x1e0] sm:$0xf]  ;;  %v847_v30 = vsub.f32 %v842_v23, %v5555_v25  ;;  %s7305_s19 = sld [smem:[#allocation34_spill]]  ;;  %s840_s21 = scalar_lea.vmem [#allocation23], %s3891_s30 }
  0x87   : > { %936 = vmatpush.bf16.msra.mxu1 %v3911_v17  ;;  %v4059_v31 = vor.u32 %v5150_v28, %v4058_v27  ;;  %v5182_v32 = vld [vmem:[%s6419_s13 + $0x1ec] sm:$0xf0]  ;;  %v4042_v33 = vld [vmem:[%s6419_s13 + $0xc0] sm:$0xf]  ;;  %s7306_s20 = sld [smem:[#allocation49_spill]]  ;;  %s3573_s11 = sshll.u32 %s840_s21, 4  ;;  %s3574_s11 = int_to_ptr.vmem [resolvable:$true] %s3573_s11 }
  0x88   : > { %949 = vmatpush.bf16.msra.mxu2 %v3915_v21  ;;  %v5146_v34 = vld [vmem:[%s6419_s13 + $0xcc] sm:$0xf0]  ;;  %962 = vmatpush.bf16.msra.mxu3 %v3919_v24  ;;  %v4187_v35 = vor.u32 %v5182_v32, %v4186_v29  ;;  %v4170_v36 = vld [vmem:[%s6419_s13 + $0x1c0] sm:$0xf]  ;;  %v852_v39 = vmul.f32 %v5556_v26, %v847_v30  ;;  %s3560_s28 = scalar_lea.sflag [#allocation4], %s6390_s17 }
  0x89   : > { %v5178_v37 = vld [vmem:[%s6419_s13 + $0x1cc] sm:$0xf0]  ;;  %v4314_v38 = vld [vmem:[%s6419_s13 + $0x2e0] sm:$0xf]  ;;  %v4043_v48 = vor.u32 %v5146_v34, %v4042_v33 }
  0x8a   : > { %1830 = vmatpush.bf16.msrb.mxu0 %v4059_v31  ;;  %v5214_v40 = vld [vmem:[%s6419_s13 + $0x2ec] sm:$0xf0]  ;;  %v4442_v41 = vld [vmem:[%s6419_s13 + $0x3e0] sm:$0xf]  ;;  %v853_v47 = vpack.c.bf16 %v852_v39, %v852_v39  ;;  %v4171_v49 = vor.u32 %v5178_v37, %v4170_v36 }
  0x8b   : > { %v5246_v42 = vld [vmem:[%s6419_s13 + $0x3ec] sm:$0xf0]  ;;  %1843 = vmatpush.bf16.msrb.mxu1 %v4187_v35  ;;  %v4315_v43 = vor.u32 %v5214_v40, %v4314_v38  ;;  %v4026_v45 = vld [vmem:[%s6419_s13 + $0xa0] sm:$0xf] }
  0x8c   : > { %v4443_v44 = vor.u32 %v5246_v42, %v4442_v41  ;;  %v5142_v46 = vld [vmem:[%s6419_s13 + $0xac] sm:$0xf0]  ;;  %v4154_v50 = vld [vmem:[%s6419_s13 + $0x1a0] sm:$0xf]  ;;  %3936 = vmatmul.msk.bf16.vlgmr.msra.gmra.mxu0 %vm912_vm0, %v853_v47  ;;  %3937 = vmatmul.msk.bf16.vlgmr.msra.gmra.mxu1 %vm912_vm0, %v853_v47  ;;  %s5105_s25 = sshll.u32 %s7305_s19, 3 }
  0x8d   : > { %v4298_v51 = vld [vmem:[%s6419_s13 + $0x2c0] sm:$0xf]  ;;  %v5210_v52 = vld [vmem:[%s6419_s13 + $0x2cc] sm:$0xf0]  ;;  %1856 = vmatpush.bf16.msrb.mxu2 %v4315_v43  ;;  %3939 = vmatmul.msk.bf16.vlgmr.msra.gmra.mxu3 %vm912_vm0, %v853_v47  ;;  %v4027_v61 = vor.u32 %v5142_v46, %v4026_v45  ;;  %s3571_s26 = scalar_lea.hbm %s7306_s20, %s5105_s25  ;;  %s6026_s30 = scalar_lea.hbm %s7306_s20, 32 }
  0x8e   : > { %1869 = vmatpush.bf16.msrb.mxu3 %v4443_v44  ;;  %v5174_v53 = vld [vmem:[%s6419_s13 + $0x1ac] sm:$0xf0]  ;;  %v4299_v54 = vor.u32 %v5210_v52, %v4298_v51  ;;  %v4426_v55 = vld [vmem:[%s6419_s13 + $0x3c0] sm:$0xf]  ;;  %3938 = vmatmul.msk.bf16.vlgmr.msra.gmra.mxu2 %vm912_vm0, %v853_v47  ;;  %v4060_v51 = vld [vmem:[%s6419_s13 + $0xf0] sm:$0xf0] }
  0x8f   : > { %v5242_v56 = vld [vmem:[%s6419_s13 + $0x3cc] sm:$0xf0]  ;;  %v4282_v58 = vld [vmem:[%s6419_s13 + $0x2a0] sm:$0xf]  ;;  %1831 = vmatpush.bf16.msrb.mxu0 %v4043_v48  ;;  %1844 = vmatpush.bf16.msrb.mxu1 %v4171_v49  ;;  %v4155_v62 = vor.u32 %v5174_v53, %v4154_v50  ;;  %v5148_v50 = vld [vmem:[%s6419_s13 + $0xe4] sm:$0xf] }
  0x90   : > { %v4427_v57 = vor.u32 %v5242_v56, %v4426_v55  ;;  %v5206_v59 = vld [vmem:[%s6419_s13 + $0x2ac] sm:$0xf0]  ;;  %v4410_v60 = vld [vmem:[%s6419_s13 + $0x3a0] sm:$0xf]  ;;  %v4063_v52 = vor.u32 %v5148_v50, %v4060_v51  ;;  %v5180_v53 = vld [vmem:[%s6419_s13 + $0x1e4] sm:$0xf] }
  0x91   : > { %v4010_v63 = vld [vmem:[%s6419_s13 + $0x80] sm:$0xf]  ;;  %v5138_v0 = vld [vmem:[%s6419_s13 + $0x8c] sm:$0xf0]  ;;  %1857 = vmatpush.bf16.msrb.mxu2 %v4299_v54  ;;  %v4283_v4 = vor.u32 %v5206_v59, %v4282_v58  ;;  %v4188_v54 = vld [vmem:[%s6419_s13 + $0x1f0] sm:$0xf0] }
  0x92   : > { %v5238_v1 = vld [vmem:[%s6419_s13 + $0x3ac] sm:$0xf0]  ;;  %1870 = vmatpush.bf16.msrb.mxu3 %v4427_v57  ;;  %v4138_v2 = vld [vmem:[%s6419_s13 + $0x180] sm:$0xf]  ;;  %v4011_v11 = vor.u32 %v5138_v0, %v4010_v63  ;;  %v4191_v56 = vor.u32 %v5180_v53, %v4188_v54  ;;  %v4044_v63 = vld [vmem:[%s6419_s13 + $0xd0] sm:$0xf0] }
  0x93   : > { %v5170_v3 = vld [vmem:[%s6419_s13 + $0x18c] sm:$0xf0]  ;;  %v4411_v5 = vor.u32 %v5238_v1, %v4410_v60  ;;  %v4266_v6 = vld [vmem:[%s6419_s13 + $0x280] sm:$0xf]  ;;  %1832 = vmatpush.bf16.msrb.mxu0 %v4027_v61  ;;  %1845 = vmatpush.bf16.msrb.mxu1 %v4155_v62  ;;  %v5144_v62 = vld [vmem:[%s6419_s13 + $0xc4] sm:$0xf] }
  0x94   : > { %v5202_v7 = vld [vmem:[%s6419_s13 + $0x28c] sm:$0xf0]  ;;  %v4394_v8 = vld [vmem:[%s6419_s13 + $0x380] sm:$0xf]  ;;  %v4139_v12 = vor.u32 %v5170_v3, %v4138_v2  ;;  %v5176_v0 = vld [vmem:[%s6419_s13 + $0x1c4] sm:$0xf]  ;;  %v4047_v1 = vor.u32 %v5144_v62, %v4044_v63 }
  0x95   : > { %v5234_v9 = vld [vmem:[%s6419_s13 + $0x38c] sm:$0xf0]  ;;  %v3994_v10 = vld [vmem:[%s6419_s13 + $0x60] sm:$0xf]  ;;  %1858 = vmatpush.bf16.msrb.mxu2 %v4283_v4  ;;  %v4267_v16 = vor.u32 %v5202_v7, %v4266_v6  ;;  %v4172_v2 = vld [vmem:[%s6419_s13 + $0x1d0] sm:$0xf0] }
  0x96   : > { %v5134_v13 = vld [vmem:[%s6419_s13 + $0x6c] sm:$0xf0]  ;;  %v4122_v14 = vld [vmem:[%s6419_s13 + $0x160] sm:$0xf]  ;;  %1871 = vmatpush.bf16.msrb.mxu3 %v4411_v5  ;;  %v4395_v17 = vor.u32 %v5234_v9, %v4394_v8  ;;  %v4175_v5 = vor.u32 %v5176_v0, %v4172_v2  ;;  %v5212_v9 = vld [vmem:[%s6419_s13 + $0x2e4] sm:$0xf] }
  0x97   : > { %v5166_v15 = vld [vmem:[%s6419_s13 + $0x16c] sm:$0xf0]  ;;  %v4250_v18 = vld [vmem:[%s6419_s13 + $0x260] sm:$0xf]  ;;  %1833 = vmatpush.bf16.msrb.mxu0 %v4011_v11  ;;  %1846 = vmatpush.bf16.msrb.mxu1 %v4139_v12  ;;  %v3995_v22 = vor.u32 %v5134_v13, %v3994_v10  ;;  %v4316_v11 = vld [vmem:[%s6419_s13 + $0x2f0] sm:$0xf0] }
  0x98   : > { %v5198_v19 = vld [vmem:[%s6419_s13 + $0x26c] sm:$0xf0]  ;;  %v4378_v20 = vld [vmem:[%s6419_s13 + $0x360] sm:$0xf]  ;;  %v4123_v23 = vor.u32 %v5166_v15, %v4122_v14  ;;  %v5244_v12 = vld [vmem:[%s6419_s13 + $0x3e4] sm:$0xf]  ;;  %v4319_v14 = vor.u32 %v5212_v9, %v4316_v11 }
  0x99   : > { %v5230_v21 = vld [vmem:[%s6419_s13 + $0x36c] sm:$0xf0]  ;;  %v3978_v24 = vld [vmem:[%s6419_s13 + $0x40] sm:$0xf]  ;;  %1859 = vmatpush.bf16.msrb.mxu2 %v4267_v16  ;;  %v4251_v28 = vor.u32 %v5198_v19, %v4250_v18  ;;  %v4444_v13 = vld [vmem:[%s6419_s13 + $0x3f0] sm:$0xf0] }
  0x9a   : > { %1872 = vmatpush.bf16.msrb.mxu3 %v4395_v17  ;;  %v5130_v25 = vld [vmem:[%s6419_s13 + $0x4c] sm:$0xf0]  ;;  %v4106_v26 = vld [vmem:[%s6419_s13 + $0x140] sm:$0xf]  ;;  %v4379_v29 = vor.u32 %v5230_v21, %v4378_v20  ;;  %v4447_v15 = vor.u32 %v5244_v12, %v4444_v13  ;;  %v5140_v16 = vld [vmem:[%s6419_s13 + $0xa4] sm:$0xf] }
  0x9b   : > { %v5162_v27 = vld [vmem:[%s6419_s13 + $0x14c] sm:$0xf0]  ;;  %1834 = vmatpush.bf16.msrb.mxu0 %v3995_v22  ;;  %1847 = vmatpush.bf16.msrb.mxu1 %v4123_v23  ;;  %v3979_v30 = vor.u32 %v5130_v25, %v3978_v24  ;;  %v3962_v32 = vld [vmem:[%s6419_s13 + $0x20] sm:$0xf]  ;;  %v4028_v17 = vld [vmem:[%s6419_s13 + $0xb0] sm:$0xf0] }
  0x9c   : > { %v4107_v31 = vor.u32 %v5162_v27, %v4106_v26  ;;  %v5126_v33 = vld [vmem:[%s6419_s13 + $0x2c] sm:$0xf0]  ;;  %v4090_v34 = vld [vmem:[%s6419_s13 + $0x120] sm:$0xf]  ;;  %v5172_v18 = vld [vmem:[%s6419_s13 + $0x1a4] sm:$0xf]  ;;  %v4031_v19 = vor.u32 %v5140_v16, %v4028_v17 }
  0x9d   : > { %1860 = vmatpush.bf16.msrb.mxu2 %v4251_v28  ;;  %v3963_v35 = vor.u32 %v5126_v33, %v3962_v32  ;;  %v5158_v36 = vld [vmem:[%s6419_s13 + $0x12c] sm:$0xf0]  ;;  %v4234_v38 = vld [vmem:[%s6419_s13 + $0x240] sm:$0xf]  ;;  %v4156_v20 = vld [vmem:[%s6419_s13 + $0x1b0] sm:$0xf0] }
  0x9e   : > { %1873 = vmatpush.bf16.msrb.mxu3 %v4379_v29  ;;  %v4091_v37 = vor.u32 %v5158_v36, %v4090_v34  ;;  %v5194_v39 = vld [vmem:[%s6419_s13 + $0x24c] sm:$0xf0]  ;;  %v4362_v40 = vld [vmem:[%s6419_s13 + $0x340] sm:$0xf]  ;;  %v4159_v21 = vor.u32 %v5172_v18, %v4156_v20  ;;  %v5208_v22 = vld [vmem:[%s6419_s13 + $0x2c4] sm:$0xf] }
  0x9f   : > { %1835 = vmatpush.bf16.msrb.mxu0 %v3979_v30  ;;  %1848 = vmatpush.bf16.msrb.mxu1 %v4107_v31  ;;  %v4235_v41 = vor.u32 %v5194_v39, %v4234_v38  ;;  %v5226_v42 = vld [vmem:[%s6419_s13 + $0x34c] sm:$0xf0]  ;;  %v3946_v44 = vld [vmem:[%s6419_s13] sm:$0xf]  ;;  %v4300_v23 = vld [vmem:[%s6419_s13 + $0x2d0] sm:$0xf0] }
  0xa0   : > { %v4363_v43 = vor.u32 %v5226_v42, %v4362_v40  ;;  %v5122_v45 = vld [vmem:[%s6419_s13 + $0xc] sm:$0xf0]  ;;  %v4074_v46 = vld [vmem:[%s6419_s13 + $0x100] sm:$0xf]  ;;  %v5240_v24 = vld [vmem:[%s6419_s13 + $0x3c4] sm:$0xf]  ;;  %v4303_v25 = vor.u32 %v5208_v22, %v4300_v23 }
  0xa1   : > { %1861 = vmatpush.bf16.msrb.mxu2 %v4235_v41  ;;  %v3947_v47 = vor.u32 %v5122_v45, %v3946_v44  ;;  %v5154_v48 = vld [vmem:[%s6419_s13 + $0x10c] sm:$0xf0]  ;;  %v4218_v55 = vld [vmem:[%s6419_s13 + $0x220] sm:$0xf]  ;;  %v4428_v26 = vld [vmem:[%s6419_s13 + $0x3d0] sm:$0xf0] }
  0xa2   : > { %1874 = vmatpush.bf16.msrb.mxu3 %v4363_v43  ;;  %v4075_v49 = vor.u32 %v5154_v48, %v4074_v46  ;;  %v5190_v57 = vld [vmem:[%s6419_s13 + $0x22c] sm:$0xf0]  ;;  %v4346_v58 = vld [vmem:[%s6419_s13 + $0x320] sm:$0xf]  ;;  %v4431_v27 = vor.u32 %v5240_v24, %v4428_v26  ;;  %v5136_v28 = vld [vmem:[%s6419_s13 + $0x84] sm:$0xf] }
  0xa3   : > { %1836 = vmatpush.bf16.msrb.mxu0 %v3963_v35  ;;  %1849 = vmatpush.bf16.msrb.mxu1 %v4091_v37  ;;  %v5222_v59 = vld [vmem:[%s6419_s13 + $0x32c] sm:$0xf0]  ;;  %v4219_v60 = vor.u32 %v5190_v57, %v4218_v55  ;;  %v4202_v3 = vld [vmem:[%s6419_s13 + $0x200] sm:$0xf]  ;;  %v4012_v29 = vld [vmem:[%s6419_s13 + $0x90] sm:$0xf0] }
  0xa4   : > { %v4347_v61 = vor.u32 %v5222_v59, %v4346_v58  ;;  %v5186_v4 = vld [vmem:[%s6419_s13 + $0x20c] sm:$0xf0]  ;;  %v4330_v7 = vld [vmem:[%s6419_s13 + $0x300] sm:$0xf]  ;;  %v5168_v30 = vld [vmem:[%s6419_s13 + $0x184] sm:$0xf]  ;;  %v4015_v31 = vor.u32 %v5136_v28, %v4012_v29 }
  0xa5   : > { %1862 = vmatpush.bf16.msrb.mxu2 %v4219_v60  ;;  %v4203_v6 = vor.u32 %v5186_v4, %v4202_v3  ;;  %v5218_v8 = vld [vmem:[%s6419_s13 + $0x30c] sm:$0xf0]  ;;  %v4140_v32 = vld [vmem:[%s6419_s13 + $0x190] sm:$0xf0]  ;;  %v5204_v34 = vld [vmem:[%s6419_s13 + $0x2a4] sm:$0xf] }
  0xa6   : > { %1875 = vmatpush.bf16.msrb.mxu3 %v4347_v61  ;;  %v4331_v10 = vor.u32 %v5218_v8, %v4330_v7  ;;  %v4143_v33 = vor.u32 %v5168_v30, %v4140_v32  ;;  %v4284_v35 = vld [vmem:[%s6419_s13 + $0x2b0] sm:$0xf0]  ;;  %v5236_v36 = vld [vmem:[%s6419_s13 + $0x3a4] sm:$0xf]  ;;  %v6563_v43 = vld [vmem:[%s689_s1] sm:$0xf] }
  0xa7   : > { %1837 = vmatpush.bf16.msrb.mxu0 %v3947_v47  ;;  %1850 = vmatpush.bf16.msrb.mxu1 %v4075_v49  ;;  %v4287_v37 = vor.u32 %v5204_v34, %v4284_v35  ;;  %v4412_v38 = vld [vmem:[%s6419_s13 + $0x3b0] sm:$0xf0]  ;;  %v5132_v40 = vld [vmem:[%s6419_s13 + $0x64] sm:$0xf]  ;;  %v865_v57 = vperm.slane %v6563_v43, 1  ;;  %v866_v16 = vperm.slane %v6563_v43, 2 }
  0xa8   : > { %v4415_v39 = vor.u32 %v5236_v36, %v4412_v38  ;;  %v3996_v41 = vld [vmem:[%s6419_s13 + $0x70] sm:$0xf0]  ;;  %v5164_v42 = vld [vmem:[%s6419_s13 + $0x164] sm:$0xf]  ;;  %v867_v17 = vperm.slane %v6563_v43, 3  ;;  %s3575_s1 = sshll.u32 %s3571_s26, 4  ;;  %s3576_s1 = int_to_ptr.hbm [resolvable:$true] %s3575_s1 }
  0xa9   : > { %1863 = vmatpush.bf16.msrb.mxu2 %v4203_v6  ;;  %v3999_v44 = vor.u32 %v5132_v40, %v3996_v41  ;;  %v4124_v45 = vld [vmem:[%s6419_s13 + $0x170] sm:$0xf0]  ;;  %v5200_v47 = vld [vmem:[%s6419_s13 + $0x284] sm:$0xf] }
  0xaa   : > { %1876 = vmatpush.bf16.msrb.mxu3 %v4331_v10  ;;  %v4127_v46 = vor.u32 %v5164_v42, %v4124_v45  ;;  %v4268_v48 = vld [vmem:[%s6419_s13 + $0x290] sm:$0xf0]  ;;  %v5232_v49 = vld [vmem:[%s6419_s13 + $0x384] sm:$0xf] }
  0xab   : > { %1882 = vmatpush.bf16.msra.mxu0 %v4063_v52  ;;  %1895 = vmatpush.bf16.msra.mxu1 %v4191_v56  ;;  %v4271_v50 = vor.u32 %v5200_v47, %v4268_v48  ;;  %v4396_v51 = vld [vmem:[%s6419_s13 + $0x390] sm:$0xf0]  ;;  %v5128_v53 = vld [vmem:[%s6419_s13 + $0x44] sm:$0xf]  ;;  %v864_v56 = vperm.slane %v6563_v43, 0 }
  0xac   : > { %v4399_v52 = vor.u32 %v5232_v49, %v4396_v51  ;;  %v3980_v54 = vld [vmem:[%s6419_s13 + $0x50] sm:$0xf0]  ;;  %v5160_v55 = vld [vmem:[%s6419_s13 + $0x144] sm:$0xf] }
  0xad   : > { %1908 = vmatpush.bf16.msra.mxu2 %v4319_v14  ;;  %v3983_v58 = vor.u32 %v5128_v53, %v3980_v54  ;;  %v4108_v59 = vld [vmem:[%s6419_s13 + $0x150] sm:$0xf0]  ;;  %v5196_v61 = vld [vmem:[%s6419_s13 + $0x264] sm:$0xf] }
  0xae   : > { %1921 = vmatpush.bf16.msra.mxu3 %v4447_v15  ;;  %v4111_v60 = vor.u32 %v5160_v55, %v4108_v59  ;;  %v4252_v62 = vld [vmem:[%s6419_s13 + $0x270] sm:$0xf0]  ;;  %v5228_v63 = vld [vmem:[%s6419_s13 + $0x364] sm:$0xf] }
  0xaf   : > { %1883 = vmatpush.bf16.msra.mxu0 %v4047_v1  ;;  %1896 = vmatpush.bf16.msra.mxu1 %v4175_v5  ;;  %v4255_v0 = vor.u32 %v5196_v61, %v4252_v62  ;;  %v4380_v1 = vld [vmem:[%s6419_s13 + $0x370] sm:$0xf0]  ;;  %v5124_v3 = vld [vmem:[%s6419_s13 + $0x24] sm:$0xf] }
  0xb0   : > { %v4383_v2 = vor.u32 %v5228_v63, %v4380_v1  ;;  %v3964_v4 = vld [vmem:[%s6419_s13 + $0x30] sm:$0xf0]  ;;  %v5156_v5 = vld [vmem:[%s6419_s13 + $0x124] sm:$0xf]  ;;  %v6624_v1 = vld [vmem:[%s6419_s13 + $0xf4] sm:$0xf0] }
  0xb1   : > { %1909 = vmatpush.bf16.msra.mxu2 %v4303_v25  ;;  %v3967_v8 = vor.u32 %v5124_v3, %v3964_v4  ;;  %v4092_v9 = vld [vmem:[%s6419_s13 + $0x130] sm:$0xf0]  ;;  %v5192_v13 = vld [vmem:[%s6419_s13 + $0x244] sm:$0xf] }
  0xb2   : > { %1922 = vmatpush.bf16.msra.mxu3 %v4431_v27  ;;  %v4095_v12 = vor.u32 %v5156_v5, %v4092_v9  ;;  %v4236_v14 = vld [vmem:[%s6419_s13 + $0x250] sm:$0xf0]  ;;  %v5224_v15 = vld [vmem:[%s6419_s13 + $0x344] sm:$0xf]  ;;  %v6627_v5 = vld [vmem:[%s6419_s13 + $0x1e8] sm:$0xf] }
  0xb3   : > { %1884 = vmatpush.bf16.msra.mxu0 %v4031_v19  ;;  %1897 = vmatpush.bf16.msra.mxu1 %v4159_v21  ;;  %v4239_v18 = vor.u32 %v5192_v13, %v4236_v14  ;;  %v4364_v19 = vld [vmem:[%s6419_s13 + $0x350] sm:$0xf0]  ;;  %v5120_v23 = vld [vmem:[%s6419_s13 + $0x4] sm:$0xf]  ;;  %v5183_v9 = vld [vmem:[%s6419_s13 + $0x1f4] sm:$0xf0] }
  0xb4   : > { %v4367_v22 = vor.u32 %v5224_v15, %v4364_v19  ;;  %v3948_v24 = vld [vmem:[%s6419_s13 + $0x10] sm:$0xf0]  ;;  %v5152_v25 = vld [vmem:[%s6419_s13 + $0x104] sm:$0xf]  ;;  %v4195_v19 = vor.u32 %v5183_v9, %v6627_v5  ;;  %v4434_v5 = vld [vmem:[%s6419_s13 + $0x3c8] sm:$0xf] }
  0xb5   : > { %1910 = vmatpush.bf16.msra.mxu2 %v4287_v37  ;;  %v4076_v26 = vld [vmem:[%s6419_s13 + $0x110] sm:$0xf0]  ;;  %v3951_v27 = vor.u32 %v5120_v23, %v3948_v24  ;;  %v5188_v29 = vld [vmem:[%s6419_s13 + $0x224] sm:$0xf]  ;;  %v5243_v9 = vld [vmem:[%s6419_s13 + $0x3d4] sm:$0xf0] }
  0xb6   : > { %1923 = vmatpush.bf16.msra.mxu3 %v4415_v39  ;;  %v4079_v28 = vor.u32 %v5152_v25, %v4076_v26  ;;  %v4220_v30 = vld [vmem:[%s6419_s13 + $0x230] sm:$0xf0]  ;;  %v5220_v34 = vld [vmem:[%s6419_s13 + $0x324] sm:$0xf] }
  0xb7   : > { %1885 = vmatpush.bf16.msra.mxu0 %v4015_v31  ;;  %1898 = vmatpush.bf16.msra.mxu1 %v4143_v33  ;;  %v4223_v33 = vor.u32 %v5188_v29, %v4220_v30  ;;  %v4348_v35 = vld [vmem:[%s6419_s13 + $0x330] sm:$0xf0]  ;;  %v5184_v41 = vld [vmem:[%s6419_s13 + $0x204] sm:$0xf] }
  0xb8   : > { %v4351_v40 = vor.u32 %v5220_v34, %v4348_v35  ;;  %v4204_v42 = vld [vmem:[%s6419_s13 + $0x210] sm:$0xf0]  ;;  %v4050_v34 = vld [vmem:[%s6419_s13 + $0xc8] sm:$0xf]  ;;  %v5147_v35 = vld [vmem:[%s6419_s13 + $0xd4] sm:$0xf0] }
  0xb9   : > { %1911 = vmatpush.bf16.msra.mxu2 %v4271_v50  ;;  %v4207_v45 = vor.u32 %v5184_v41, %v4204_v42  ;;  %v4332_v48 = vld [vmem:[%s6419_s13 + $0x310] sm:$0xf0] }
  0xba   : > { %1924 = vmatpush.bf16.msra.mxu3 %v4399_v52 }
  0xbb   : > { %1886 = vmatpush.bf16.msra.mxu0 %v3999_v44  ;;  %1899 = vmatpush.bf16.msra.mxu1 %v4127_v46  ;;  %v5216_v46 = vld [vmem:[%s6419_s13 + $0x304] sm:$0xf] }
  0xbc   : > { %v4335_v51 = vor.u32 %v5216_v46, %v4332_v48  ;;  %v4322_v46 = vld [vmem:[%s6419_s13 + $0x2e8] sm:$0xf] }
  0xbd   : > { %1912 = vmatpush.bf16.msra.mxu2 %v4255_v0  ;;  %v6621_v0 = vld [vmem:[%s6419_s13 + $0xe8] sm:$0xf] }
  0xbe   : > { %1925 = vmatpush.bf16.msra.mxu3 %v4383_v2  ;;  %v4067_v15 = vor.u32 %v6624_v1, %v6621_v0 }
  0xbf   : > { %1887 = vmatpush.bf16.msra.mxu0 %v3983_v58  ;;  %1900 = vmatpush.bf16.msra.mxu1 %v4111_v60 }
  0xc1   : > { %1913 = vmatpush.bf16.msra.mxu2 %v4239_v18 }
  0xc2   : > { %1926 = vmatpush.bf16.msra.mxu3 %v4367_v22 }
  0xc3   : > { %1888 = vmatpush.bf16.msra.mxu0 %v3967_v8  ;;  %1901 = vmatpush.bf16.msra.mxu1 %v4095_v12 }
  0xc5   : > { %1914 = vmatpush.bf16.msra.mxu2 %v4223_v33 }
  0xc6   : > { %1927 = vmatpush.bf16.msra.mxu3 %v4351_v40 }
  0xc7   : > { %1889 = vmatpush.bf16.msra.mxu0 %v3951_v27  ;;  %1902 = vmatpush.bf16.msra.mxu1 %v4079_v28 }
  0xc9   : > { %1915 = vmatpush.bf16.msra.mxu2 %v4207_v45  ;;  %v4051_v45 = vor.u32 %v5147_v35, %v4050_v34  ;;  %v5235_v34 = vld [vmem:[%s6419_s13 + $0x394] sm:$0xf0]  ;;  %v4114_v35 = vld [vmem:[%s6419_s13 + $0x148] sm:$0xf] }
  0xca   : > { %1928 = vmatpush.bf16.msra.mxu3 %v4335_v51  ;;  %v5247_v51 = vld [vmem:[%s6419_s13 + $0x3f4] sm:$0xf0] }
 0x109   : > { %v925_v6 = vpop.f32.mrf.mxu0  ;;  %v938_v7 = vpop.f32.mrf.mxu1 }
 0x10a   : > { %v6584_v10 = vadd.f32 %v925_v6, %v864_v56  ;;  %v6586_v11 = vadd.f32 %v938_v7, %v865_v57 }
 0x10c   : > { %v3940_v20 = vmul.f32 -1.442695, %v6584_v10  ;;  %v3941_v21 = vmul.f32 -1.442695, %v6586_v11 }
 0x10e   : > { %5560 = vpow2.f32 %v3940_v20 }
 0x10f   : > { %5562 = vpow2.f32 %v3941_v21 }
 0x110   : > { %v964_v32 = vpop.f32.mrf.mxu3 }
 0x111   : > { %v951_v31 = vpop.f32.mrf.mxu2  ;;  %v6606_v37 = vadd.f32 %v964_v32, %v867_v17  ;;  %v927_v38 = vpop.f32.mrf.mxu0 }
 0x112   : > { %v6604_v36 = vadd.f32 %v951_v31, %v866_v16  ;;  %v940_v39 = vpop.f32.mrf.mxu1 }
 0x113   : > { %v3943_v44 = vmul.f32 -1.442695, %v6606_v37 }
 0x114   : > { %v3942_v43 = vmul.f32 -1.442695, %v6604_v36  ;;  %v5561_v47 = vpop.eup %5560 }
 0x115   : > { %v5563_v49 = vpop.eup %5562  ;;  %v980_v50 = vadd.f32 1.0, %v5561_v47  ;;  %v5215_v47 = vld [vmem:[%s6419_s13 + $0x2f4] sm:$0xf0] }
 0x116   : > { %5564 = vpow2.f32 %v3942_v43  ;;  %v981_v52 = vadd.f32 1.0, %v5563_v49  ;;  %v5179_v43 = vld [vmem:[%s6419_s13 + $0x1d4] sm:$0xf0] }
 0x117   : > { %5566 = vpow2.f32 %v3943_v44  ;;  %vm989_vm1 = vweird.f32 %v980_v50  ;;  %v993_v2 = vand.u32 2147483647, %v980_v50  ;;  %v995_v3 = vand.u32 2147483648, %v980_v50 }
 0x118   : > { %5568 = vrcp.f32 %v980_v50  ;;  %v966_v54 = vpop.f32.mrf.mxu3  ;;  %v1008_v7 = vand.u32 2147483647, %v981_v52  ;;  %v1010_v8 = vand.u32 2147483648, %v981_v52  ;;  %vm1004_vm3 = vweird.f32 %v981_v52 }
 0x119   : > { %5570 = vrcp.f32 %v981_v52  ;;  %v953_v53 = vpop.f32.mrf.mxu2  ;;  %v996_v16 = vor.u32 1.1754944e-38, %v995_v3  ;;  %vm994_vm6 = vcmp.eq.f32.partialorder %v993_v2, 8.507059e+37  ;;  %v4306_v2 = vld [vmem:[%s6419_s13 + $0x2c8] sm:$0xf] }
 0x11a   : > { %vm1009_vm8 = vcmp.eq.f32.partialorder %v1008_v7, 8.507059e+37  ;;  %v1011_v22 = vor.u32 1.1754944e-38, %v1010_v8  ;;  %v5139_v7 = vld [vmem:[%s6419_s13 + $0x94] sm:$0xf0] }
 0x11c   : > { %v5565_v55 = vpop.eup %5564 }
 0x11d   : > { %v5567_v56 = vpop.eup %5566  ;;  %v6614_v57 = vadd.f32 1.0, %v5565_v55  ;;  %v4034_v55 = vld [vmem:[%s6419_s13 + $0xa8] sm:$0xf] }
 0x11e   : > { %v5569_v58 = vpop.eup %5568  ;;  %v6616_v59 = vadd.f32 1.0, %v5567_v56  ;;  %v5143_v56 = vld [vmem:[%s6419_s13 + $0xb4] sm:$0xf0] }
 0x11f   : > { %v5571_v60 = vpop.eup %5570  ;;  %v985_v61 = vmul.f32 %v5569_v58, %v980_v50  ;;  %5572 = vrcp.f32 %v6614_v57  ;;  %vm990_vm2 = vweird.f32 %v5569_v58  ;;  %v1023_v29 = vand.u32 2147483647, %v6614_v57  ;;  %v4450_v50 = vld [vmem:[%s6419_s13 + $0x3e8] sm:$0xf] }
 0x120   : > { %v1000_v62 = vmul.f32 %v5571_v60, %v981_v52  ;;  %5574 = vrcp.f32 %v6616_v59  ;;  %vm1005_vm4 = vweird.f32 %v5571_v60  ;;  %vm991_vm5 = vmor %vm989_vm1, %vm990_vm2  ;;  %v1025_v30 = vand.u32 2147483648, %v6614_v57 }
 0x121   : > { %v986_v63 = vsub.f32 1.0, %v985_v61  ;;  %vm1006_vm7 = vmor %vm1004_vm3, %vm1005_vm4  ;;  %vm1019_vm10 = vweird.f32 %v6614_v57  ;;  %v1040_v39 = vand.u32 2147483648, %v6616_v59  ;;  %vm1024_vm13 = vcmp.eq.f32.partialorder %v1023_v29, 8.507059e+37 }
 0x122   : > { %v1001_v4 = vsub.f32 1.0, %v1000_v62  ;;  %v1026_v44 = vor.u32 1.1754944e-38, %v1025_v30  ;;  %vm1034_vm14 = vweird.f32 %v6616_v59  ;;  %v4323_v62 = vor.u32 %v5215_v47, %v4322_v46  ;;  %v3970_v46 = vld [vmem:[%s6419_s13 + $0x28] sm:$0xf]  ;;  %v5127_v47 = vld [vmem:[%s6419_s13 + $0x34] sm:$0xf0] }
 0x123   : > { %v987_v6 = vmul.f32 %v5569_v58, %v986_v63  ;;  %v1041_v53 = vor.u32 1.1754944e-38, %v1040_v39  ;;  %v4035_v1 = vor.u32 %v5143_v56, %v4034_v55  ;;  %v4451_v3 = vor.u32 %v5247_v51, %v4450_v50  ;;  %v5159_v50 = vld [vmem:[%s6419_s13 + $0x134] sm:$0xf0]  ;;  %v4370_v55 = vld [vmem:[%s6419_s13 + $0x348] sm:$0xf] }
 0x124   : > { %v1002_v12 = vmul.f32 %v5571_v60, %v1001_v4 }
 0x125   : > { %v5573_v13 = vpop.eup %5572  ;;  %v988_v14 = vadd.f32 %v5569_v58, %v987_v6  ;;  %v4018_v6 = vld [vmem:[%s6419_s13 + $0x88] sm:$0xf] }
 0x126   : > { %v1003_v17 = vadd.f32 %v5571_v60, %v1002_v12  ;;  %v1015_v18 = vmul.f32 %v5573_v13, %v6614_v57  ;;  %v5575_v20 = vpop.eup %5574  ;;  %vm1020_vm9 = vweird.f32 %v5573_v13  ;;  %v5171_v12 = vld [vmem:[%s6419_s13 + $0x194] sm:$0xf0] }
 0x127   : > { %v992_v21 = vsel %vm991_vm5, %v5569_v58, %v988_v14  ;;  %v1030_v26 = vmul.f32 %v5575_v20, %v6616_v59  ;;  %vm1035_vm11 = vweird.f32 %v5575_v20  ;;  %vm1021_vm12 = vmor %vm1019_vm10, %vm1020_vm9  ;;  %v4019_v14 = vor.u32 %v5139_v7, %v4018_v6  ;;  %v5191_v6 = vld [vmem:[%s6419_s13 + $0x234] sm:$0xf0] }
 0x128   : > { %v997_v23 = vsel %vm994_vm6, %v996_v16, %v992_v21  ;;  %v1007_v24 = vsel %vm1006_vm7, %v5571_v60, %v1003_v17  ;;  %v1016_v25 = vsub.f32 1.0, %v1015_v18  ;;  %vm1036_vm15 = vmor %vm1034_vm14, %vm1035_vm11  ;;  %v5175_v60 = vld [vmem:[%s6419_s13 + $0x1b4] sm:$0xf0]  ;;  %v4435_v17 = vor.u32 %v5243_v9, %v4434_v5  ;;  %v4226_v5 = vld [vmem:[%s6419_s13 + $0x228] sm:$0xf] }
 0x129   : > { %v1044_v27 = vmul.f32 %v997_v23, %v6584_v10  ;;  %v1012_v28 = vsel %vm1009_vm8, %v1011_v22, %v1007_v24  ;;  %v1031_v33 = vsub.f32 1.0, %v1030_v26  ;;  %v1038_v10 = vand.u32 2147483647, %v6616_v59  ;;  %v4162_v59 = vld [vmem:[%s6419_s13 + $0x1a8] sm:$0xf] }
 0x12a   : > { %v1045_v31 = vmul.f32 %v1012_v28, %v6586_v11  ;;  %v1017_v32 = vmul.f32 %v5573_v13, %v1016_v25  ;;  %v4178_v11 = vld [vmem:[%s6419_s13 + $0x1c8] sm:$0xf]  ;;  %v4163_v4 = vor.u32 %v5175_v60, %v4162_v59  ;;  %v5207_v16 = vld [vmem:[%s6419_s13 + $0x2b4] sm:$0xf0] }
 0x12b   : > { %v6642_v38 = vpack.c.bf16 %v1044_v27, %v1044_v27  ;;  %v1032_v42 = vmul.f32 %v5575_v20, %v1031_v33  ;;  %v4179_v54 = vor.u32 %v5179_v43, %v4178_v11  ;;  %vm1039_vm0 = vcmp.eq.f32.partialorder %v1038_v10, 8.507059e+37  ;;  %v5135_v21 = vld [vmem:[%s6419_s13 + $0x74] sm:$0xf0]  ;;  %v4130_v23 = vld [vmem:[%s6419_s13 + $0x168] sm:$0xf] }
 0x12c   : > { %v6647_v40 = vpack.c.bf16 %v1045_v31, %v1045_v31  ;;  %v1018_v41 = vadd.f32 %v5573_v13, %v1017_v32  ;;  %v5239_v22 = vld [vmem:[%s6419_s13 + $0x3b4] sm:$0xf0]  ;;  %v4274_v27 = vld [vmem:[%s6419_s13 + $0x288] sm:$0xf] }
 0x12d   : > { %1838 = vmatmul.bf16.vlgmr.msrb.gmra.mxu0 %v6642_v38  ;;  %v1033_v49 = vadd.f32 %v5575_v20, %v1032_v42  ;;  %v5167_v24 = vld [vmem:[%s6419_s13 + $0x174] sm:$0xf0]  ;;  %v4402_v31 = vld [vmem:[%s6419_s13 + $0x388] sm:$0xf] }
 0x12e   : > { %v1022_v48 = vsel %vm1021_vm12, %v5573_v13, %v1018_v41  ;;  %1851 = vmatmul.bf16.vlgmr.msrb.gmra.mxu1 %v6647_v40  ;;  %1934 = vmatpush.bf16.msrb.mxu0 %v4067_v15  ;;  %v4290_v15 = vld [vmem:[%s6419_s13 + $0x2a8] sm:$0xf]  ;;  %v5203_v28 = vld [vmem:[%s6419_s13 + $0x294] sm:$0xf0]  ;;  %v4131_v30 = vor.u32 %v5167_v24, %v4130_v23  ;;  %v4403_v43 = vor.u32 %v5235_v34, %v4402_v31  ;;  %v5213_v23 = vld [vmem:[%s6419_s13 + $0x2ec] sm:$0xf] }
 0x12f   : > { %v1027_v52 = vsel %vm1024_vm13, %v1026_v44, %v1022_v48  ;;  %1947 = vmatpush.bf16.msrb.mxu1 %v4195_v19  ;;  %v1037_v58 = vsel %vm1036_vm15, %v5575_v20, %v1033_v49  ;;  %v4418_v19 = vld [vmem:[%s6419_s13 + $0x3a8] sm:$0xf]  ;;  %v4291_v25 = vor.u32 %v5207_v16, %v4290_v15  ;;  %v5131_v33 = vld [vmem:[%s6419_s13 + $0x54] sm:$0xf0]  ;;  %v4275_v39 = vor.u32 %v5203_v28, %v4274_v27  ;;  %v5145_v15 = vld [vmem:[%s6419_s13 + $0xcc] sm:$0xf] }
 0x130   : > { %v1046_v57 = vmul.f32 %v1027_v52, %v6604_v36  ;;  %v1042_v61 = vsel %vm1039_vm0, %v1041_v53, %v1037_v58  ;;  %v5211_v36 = vld [vmem:[%s6419_s13 + $0x2d4] sm:$0xf0]  ;;  %v4002_v20 = vld [vmem:[%s6419_s13 + $0x68] sm:$0xf]  ;;  %v4419_v29 = vor.u32 %v5239_v22, %v4418_v19  ;;  %v3971_v52 = vor.u32 %v5127_v47, %v3970_v46  ;;  %v4180_v19 = vld [vmem:[%s6419_s13 + $0x1d8] sm:$0xf0] }
 0x131   : > { %v1047_v0 = vmul.f32 %v1042_v61, %v6606_v37  ;;  %v4146_v37 = vld [vmem:[%s6419_s13 + $0x188] sm:$0xf]  ;;  %v4307_v13 = vor.u32 %v5211_v36, %v4306_v2  ;;  %v4003_v26 = vor.u32 %v5135_v21, %v4002_v20  ;;  %v5163_v10 = vld [vmem:[%s6419_s13 + $0x154] sm:$0xf0]  ;;  %v4068_v2 = vld [vmem:[%s6419_s13 + $0xf8] sm:$0xf0]  ;;  %v4227_v16 = vor.u32 %v5191_v6, %v4226_v5 }
 0x132   : > { %v6664_v63 = vpack.c.bf16 %v1046_v57, %v1046_v57  ;;  %1935 = vmatpush.bf16.msrb.mxu0 %v4051_v45  ;;  %v4147_v18 = vor.u32 %v5171_v12, %v4146_v37  ;;  %v3986_v32 = vld [vmem:[%s6419_s13 + $0x48] sm:$0xf]  ;;  %v5199_v11 = vld [vmem:[%s6419_s13 + $0x274] sm:$0xf0]  ;;  %v4115_v44 = vor.u32 %v5163_v10, %v4114_v35  ;;  %v5181_v36 = vld [vmem:[%s6419_s13 + $0x1ec] sm:$0xf] }
 0x133   : > { %1948 = vmatpush.bf16.msrb.mxu1 %v4179_v54  ;;  %v6672_v8 = vpack.c.bf16 %v1047_v0, %v1047_v0  ;;  %v3987_v41 = vor.u32 %v5131_v33, %v3986_v32  ;;  %v4258_v42 = vld [vmem:[%s6419_s13 + $0x268] sm:$0xf]  ;;  %v5231_v48 = vld [vmem:[%s6419_s13 + $0x374] sm:$0xf0]  ;;  %v5149_v0 = vld [vmem:[%s6419_s13 + $0xec] sm:$0xf] }
 0x134   : > { %1864 = vmatmul.bf16.vlgmr.msrb.gmra.mxu2 %v6664_v63  ;;  %v4386_v45 = vld [vmem:[%s6419_s13 + $0x368] sm:$0xf]  ;;  %v4259_v51 = vor.u32 %v5199_v11, %v4258_v42  ;;  %v5195_v54 = vld [vmem:[%s6419_s13 + $0x254] sm:$0xf0]  ;;  %v4071_v37 = vor.u32 %v5149_v0, %v4068_v2  ;;  %v4324_v24 = vld [vmem:[%s6419_s13 + $0x2f8] sm:$0xf0] }
 0x135   : > { %1960 = vmatpush.bf16.msrb.mxu2 %v4323_v62  ;;  %1877 = vmatmul.bf16.vlgmr.msrb.gmra.mxu3 %v6672_v8  ;;  %v4098_v49 = vld [vmem:[%s6419_s13 + $0x128] sm:$0xf]  ;;  %v4387_v56 = vor.u32 %v5231_v48, %v4386_v45  ;;  %v5227_v58 = vld [vmem:[%s6419_s13 + $0x354] sm:$0xf0]  ;;  %v4452_v31 = vld [vmem:[%s6419_s13 + $0x3f8] sm:$0xf0]  ;;  %v4327_v34 = vor.u32 %v5213_v23, %v4324_v24 }
 0x136   : > { %1936 = vmatpush.bf16.msrb.mxu0 %v4035_v1  ;;  %1973 = vmatpush.bf16.msrb.mxu3 %v4451_v3  ;;  %v4242_v53 = vld [vmem:[%s6419_s13 + $0x248] sm:$0xf]  ;;  %v4099_v57 = vor.u32 %v5159_v50, %v4098_v49  ;;  %v5123_v60 = vld [vmem:[%s6419_s13 + $0x14] sm:$0xf0]  ;;  %v4196_v3 = vld [vmem:[%s6419_s13 + $0x1f8] sm:$0xf0]  ;;  %v4371_v7 = vor.u32 %v5227_v58, %v4370_v55 }
 0x137   : > { %1949 = vmatpush.bf16.msrb.mxu1 %v4163_v4  ;;  %v3954_v59 = vld [vmem:[%s6419_s13 + $0x8] sm:$0xf]  ;;  %v5155_v62 = vld [vmem:[%s6419_s13 + $0x114] sm:$0xf0]  ;;  %v4243_v1 = vor.u32 %v5195_v54, %v4242_v53  ;;  %v4199_v12 = vor.u32 %v5181_v36, %v4196_v3  ;;  %v5141_v32 = vld [vmem:[%s6419_s13 + $0xac] sm:$0xf] }
 0x138   : > { %v4082_v61 = vld [vmem:[%s6419_s13 + $0x108] sm:$0xf]  ;;  %v3955_v4 = vor.u32 %v5123_v60, %v3954_v59  ;;  %v5187_v21 = vld [vmem:[%s6419_s13 + $0x214] sm:$0xf0]  ;;  %v4036_v33 = vld [vmem:[%s6419_s13 + $0xb8] sm:$0xf0] }
 0x139   : > { %1961 = vmatpush.bf16.msrb.mxu2 %v4307_v13  ;;  %v4083_v9 = vor.u32 %v5155_v62, %v4082_v61  ;;  %v4354_v13 = vld [vmem:[%s6419_s13 + $0x328] sm:$0xf]  ;;  %v5219_v28 = vld [vmem:[%s6419_s13 + $0x314] sm:$0xf0]  ;;  %v5173_v35 = vld [vmem:[%s6419_s13 + $0x1ac] sm:$0xf] }
 0x13a   : > { %1937 = vmatpush.bf16.msrb.mxu0 %v4019_v14  ;;  %1974 = vmatpush.bf16.msrb.mxu3 %v4435_v17  ;;  %v5223_v14 = vld [vmem:[%s6419_s13 + $0x334] sm:$0xf0]  ;;  %v4052_v17 = vld [vmem:[%s6419_s13 + $0xd8] sm:$0xf0]  ;;  %v4210_v20 = vld [vmem:[%s6419_s13 + $0x208] sm:$0xf] }
 0x13b   : > { %1950 = vmatpush.bf16.msrb.mxu1 %v4147_v18  ;;  %v5177_v18 = vld [vmem:[%s6419_s13 + $0x1cc] sm:$0xf]  ;;  %v4355_v22 = vor.u32 %v5223_v14, %v4354_v13  ;;  %v4338_v27 = vld [vmem:[%s6419_s13 + $0x308] sm:$0xf]  ;;  %v4164_v10 = vld [vmem:[%s6419_s13 + $0x1b8] sm:$0xf0] }
 0x13c   : > { %v4308_v42 = vld [vmem:[%s6419_s13 + $0x2d8] sm:$0xf0]  ;;  %v4167_v45 = vor.u32 %v5173_v35, %v4164_v10  ;;  %v5137_v47 = vld [vmem:[%s6419_s13 + $0x8c] sm:$0xf] }
 0x13d   : > { %1962 = vmatpush.bf16.msrb.mxu2 %v4291_v25  ;;  %1890 = vmatmul.bf16.vlgmr.msra.gmra.mxu0 %v6642_v38  ;;  %v4055_v25 = vor.u32 %v5145_v15, %v4052_v17  ;;  %v4436_v46 = vld [vmem:[%s6419_s13 + $0x3d8] sm:$0xf0]  ;;  %v5169_v50 = vld [vmem:[%s6419_s13 + $0x18c] sm:$0xf] }
 0x13e   : > { %1903 = vmatmul.bf16.vlgmr.msra.gmra.mxu1 %v6647_v40  ;;  %1938 = vmatpush.bf16.msrb.mxu0 %v4003_v26  ;;  %v4183_v26 = vor.u32 %v5177_v18, %v4180_v19  ;;  %v4020_v48 = vld [vmem:[%s6419_s13 + $0x98] sm:$0xf0]  ;;  %v5133_v59 = vld [vmem:[%s6419_s13 + $0x6c] sm:$0xf] }
 0x13f   : > { %1975 = vmatpush.bf16.msrb.mxu3 %v4419_v29  ;;  %1951 = vmatpush.bf16.msrb.mxu1 %v4131_v30  ;;  %v5245_v29 = vld [vmem:[%s6419_s13 + $0x3ec] sm:$0xf]  ;;  %v4211_v30 = vor.u32 %v5187_v21, %v4210_v20  ;;  %v4292_v53 = vld [vmem:[%s6419_s13 + $0x2b8] sm:$0xf0]  ;;  %v4023_v55 = vor.u32 %v5137_v47, %v4020_v48 }
 0x140   : > { %v4455_v11 = vor.u32 %v5245_v29, %v4452_v31  ;;  %v4420_v58 = vld [vmem:[%s6419_s13 + $0x3b8] sm:$0xf0]  ;;  %v5165_v62 = vld [vmem:[%s6419_s13 + $0x16c] sm:$0xf] }
 0x141   : > { %1963 = vmatpush.bf16.msrb.mxu2 %v4275_v39  ;;  %v4339_v39 = vor.u32 %v5219_v28, %v4338_v27  ;;  %v4004_v60 = vld [vmem:[%s6419_s13 + $0x78] sm:$0xf0]  ;;  %v5197_v14 = vld [vmem:[%s6419_s13 + $0x26c] sm:$0xf] }
 0x142   : > { %1939 = vmatpush.bf16.msrb.mxu0 %v3987_v41  ;;  %v5209_v41 = vld [vmem:[%s6419_s13 + $0x2cc] sm:$0xf]  ;;  %v4132_v0 = vld [vmem:[%s6419_s13 + $0x178] sm:$0xf0]  ;;  %v4007_v3 = vor.u32 %v5133_v59, %v4004_v60  ;;  %v4542_v60 = vld [vmem:[%s6426_s24 + $0xa0] sm:$0xf] }
 0x143   : > { %1976 = vmatpush.bf16.msrb.mxu3 %v4403_v43  ;;  %1952 = vmatpush.bf16.msrb.mxu1 %v4115_v44  ;;  %v4039_v43 = vor.u32 %v5141_v32, %v4036_v33  ;;  %v5241_v44 = vld [vmem:[%s6419_s13 + $0x3cc] sm:$0xf]  ;;  %v4311_v49 = vor.u32 %v5209_v41, %v4308_v42  ;;  %v4276_v2 = vld [vmem:[%s6419_s13 + $0x298] sm:$0xf0]  ;;  %v4135_v5 = vor.u32 %v5165_v62, %v4132_v0  ;;  %v4574_v41 = vld [vmem:[%s6426_s24 + $0xe0] sm:$0xf] }
 0x144   : > { %1916 = vmatmul.bf16.vlgmr.msra.gmra.mxu2 %v6664_v63  ;;  %v4439_v54 = vor.u32 %v5241_v44, %v4436_v46  ;;  %v4404_v6 = vld [vmem:[%s6419_s13 + $0x398] sm:$0xf0]  ;;  %v5229_v18 = vld [vmem:[%s6419_s13 + $0x36c] sm:$0xf]  ;;  %v5278_v42 = vld [vmem:[%s6426_s24 + $0xec] sm:$0xf0] }
 0x145   : > { %1964 = vmatpush.bf16.msrb.mxu2 %v4259_v51  ;;  %1929 = vmatmul.bf16.vlgmr.msra.gmra.mxu3 %v6672_v8  ;;  %v4148_v51 = vld [vmem:[%s6419_s13 + $0x198] sm:$0xf0]  ;;  %v5125_v21 = vld [vmem:[%s6419_s13 + $0x2c] sm:$0xf] }
 0x146   : > { %1940 = vmatpush.bf16.msrb.mxu0 %v3971_v52  ;;  %v5205_v52 = vld [vmem:[%s6419_s13 + $0x2ac] sm:$0xf]  ;;  %v4116_v13 = vld [vmem:[%s6419_s13 + $0x158] sm:$0xf0] }
 0x147   : > { %1977 = vmatpush.bf16.msrb.mxu3 %v4387_v56  ;;  %1953 = vmatpush.bf16.msrb.mxu1 %v4099_v57  ;;  %v5237_v56 = vld [vmem:[%s6419_s13 + $0x3ac] sm:$0xf]  ;;  %v4151_v57 = vor.u32 %v5169_v50, %v4148_v51  ;;  %v4295_v61 = vor.u32 %v5205_v52, %v4292_v53  ;;  %v4260_v15 = vld [vmem:[%s6419_s13 + $0x278] sm:$0xf0]  ;;  %v4558_v51 = vld [vmem:[%s6426_s24 + $0xc0] sm:$0xf] }
 0x148   : > { %v4423_v36 = vor.u32 %v5237_v56, %v4420_v58  ;;  %v4388_v20 = vld [vmem:[%s6419_s13 + $0x378] sm:$0xf0]  ;;  %v4263_v23 = vor.u32 %v5197_v14, %v4260_v15  ;;  %v5157_v24 = vld [vmem:[%s6419_s13 + $0x12c] sm:$0xf]  ;;  %v5274_v52 = vld [vmem:[%s6426_s24 + $0xcc] sm:$0xf0] }
 0x149   : > { %1965 = vmatpush.bf16.msrb.mxu2 %v4243_v1  ;;  %v5201_v1 = vld [vmem:[%s6419_s13 + $0x28c] sm:$0xf]  ;;  %v4244_v27 = vld [vmem:[%s6419_s13 + $0x258] sm:$0xf0]  ;;  %v4391_v28 = vor.u32 %v5229_v18, %v4388_v20  ;;  %v4559_v58 = vor.u32 %v5274_v52, %v4558_v51  ;;  %v5254_v14 = vld [vmem:[%s6426_s24 + $0x2c] sm:$0xf0] }
 0x14a   : > { %1941 = vmatpush.bf16.msrb.mxu0 %v3955_v4  ;;  %v5233_v4 = vld [vmem:[%s6419_s13 + $0x38c] sm:$0xf]  ;;  %v4372_v31 = vld [vmem:[%s6419_s13 + $0x358] sm:$0xf0]  ;;  %v4670_v15 = vld [vmem:[%s6426_s24 + $0x1a0] sm:$0xf] }
 0x14b   : > { %1978 = vmatpush.bf16.msrb.mxu3 %v4371_v7  ;;  %1954 = vmatpush.bf16.msrb.mxu1 %v4083_v9  ;;  %v5129_v7 = vld [vmem:[%s6419_s13 + $0x4c] sm:$0xf]  ;;  %v3988_v9 = vld [vmem:[%s6419_s13 + $0x58] sm:$0xf0]  ;;  %v5250_v20 = vld [vmem:[%s6426_s24 + $0xc] sm:$0xf0] }
 0x14c   : > { %v3991_v17 = vor.u32 %v5129_v7, %v3988_v9  ;;  %v5121_v33 = vld [vmem:[%s6419_s13 + $0xc] sm:$0xf]  ;;  %v4356_v48 = vld [vmem:[%s6419_s13 + $0x338] sm:$0xf0]  ;;  %v5258_v7 = vld [vmem:[%s6426_s24 + $0x4c] sm:$0xf0] }
 0x14d   : > { %1966 = vmatpush.bf16.msrb.mxu2 %v4227_v16  ;;  %1942 = vmatmul.bf16.vlgmr.msrb.gmra.mxu0 %v6642_v38  ;;  %v4407_v16 = vor.u32 %v5233_v4, %v4404_v6  ;;  %v5153_v35 = vld [vmem:[%s6419_s13 + $0x10c] sm:$0xf]  ;;  %v5310_v4 = vld [vmem:[%s6426_s24 + $0x1ec] sm:$0xf0]  ;;  %v4798_v52 = vld [vmem:[%s6426_s24 + $0x2a0] sm:$0xf] }
 0x14e   : > { %1986 = vmatpush.bf16.msra.mxu0 %v4071_v37  ;;  %1955 = vmatmul.bf16.vlgmr.msrb.gmra.mxu1 %v6647_v40  ;;  %v4279_v37 = vor.u32 %v5201_v1, %v4276_v2  ;;  %v5221_v47 = vld [vmem:[%s6419_s13 + $0x32c] sm:$0xf]  ;;  %v4526_v1 = vld [vmem:[%s6426_s24 + $0x80] sm:$0xf]  ;;  %v5286_v51 = vld [vmem:[%s6426_s24 + $0x12c] sm:$0xf0] }
 0x14f   : > { %1999 = vmatpush.bf16.msra.mxu1 %v4199_v12  ;;  %1979 = vmatpush.bf16.msrb.mxu3 %v4355_v22  ;;  %v5161_v12 = vld [vmem:[%s6419_s13 + $0x14c] sm:$0xf]  ;;  %v3972_v22 = vld [vmem:[%s6419_s13 + $0x38] sm:$0xf0]  ;;  %v4510_v2 = vld [vmem:[%s6426_s24 + $0x60] sm:$0xf] }
 0x150   : > { %v4119_v19 = vor.u32 %v5161_v12, %v4116_v13  ;;  %v3975_v29 = vor.u32 %v5125_v21, %v3972_v22  ;;  %v5185_v53 = vld [vmem:[%s6419_s13 + $0x20c] sm:$0xf]  ;;  %v4478_v13 = vld [vmem:[%s6426_s24 + $0x20] sm:$0xf] }
 0x151   : > { %1967 = vmatpush.bf16.msrb.mxu2 %v4211_v30  ;;  %v5225_v30 = vld [vmem:[%s6419_s13 + $0x34c] sm:$0xf]  ;;  %v4654_v21 = vld [vmem:[%s6426_s24 + $0x180] sm:$0xf] }
 0x152   : > { %1987 = vmatpush.bf16.msra.mxu0 %v4055_v25  ;;  %v4100_v25 = vld [vmem:[%s6419_s13 + $0x138] sm:$0xf0]  ;;  %v4375_v44 = vor.u32 %v5225_v30, %v4372_v31  ;;  %v5217_v56 = vld [vmem:[%s6419_s13 + $0x30c] sm:$0xf]  ;;  %v4830_v30 = vld [vmem:[%s6426_s24 + $0x2e0] sm:$0xf] }
 0x153   : > { %2000 = vmatpush.bf16.msra.mxu1 %v4183_v26  ;;  %1980 = vmatpush.bf16.msrb.mxu3 %v4339_v39  ;;  %v5193_v26 = vld [vmem:[%s6419_s13 + $0x24c] sm:$0xf]  ;;  %v4103_v32 = vor.u32 %v5157_v24, %v4100_v25  ;;  %v4084_v39 = vld [vmem:[%s6419_s13 + $0x118] sm:$0xf0] }
 0x154   : > { %1968 = vmatmul.bf16.vlgmr.msrb.gmra.mxu2 %v6664_v63  ;;  %v4247_v10 = vor.u32 %v5193_v26, %v4244_v27  ;;  %v4087_v46 = vor.u32 %v5153_v35, %v4084_v39  ;;  %v5276_v24 = vld [vmem:[%s6426_s24 + $0xe4] sm:$0xf]  ;;  %v4576_v25 = vld [vmem:[%s6426_s24 + $0xf0] sm:$0xf0]  ;;  %v4622_v39 = vld [vmem:[%s6426_s24 + $0x140] sm:$0xf] }
 0x155   : > { %2012 = vmatpush.bf16.msra.mxu2 %v4327_v34  ;;  %v3956_v34 = vld [vmem:[%s6419_s13 + $0x18] sm:$0xf0]  ;;  %v4579_v27 = vor.u32 %v5276_v24, %v4576_v25  ;;  %v5252_v24 = vld [vmem:[%s6426_s24 + $0x24] sm:$0xf] }
 0x156   : > { %1988 = vmatpush.bf16.msra.mxu0 %v4039_v43  ;;  %1981 = vmatmul.bf16.vlgmr.msrb.gmra.mxu3 %v6672_v8  ;;  %v4228_v43 = vld [vmem:[%s6419_s13 + $0x238] sm:$0xf0] }
 0x157   : > { %2025 = vmatpush.bf16.msra.mxu3 %v4455_v11  ;;  %2001 = vmatpush.bf16.msra.mxu1 %v4167_v45  ;;  %v5189_v11 = vld [vmem:[%s6419_s13 + $0x22c] sm:$0xf]  ;;  %v3959_v45 = vor.u32 %v5121_v33, %v3956_v34  ;;  %v4560_v34 = vld [vmem:[%s6426_s24 + $0xd0] sm:$0xf0] }
 0x158   : > { %v4231_v50 = vor.u32 %v5189_v11, %v4228_v43  ;;  %v5272_v33 = vld [vmem:[%s6426_s24 + $0xc4] sm:$0xf]  ;;  %v5338_v43 = vld [vmem:[%s6426_s24 + $0x2cc] sm:$0xf0]  ;;  %v4480_v25 = vld [vmem:[%s6426_s24 + $0x30] sm:$0xf0] }
 0x159   : > { %2013 = vmatpush.bf16.msra.mxu2 %v4311_v49  ;;  %v4575_v49 = vor.u32 %v5278_v42, %v4574_v41  ;;  %v5290_v41 = vld [vmem:[%s6426_s24 + $0x14c] sm:$0xf0]  ;;  %v4814_v42 = vld [vmem:[%s6426_s24 + $0x2c0] sm:$0xf] }
 0x15a   : > { %1989 = vmatpush.bf16.msra.mxu0 %v4023_v55  ;;  %v4359_v55 = vor.u32 %v5221_v47, %v4356_v48  ;;  %v4623_v11 = vor.u32 %v5290_v41, %v4622_v39  ;;  %v6835_v48 = vld [vmem:[%s709_s16] sm:$0xf]  ;;  %v5248_v41 = vld [vmem:[%s6426_s24 + $0x4] sm:$0xf] }
 0x15b   : > { %2026 = vmatpush.bf16.msra.mxu3 %v4439_v54  ;;  %2002 = vmatpush.bf16.msra.mxu1 %v4151_v57  ;;  %v4212_v54 = vld [vmem:[%s6419_s13 + $0x218] sm:$0xf0] }
 0x15c   : > { %v4340_v57 = vld [vmem:[%s6419_s13 + $0x318] sm:$0xf0]  ;;  %v4215_v59 = vor.u32 %v5185_v53, %v4212_v54  ;;  %s6020_s13 = sshra.s32 %s3576_s1, 4  ;;  %s6021_s13 = int_to_ptr.hbm [resolvable:$true] %s6020_s13 }
 0x15d   : > { %2014 = vmatpush.bf16.msra.mxu2 %v4295_v61  ;;  %v5270_v61 = vld [vmem:[%s6426_s24 + $0xac] sm:$0xf0]  ;;  %v4343_v62 = vor.u32 %v5217_v56, %v4340_v57  ;;  %v5264_v56 = vld [vmem:[%s6426_s24 + $0x84] sm:$0xf]  ;;  %v4528_v57 = vld [vmem:[%s6426_s24 + $0x90] sm:$0xf0]  ;;  %p6027_p10 = scmp.lt.s32.totalorder %s6021_s13, %s7306_s20 }
 0x15e   : > { %1990 = vmatpush.bf16.msra.mxu0 %v4007_v3  ;;  %v4543_v0 = vor.u32 %v5270_v61, %v4542_v60  ;;  %v5262_v3 = vld [vmem:[%s6426_s24 + $0x6c] sm:$0xf0]  ;;  %v1182_v60 = vperm.slane %v6835_v48, 0  ;;  %v4590_v61 = vld [vmem:[%s6426_s24 + $0x100] sm:$0xf]  ;;  %s6022_s16 = scalar_lea.hbm %s6021_s13, 8 }
 0x15f   : > { %2027 = vmatpush.bf16.msra.mxu3 %v4423_v36  ;;  %2003 = vmatpush.bf16.msra.mxu1 %v4135_v5  ;;  %v4511_v6 = vor.u32 %v5262_v3, %v4510_v2  ;;  %v5260_v2 = vld [vmem:[%s6426_s24 + $0x64] sm:$0xf]  ;;  %p6023_p3 = scmp.ne.s32.totalorder %s6021_s13, %s6022_s16  ;;  %p6028_p11 = scmp.lt.s32.totalorder %s6026_s30, %s6022_s16 }
 0x161   : > { %2015 = vmatpush.bf16.msra.mxu2 %v4279_v37  ;;  %v5306_v37 = vld [vmem:[%s6426_s24 + $0x1cc] sm:$0xf0]  ;;  %p6024_p6 = pnand %p6023_p3, %p6244_p8  ;;  %p6029_p12 = por %p6028_p11, %p6027_p10 }
 0x162   : > { %1991 = vmatpush.bf16.msra.mxu0 %v3991_v17  ;;  %v5302_v17 = vld [vmem:[%s6426_s24 + $0x1ac] sm:$0xf0] }
 0x163   : > { %2028 = vmatpush.bf16.msra.mxu3 %v4407_v16  ;;  %2004 = vmatpush.bf16.msra.mxu1 %v4119_v19  ;;  %v4479_v16 = vor.u32 %v5254_v14, %v4478_v13  ;;  %v4671_v18 = vor.u32 %v5302_v17, %v4670_v15  ;;  %v4462_v19 = vld [vmem:[%s6426_s24] sm:$0xf]  ;;  %v5256_v13 = vld [vmem:[%s6426_s24 + $0x44] sm:$0xf]  ;;  %v4496_v14 = vld [vmem:[%s6426_s24 + $0x50] sm:$0xf0]  ;;  %p6025_p7 = pneg %p6024_p6 }
 0x164   : > { %v4463_v22 = vor.u32 %v5250_v20, %v4462_v19  ;;  %v5304_v15 = vld [vmem:[%s6426_s24 + $0x1c4] sm:$0xf]  ;;  %v4688_v17 = vld [vmem:[%s6426_s24 + $0x1d0] sm:$0xf0]  ;;  %v4750_v20 = vld [vmem:[%s6426_s24 + $0x240] sm:$0xf] }
 0x165   : > { %2016 = vmatpush.bf16.msra.mxu2 %v4263_v23  ;;  %v5298_v23 = vld [vmem:[%s6426_s24 + $0x18c] sm:$0xf0]  ;;  %p6030_p13 = pnand %p6029_p12, %p6025_p7 }
 0x166   : > { %1992 = vmatpush.bf16.msra.mxu0 %v3975_v29  ;;  %v4655_v26 = vor.u32 %v5298_v23, %v4654_v21  ;;  %v5294_v29 = vld [vmem:[%s6426_s24 + $0x16c] sm:$0xf0] }
 0x167   : > { %2029 = vmatpush.bf16.msra.mxu3 %v4391_v28  ;;  %2005 = vmatpush.bf16.msra.mxu1 %v4103_v32  ;;  %v4638_v28 = vld [vmem:[%s6426_s24 + $0x160] sm:$0xf]  ;;  %v5342_v32 = vld [vmem:[%s6426_s24 + $0x2ec] sm:$0xf0] }
 0x168   : > { %v4639_v31 = vor.u32 %v5294_v29, %v4638_v28  ;;  %v4831_v35 = vor.u32 %v5342_v32, %v4830_v30  ;;  %v5322_v21 = vld [vmem:[%s6426_s24 + $0x24c] sm:$0xf0]  ;;  %v4483_v28 = vor.u32 %v5252_v24, %v4480_v25  ;;  %v4672_v29 = vld [vmem:[%s6426_s24 + $0x1b0] sm:$0xf0] }
 0x169   : > { %2017 = vmatpush.bf16.msra.mxu2 %v4247_v10  ;;  %v4563_v10 = vor.u32 %v5272_v33, %v4560_v34  ;;  %v4751_v23 = vor.u32 %v5322_v21, %v4750_v20  ;;  %v4734_v34 = vld [vmem:[%s6426_s24 + $0x220] sm:$0xf]  ;;  %v4800_v20 = vld [vmem:[%s6426_s24 + $0x2b0] sm:$0xf0] }
 0x16a   : > { %1993 = vmatpush.bf16.msra.mxu0 %v3959_v45  ;;  %v4544_v45 = vld [vmem:[%s6426_s24 + $0xb0] sm:$0xf0] }
 0x16b   : > { %2030 = vmatpush.bf16.msra.mxu3 %v4375_v44  ;;  %2006 = vmatpush.bf16.msra.mxu1 %v4087_v46  ;;  %v5268_v44 = vld [vmem:[%s6426_s24 + $0xa4] sm:$0xf]  ;;  %v4815_v46 = vor.u32 %v5338_v43, %v4814_v42  ;;  %v4464_v42 = vld [vmem:[%s6426_s24 + $0x10] sm:$0xf0] }
 0x16c   : > { %v4547_v47 = vor.u32 %v5268_v44, %v4544_v45  ;;  %v4467_v44 = vor.u32 %v5248_v41, %v4464_v42  ;;  %v4656_v45 = vld [vmem:[%s6426_s24 + $0x190] sm:$0xf0] }
 0x16d   : > { %2018 = vmatpush.bf16.msra.mxu2 %v4231_v50  ;;  %1994 = vmatmul.bf16.vlgmr.msra.gmra.mxu0 %v6642_v38  ;;  %v5266_v38 = vld [vmem:[%s6426_s24 + $0x8c] sm:$0xf0]  ;;  %v4606_v50 = vld [vmem:[%s6426_s24 + $0x120] sm:$0xf] }
 0x16e   : > { %2900 = vmatpush.bf16.msrb.mxu0 %v4575_v49  ;;  %2007 = vmatmul.bf16.vlgmr.msra.gmra.mxu1 %v6647_v40  ;;  %v4527_v36 = vor.u32 %v5266_v38, %v4526_v1  ;;  %v4702_v40 = vld [vmem:[%s6426_s24 + $0x1e0] sm:$0xf]  ;;  %v4607_v54 = vor.u32 %v5286_v51, %v4606_v50  ;;  %v5330_v38 = vld [vmem:[%s6426_s24 + $0x28c] sm:$0xf0] }
 0x16f   : > { %2031 = vmatpush.bf16.msra.mxu3 %v4359_v55  ;;  %v4703_v5 = vor.u32 %v5310_v4, %v4702_v40  ;;  %v5334_v55 = vld [vmem:[%s6426_s24 + $0x2ac] sm:$0xf0]  ;;  %v5308_v4 = vld [vmem:[%s6426_s24 + $0x1e4] sm:$0xf]  ;;  %v4958_v51 = vld [vmem:[%s6426_s24 + $0x3e0] sm:$0xf] }
 0x170   : > { %v5314_v50 = vld [vmem:[%s6426_s24 + $0x20c] sm:$0xf0] }
 0x171   : > { %2019 = vmatpush.bf16.msra.mxu2 %v4215_v59  ;;  %2913 = vmatpush.bf16.msrb.mxu1 %v4703_v5  ;;  %v4531_v59 = vor.u32 %v5264_v56, %v4528_v57  ;;  %v4704_v5 = vld [vmem:[%s6426_s24 + $0x1f0] sm:$0xf0] }
 0x172   : > { %2901 = vmatpush.bf16.msrb.mxu0 %v4559_v58  ;;  %v4799_v58 = vor.u32 %v5334_v55, %v4798_v52  ;;  %v5292_v55 = vld [vmem:[%s6426_s24 + $0x164] sm:$0xf]  ;;  %v4640_v56 = vld [vmem:[%s6426_s24 + $0x170] sm:$0xf0] }
 0x173   : > { %2032 = vmatpush.bf16.msra.mxu3 %v4343_v62  ;;  %v5282_v62 = vld [vmem:[%s6426_s24 + $0x10c] sm:$0xf0] }
 0x174   : > { %2020 = vmatmul.bf16.vlgmr.msra.gmra.mxu2 %v6664_v63  ;;  %v4494_v63 = vld [vmem:[%s6426_s24 + $0x40] sm:$0xf]  ;;  %v4591_v1 = vor.u32 %v5282_v62, %v4590_v61 }
 0x175   : > { %v4495_v9 = vor.u32 %v5258_v7, %v4494_v63  ;;  %2926 = vmatpush.bf16.msrb.mxu2 %v4831_v35  ;;  %v5318_v35 = vld [vmem:[%s6426_s24 + $0x22c] sm:$0xf0] }
 0x176   : > { %2902 = vmatpush.bf16.msrb.mxu0 %v4543_v0  ;;  %2033 = vmatmul.bf16.vlgmr.msra.gmra.mxu3 %v6672_v8  ;;  %v4686_v8 = vld [vmem:[%s6426_s24 + $0x1c0] sm:$0xf]  ;;  %v4735_v39 = vor.u32 %v5318_v35, %v4734_v34 }
 0x177   : > { %v4687_v12 = vor.u32 %v5306_v37, %v4686_v8  ;;  %v4782_v0 = vld [vmem:[%s6426_s24 + $0x280] sm:$0xf] }
 0x178   : > { %v4783_v3 = vor.u32 %v5330_v38, %v4782_v0  ;;  %v4766_v8 = vld [vmem:[%s6426_s24 + $0x260] sm:$0xf] }
 0x179   : > { %2914 = vmatpush.bf16.msrb.mxu1 %v4687_v12  ;;  %2927 = vmatpush.bf16.msrb.mxu2 %v4815_v46  ;;  %v1183_v46 = vperm.slane %v6835_v48, 1  ;;  %v4942_v38 = vld [vmem:[%s6426_s24 + $0x3c0] sm:$0xf] }
 0x17a   : > { %2903 = vmatpush.bf16.msrb.mxu0 %v4527_v36  ;;  %v4512_v36 = vld [vmem:[%s6426_s24 + $0x70] sm:$0xf0] }
 0x17b   : > { %v4515_v40 = vor.u32 %v5260_v2, %v4512_v36  ;;  %v5370_v2 = vld [vmem:[%s6426_s24 + $0x3cc] sm:$0xf0] }
 0x17d   : > { %2915 = vmatpush.bf16.msrb.mxu1 %v4671_v18  ;;  %2928 = vmatpush.bf16.msrb.mxu2 %v4799_v58  ;;  %v4691_v18 = vor.u32 %v5304_v15, %v4688_v17  ;;  %v4643_v58 = vor.u32 %v5292_v55, %v4640_v56  ;;  %v5284_v15 = vld [vmem:[%s6426_s24 + $0x124] sm:$0xf] }
 0x17e   : > { %2904 = vmatpush.bf16.msrb.mxu0 %v4511_v6  ;;  %v4707_v6 = vor.u32 %v5308_v4, %v4704_v5  ;;  %v4624_v4 = vld [vmem:[%s6426_s24 + $0x150] sm:$0xf0]  ;;  %v5336_v5 = vld [vmem:[%s6426_s24 + $0x2c4] sm:$0xf] }
 0x181   : > { %2916 = vmatpush.bf16.msrb.mxu1 %v4655_v26  ;;  %2929 = vmatpush.bf16.msrb.mxu2 %v4783_v3  ;;  %v5300_v26 = vld [vmem:[%s6426_s24 + $0x1a4] sm:$0xf]  ;;  %v4943_v3 = vor.u32 %v5370_v2, %v4942_v38 }
 0x182   : > { %2905 = vmatpush.bf16.msrb.mxu0 %v4495_v9  ;;  %v5326_v9 = vld [vmem:[%s6426_s24 + $0x26c] sm:$0xf0] }
 0x183   : > { %v4767_v12 = vor.u32 %v5326_v9, %v4766_v8 }
 0x185   : > { %2917 = vmatpush.bf16.msrb.mxu1 %v4639_v31  ;;  %2930 = vmatpush.bf16.msrb.mxu2 %v4767_v12  ;;  %v4675_v31 = vor.u32 %v5300_v26, %v4672_v29  ;;  %v4926_v12 = vld [vmem:[%s6426_s24 + $0x3a0] sm:$0xf] }
 0x186   : > { %2906 = vmatpush.bf16.msrb.mxu0 %v4479_v16  ;;  %v4499_v16 = vor.u32 %v5256_v13, %v4496_v14  ;;  %v5366_v13 = vld [vmem:[%s6426_s24 + $0x3ac] sm:$0xf0]  ;;  %v4910_v26 = vld [vmem:[%s6426_s24 + $0x380] sm:$0xf] }
 0x187   : > { %v4927_v17 = vor.u32 %v5366_v13, %v4926_v12 }
 0x189   : > { %2918 = vmatpush.bf16.msrb.mxu1 %v4623_v11  ;;  %2931 = vmatpush.bf16.msrb.mxu2 %v4751_v23  ;;  %v5296_v11 = vld [vmem:[%s6426_s24 + $0x184] sm:$0xf] }
 0x18a   : > { %2907 = vmatpush.bf16.msrb.mxu0 %v4463_v22 }
 0x18d   : > { %2919 = vmatpush.bf16.msrb.mxu1 %v4607_v54  ;;  %2932 = vmatpush.bf16.msrb.mxu2 %v4735_v39  ;;  %v5374_v54 = vld [vmem:[%s6426_s24 + $0x3ec] sm:$0xf0] }
 0x18e   : > { %2952 = vmatpush.bf16.msra.mxu0 %v4579_v27  ;;  %v4959_v57 = vor.u32 %v5374_v54, %v4958_v51 }
 0x190   : > { %2939 = vmatpush.bf16.msrb.mxu3 %v4959_v57  ;;  %v4878_v57 = vld [vmem:[%s6426_s24 + $0x340] sm:$0xf] }
 0x191   : > { %2920 = vmatpush.bf16.msrb.mxu1 %v4591_v1 }
 0x192   : > { %2953 = vmatpush.bf16.msra.mxu0 %v4563_v10 }
 0x194   : > { %2940 = vmatpush.bf16.msrb.mxu3 %v4943_v3 }
 0x195   : > { %2965 = vmatpush.bf16.msra.mxu1 %v4707_v6 }
 0x196   : > { %2954 = vmatpush.bf16.msra.mxu0 %v4547_v47  ;;  %v4659_v47 = vor.u32 %v5296_v11, %v4656_v45  ;;  %v4894_v11 = vld [vmem:[%s6426_s24 + $0x360] sm:$0xf] }
 0x198   : > { %2941 = vmatpush.bf16.msrb.mxu3 %v4927_v17 }
 0x199   : > { %2966 = vmatpush.bf16.msra.mxu1 %v4691_v18  ;;  %v4608_v18 = vld [vmem:[%s6426_s24 + $0x130] sm:$0xf0] }
 0x19a   : > { %2955 = vmatpush.bf16.msra.mxu0 %v4531_v59  ;;  %v5340_v59 = vld [vmem:[%s6426_s24 + $0x2e4] sm:$0xf] }
 0x19d   : > { %2967 = vmatpush.bf16.msra.mxu1 %v4675_v31  ;;  %v4592_v31 = vld [vmem:[%s6426_s24 + $0x110] sm:$0xf0] }
 0x19e   : > { %2956 = vmatpush.bf16.msra.mxu0 %v4515_v40  ;;  %v5288_v40 = vld [vmem:[%s6426_s24 + $0x144] sm:$0xf] }
 0x1a1   : > { %2968 = vmatpush.bf16.msra.mxu1 %v4659_v47  ;;  %v5324_v47 = vld [vmem:[%s6426_s24 + $0x264] sm:$0xf] }
 0x1a2   : > { %2957 = vmatpush.bf16.msra.mxu0 %v4499_v16 }
 0x1a5   : > { %2969 = vmatpush.bf16.msra.mxu1 %v4643_v58  ;;  %v5354_v58 = vld [vmem:[%s6426_s24 + $0x34c] sm:$0xf0] }
 0x1a6   : > { %2958 = vmatpush.bf16.msra.mxu0 %v4483_v28 }
 0x1aa   : > { %v1839_v49 = vpop.f32.mrf.mxu0  ;;  %2959 = vmatpush.bf16.msra.mxu0 %v4467_v44  ;;  %v1184_v44 = vperm.slane %v6835_v48, 2 }
 0x1ab   : > { %v1852_v53 = vpop.f32.mrf.mxu1  ;;  %v1840_v63 = vadd.f32 %v1839_v49, %v1182_v60  ;;  %v4718_v49 = vld [vmem:[%s6426_s24 + $0x200] sm:$0xf]  ;;  %v4832_v60 = vld [vmem:[%s6426_s24 + $0x2f0] sm:$0xf0] }
 0x1ac   : > { %v4835_v62 = vor.u32 %v5340_v59, %v4832_v60 }
 0x1ad   : > { %v1853_v19 = vadd.f32 %v1852_v53, %v1840_v63  ;;  %v4719_v53 = vor.u32 %v5314_v50, %v4718_v49  ;;  %v4627_v63 = vor.u32 %v5288_v40, %v4624_v4  ;;  %v4768_v49 = vld [vmem:[%s6426_s24 + $0x270] sm:$0xf0]  ;;  %v4582_v40 = vld [vmem:[%s6426_s24 + $0xe8] sm:$0xf]  ;;  %v5279_v4 = vld [vmem:[%s6426_s24 + $0xf4] sm:$0xf0] }
 0x1ae   : > { %v4771_v51 = vor.u32 %v5324_v47, %v4768_v49 }
 0x1af   : > { %2933 = vmatpush.bf16.msrb.mxu2 %v4719_v53  ;;  %2970 = vmatpush.bf16.msra.mxu1 %v4627_v63  ;;  %v5350_v63 = vld [vmem:[%s6426_s24 + $0x32c] sm:$0xf0] }
 0x1b2   : > { %v1841_v7 = vpop.f32.mrf.mxu0 }
 0x1b3   : > { %v1854_v37 = vpop.f32.mrf.mxu1  ;;  %2978 = vmatpush.bf16.msra.mxu2 %v4835_v62  ;;  %v4816_v7 = vld [vmem:[%s6426_s24 + $0x2d0] sm:$0xf0]  ;;  %v5320_v62 = vld [vmem:[%s6426_s24 + $0x244] sm:$0xf] }
 0x1b4   : > { %v4819_v9 = vor.u32 %v5336_v5, %v4816_v7 }
 0x1b7   : > { %v1865_v22 = vpop.f32.mrf.mxu2  ;;  %2979 = vmatpush.bf16.msra.mxu2 %v4819_v9  ;;  %v5316_v9 = vld [vmem:[%s6426_s24 + $0x224] sm:$0xf] }
 0x1b8   : > { %v1866_v27 = vadd.f32 %v1865_v22, %v1853_v19  ;;  %v1878_v30 = vpop.f32.mrf.mxu3  ;;  %v5332_v19 = vld [vmem:[%s6426_s24 + $0x2a4] sm:$0xf]  ;;  %v4611_v22 = vor.u32 %v5284_v15, %v4608_v18  ;;  %v4583_v18 = vor.u32 %v5279_v4, %v4582_v40  ;;  %v4912_v40 = vld [vmem:[%s6426_s24 + $0x390] sm:$0xf0] }
 0x1b9   : > { %v4803_v25 = vor.u32 %v5332_v19, %v4800_v20  ;;  %v4566_v20 = vld [vmem:[%s6426_s24 + $0xc8] sm:$0xf] }
 0x1ba   : > { %v6864_v32 = vadd.f32 %v1878_v30, %v1866_v27  ;;  %v1891_v33 = vpop.f32.mrf.mxu0  ;;  %v5362_v27 = vld [vmem:[%s6426_s24 + $0x38c] sm:$0xf0]  ;;  %2971 = vmatpush.bf16.msra.mxu1 %v4611_v22  ;;  %v5280_v30 = vld [vmem:[%s6426_s24 + $0x104] sm:$0xf] }
 0x1bb   : > { %v1904_v10 = vpop.f32.mrf.mxu1  ;;  %v1892_v0 = vadd.f32 %v1891_v33, %v1183_v46  ;;  %v4911_v29 = vor.u32 %v5362_v27, %v4910_v26  ;;  %v5328_v33 = vld [vmem:[%s6426_s24 + $0x284] sm:$0xf]  ;;  %2980 = vmatpush.bf16.msra.mxu2 %v4803_v25  ;;  %v4595_v35 = vor.u32 %v5280_v30, %v4592_v31  ;;  %v4720_v27 = vld [vmem:[%s6426_s24 + $0x210] sm:$0xf0] }
 0x1bc   : > { %v4456_v43 = vmul.f32 -1.442695, %v6864_v32  ;;  %v5312_v25 = vld [vmem:[%s6426_s24 + $0x204] sm:$0xf] }
 0x1bd   : > { %v1905_v37 = vadd.f32 %v1904_v10, %v1892_v0  ;;  %v4784_v10 = vld [vmem:[%s6426_s24 + $0x290] sm:$0xf0]  ;;  %2942 = vmatpush.bf16.msrb.mxu3 %v4911_v29 }
 0x1be   : > { %5576 = vpow2.f32 %v4456_v43  ;;  %v4787_v41 = vor.u32 %v5328_v33, %v4784_v10  ;;  %v5358_v43 = vld [vmem:[%s6426_s24 + $0x36c] sm:$0xf0]  ;;  %2972 = vmatpush.bf16.msra.mxu1 %v4595_v35  ;;  %v4752_v0 = vld [vmem:[%s6426_s24 + $0x250] sm:$0xf0] }
 0x1bf   : > { %v1867_v52 = vpop.f32.mrf.mxu2  ;;  %v4895_v46 = vor.u32 %v5358_v43, %v4894_v11  ;;  %v4755_v2 = vor.u32 %v5320_v62, %v4752_v0  ;;  %v4960_v29 = vld [vmem:[%s6426_s24 + $0x3f0] sm:$0xf0]  ;;  %v5263_v62 = vld [vmem:[%s6426_s24 + $0x74] sm:$0xf0] }
 0x1c0   : > { %v1880_v61 = vpop.f32.mrf.mxu3  ;;  %2981 = vmatpush.bf16.msra.mxu2 %v4787_v41  ;;  %v5271_v41 = vld [vmem:[%s6426_s24 + $0xb4] sm:$0xf0] }
 0x1c1   : > { %2943 = vmatpush.bf16.msrb.mxu3 %v4895_v46  ;;  %v4879_v61 = vor.u32 %v5354_v58, %v4878_v57 }
 0x1c2   : > { %v1893_v1 = vpop.f32.mrf.mxu0 }
 0x1c3   : > { %v1906_v36 = vpop.f32.mrf.mxu1 }
 0x1c4   : > { %v5577_v6 = vpop.eup %5576  ;;  %2982 = vmatpush.bf16.msra.mxu2 %v4771_v51 }
 0x1c5   : > { %v6888_v8 = vadd.f32 1.0, %v5577_v6  ;;  %2944 = vmatpush.bf16.msrb.mxu3 %v4879_v61  ;;  %v4862_v6 = vld [vmem:[%s6426_s24 + $0x320] sm:$0xf]  ;;  %v4518_v61 = vld [vmem:[%s6426_s24 + $0x68] sm:$0xf] }
 0x1c7   : > { %5578 = vrcp.f32 %v6888_v8  ;;  %v1917_v14 = vpop.f32.mrf.mxu2  ;;  %v2065_v52 = vand.u32 2147483648, %v6888_v8  ;;  %v2063_v55 = vand.u32 2147483647, %v6888_v8  ;;  %vm2059_vm2 = vweird.f32 %v6888_v8 }
 0x1c8   : > { %v1918_v16 = vadd.f32 %v1917_v14, %v1905_v37  ;;  %v1930_v21 = vpop.f32.mrf.mxu3  ;;  %v4736_v37 = vld [vmem:[%s6426_s24 + $0x230] sm:$0xf0]  ;;  %2983 = vmatpush.bf16.msra.mxu2 %v4755_v2  ;;  %v4863_v14 = vor.u32 %v5350_v63, %v4862_v6  ;;  %v5311_v2 = vld [vmem:[%s6426_s24 + $0x1f4] sm:$0xf0]  ;;  %v4519_v63 = vor.u32 %v5263_v62, %v4518_v61 }
 0x1c9   : > { %v2066_v36 = vor.u32 1.1754944e-38, %v2065_v52  ;;  %vm2064_vm4 = vcmp.eq.f32.partialorder %v2063_v55, 8.507059e+37  ;;  %v4739_v15 = vor.u32 %v5316_v9, %v4736_v37  ;;  %v4534_v52 = vld [vmem:[%s6426_s24 + $0x88] sm:$0xf]  ;;  %v4928_v55 = vld [vmem:[%s6426_s24 + $0x3b0] sm:$0xf0] }
 0x1ca   : > { %v6897_v23 = vadd.f32 %v1930_v21, %v1918_v16  ;;  %v1943_v24 = vpop.f32.mrf.mxu0  ;;  %v5275_v21 = vld [vmem:[%s6426_s24 + $0xd4] sm:$0xf0]  ;;  %2945 = vmatpush.bf16.msrb.mxu3 %v4863_v14 }
 0x1cb   : > { %v1956_v28 = vpop.f32.mrf.mxu1  ;;  %v1944_v59 = vadd.f32 %v1943_v24, %v1184_v44  ;;  %v4846_v24 = vld [vmem:[%s6426_s24 + $0x300] sm:$0xf]  ;;  %v4567_v33 = vor.u32 %v5275_v21, %v4566_v20  ;;  %v4944_v44 = vld [vmem:[%s6426_s24 + $0x3d0] sm:$0xf0]  ;;  %v5307_v14 = vld [vmem:[%s6426_s24 + $0x1d4] sm:$0xf0] }
 0x1cc   : > { %v4457_v34 = vmul.f32 -1.442695, %v6897_v23  ;;  %2984 = vmatpush.bf16.msra.mxu2 %v4739_v15  ;;  %v5356_v15 = vld [vmem:[%s6426_s24 + $0x364] sm:$0xf]  ;;  %v4486_v20 = vld [vmem:[%s6426_s24 + $0x28] sm:$0xf] }
 0x1cd   : > { %v5579_v39 = vpop.eup %5578  ;;  %v5343_v61 = vld [vmem:[%s6426_s24 + $0x2f4] sm:$0xf0] }
 0x1ce   : > { %v2055_v42 = vmul.f32 %v5579_v39, %v6888_v8  ;;  %5580 = vpow2.f32 %v4457_v34  ;;  %vm2060_vm1 = vweird.f32 %v5579_v39  ;;  %v1957_v8 = vadd.f32 %v1956_v28, %v1944_v59  ;;  %v5372_v28 = vld [vmem:[%s6426_s24 + $0x3e4] sm:$0xf] }
 0x1cf   : > { %v1919_v45 = vpop.f32.mrf.mxu2  ;;  %vm2061_vm3 = vmor %vm2059_vm2, %vm2060_vm1  ;;  %v4723_v34 = vor.u32 %v5312_v25, %v4720_v27  ;;  %v4963_v35 = vor.u32 %v5372_v28, %v4960_v29  ;;  %v5303_v25 = vld [vmem:[%s6426_s24 + $0x1b4] sm:$0xf0]  ;;  %v5352_v28 = vld [vmem:[%s6426_s24 + $0x344] sm:$0xf] }
 0x1d0   : > { %v2056_v50 = vsub.f32 1.0, %v2055_v42  ;;  %v1932_v53 = vpop.f32.mrf.mxu3  ;;  %v5368_v42 = vld [vmem:[%s6426_s24 + $0x3c4] sm:$0xf]  ;;  %v4880_v29 = vld [vmem:[%s6426_s24 + $0x350] sm:$0xf0] }
 0x1d1   : > { %2985 = vmatpush.bf16.msra.mxu2 %v4723_v34  ;;  %v4947_v49 = vor.u32 %v5368_v42, %v4944_v44  ;;  %v5267_v53 = vld [vmem:[%s6426_s24 + $0x94] sm:$0xf0]  ;;  %v4883_v34 = vor.u32 %v5352_v28, %v4880_v29  ;;  %v4662_v42 = vld [vmem:[%s6426_s24 + $0x188] sm:$0xf]  ;;  %v5277_v44 = vld [vmem:[%s6426_s24 + $0xec] sm:$0xf] }
 0x1d2   : > { %v2057_v54 = vmul.f32 %v5579_v39, %v2056_v50  ;;  %v1945_v56 = vpop.f32.mrf.mxu0  ;;  %v5265_v28 = vld [vmem:[%s6426_s24 + $0x8c] sm:$0xf]  ;;  %v4536_v29 = vld [vmem:[%s6426_s24 + $0x98] sm:$0xf0] }
 0x1d3   : > { %v1958_v60 = vpop.f32.mrf.mxu1 }
 0x1d4   : > { %v5581_v1 = vpop.eup %5580  ;;  %v2058_v38 = vadd.f32 %v5579_v39, %v2057_v54  ;;  %v5364_v54 = vld [vmem:[%s6426_s24 + $0x3a4] sm:$0xf]  ;;  %v4535_v60 = vor.u32 %v5267_v53, %v4534_v52 }
 0x1d5   : > { %v6920_v3 = vadd.f32 1.0, %v5581_v1  ;;  %v4931_v57 = vor.u32 %v5364_v54, %v4928_v55  ;;  %v4646_v54 = vld [vmem:[%s6426_s24 + $0x168] sm:$0xf] }
 0x1d6   : > { %v2062_v5 = vsel %vm2061_vm3, %v5579_v39, %v2058_v38  ;;  %v4550_v39 = vld [vmem:[%s6426_s24 + $0xa8] sm:$0xf] }
 0x1d7   : > { %v2067_v7 = vsel %vm2064_vm4, %v2066_v36, %v2062_v5  ;;  %5582 = vrcp.f32 %v6920_v3  ;;  %v1969_v13 = vpop.f32.mrf.mxu2  ;;  %v2080_v45 = vand.u32 2147483648, %v6920_v3  ;;  %v4551_v47 = vor.u32 %v5271_v41, %v4550_v39  ;;  %v4710_v38 = vld [vmem:[%s6426_s24 + $0x1e8] sm:$0xf] }
 0x1d8   : > { %v2114_v12 = vmul.f32 %v2067_v7, %v6864_v32  ;;  %v1970_v16 = vadd.f32 %v1969_v13, %v1957_v8  ;;  %v5346_v32 = vld [vmem:[%s6426_s24 + $0x30c] sm:$0xf0]  ;;  %v2078_v51 = vand.u32 2147483647, %v6920_v3  ;;  %vm2074_vm6 = vweird.f32 %v6920_v3  ;;  %v4502_v8 = vld [vmem:[%s6426_s24 + $0x48] sm:$0xf] }
 0x1d9   : > { %v1982_v17 = vpop.f32.mrf.mxu3  ;;  %v4847_v26 = vor.u32 %v5346_v32, %v4846_v24  ;;  %v2081_v59 = vor.u32 1.1754944e-38, %v2080_v45  ;;  %v4711_v7 = vor.u32 %v5311_v2, %v4710_v38  ;;  %v4694_v13 = vld [vmem:[%s6426_s24 + $0x1c8] sm:$0xf]  ;;  %v5255_v32 = vld [vmem:[%s6426_s24 + $0x34] sm:$0xf0] }
 0x1da   : > { %v6930_v19 = vpack.c.bf16 %v2114_v12, %v2114_v12  ;;  %v6934_v22 = vadd.f32 %v1982_v17, %v1970_v16  ;;  %vm2079_vm8 = vcmp.eq.f32.partialorder %v2078_v51, 8.507059e+37  ;;  %v5259_v12 = vld [vmem:[%s6426_s24 + $0x54] sm:$0xf0]  ;;  %v4896_v16 = vld [vmem:[%s6426_s24 + $0x370] sm:$0xf0]  ;;  %v4487_v39 = vor.u32 %v5255_v32, %v4486_v20 }
 0x1db   : > { %2946 = vmatpush.bf16.msrb.mxu3 %v4847_v26  ;;  %v4503_v17 = vor.u32 %v5259_v12, %v4502_v8  ;;  %v4899_v21 = vor.u32 %v5356_v15, %v4896_v16  ;;  %v4584_v45 = vld [vmem:[%s6426_s24 + $0xf8] sm:$0xf0]  ;;  %v4864_v51 = vld [vmem:[%s6426_s24 + $0x330] sm:$0xf0]  ;;  %v5273_v2 = vld [vmem:[%s6426_s24 + $0xcc] sm:$0xf] }
 0x1dc   : > { %2908 = vmatmul.bf16.vlgmr.msrb.gmra.mxu0 %v6930_v19  ;;  %v4458_v31 = vmul.f32 -1.442695, %v6934_v22  ;;  %v4587_v38 = vor.u32 %v5277_v44, %v4584_v45  ;;  %v5339_v16 = vld [vmem:[%s6426_s24 + $0x2d4] sm:$0xf0]  ;;  %v5309_v44 = vld [vmem:[%s6426_s24 + $0x1ec] sm:$0xf] }
 0x1dd   : > { %v5583_v30 = vpop.eup %5582  ;;  %3004 = vmatpush.bf16.msrb.mxu0 %v4583_v18  ;;  %v4695_v18 = vor.u32 %v5307_v14, %v4694_v13  ;;  %v4630_v13 = vld [vmem:[%s6426_s24 + $0x148] sm:$0xf]  ;;  %v5291_v14 = vld [vmem:[%s6426_s24 + $0x154] sm:$0xf0]  ;;  %v4712_v45 = vld [vmem:[%s6426_s24 + $0x1f8] sm:$0xf0] }
 0x1de   : > { %v2070_v10 = vmul.f32 %v5583_v30, %v6920_v3  ;;  %5584 = vpow2.f32 %v4458_v31  ;;  %vm2075_vm5 = vweird.f32 %v5583_v30  ;;  %v5360_v3 = vld [vmem:[%s6426_s24 + $0x384] sm:$0xf]  ;;  %v4470_v31 = vld [vmem:[%s6426_s24 + $0x8] sm:$0xf]  ;;  %v4631_v20 = vor.u32 %v5291_v14, %v4630_v13  ;;  %v5249_v13 = vld [vmem:[%s6426_s24 + $0xc] sm:$0xf] }
 0x1df   : > { %2991 = vmatpush.bf16.msra.mxu3 %v4963_v35  ;;  %v1971_v43 = vpop.f32.mrf.mxu2  ;;  %vm2076_vm7 = vmor %vm2074_vm6, %vm2075_vm5  ;;  %v4915_v9 = vor.u32 %v5360_v3, %v4912_v40  ;;  %v5344_v40 = vld [vmem:[%s6426_s24 + $0x304] sm:$0xf]  ;;  %v4472_v14 = vld [vmem:[%s6426_s24 + $0x18] sm:$0xf0] }
 0x1e0   : > { %v2071_v11 = vsub.f32 1.0, %v2070_v10 }
 0x1e1   : > { %v1984_v46 = vpop.f32.mrf.mxu3  ;;  %3005 = vmatpush.bf16.msrb.mxu0 %v4567_v33  ;;  %v5251_v33 = vld [vmem:[%s6426_s24 + $0x14] sm:$0xf0] }
 0x1e2   : > { %v2072_v50 = vmul.f32 %v5583_v30, %v2071_v11  ;;  %v5299_v11 = vld [vmem:[%s6426_s24 + $0x194] sm:$0xf0]  ;;  %v4471_v53 = vor.u32 %v5251_v33, %v4470_v31  ;;  %v4598_v33 = vld [vmem:[%s6426_s24 + $0x108] sm:$0xf] }
 0x1e3   : > { %2992 = vmatpush.bf16.msra.mxu3 %v4947_v49 }
 0x1e4   : > { %v2073_v56 = vadd.f32 %v5583_v30, %v2072_v50  ;;  %v5585_v58 = vpop.eup %5584  ;;  %v5348_v50 = vld [vmem:[%s6426_s24 + $0x324] sm:$0xf] }
 0x1e5   : > { %3006 = vmatpush.bf16.msrb.mxu0 %v4551_v47  ;;  %v6958_v1 = vadd.f32 1.0, %v5585_v58  ;;  %v4867_v55 = vor.u32 %v5348_v50, %v4864_v51  ;;  %v4663_v58 = vor.u32 %v5299_v11, %v4662_v42  ;;  %v5331_v42 = vld [vmem:[%s6426_s24 + $0x294] sm:$0xf0]  ;;  %v5261_v11 = vld [vmem:[%s6426_s24 + $0x6c] sm:$0xf]  ;;  %v4715_v51 = vor.u32 %v5309_v44, %v4712_v45 }
 0x1e6   : > { %v2077_v0 = vsel %vm2076_vm7, %v5583_v30, %v2073_v56  ;;  %v4774_v50 = vld [vmem:[%s6426_s24 + $0x268] sm:$0xf]  ;;  %v4632_v44 = vld [vmem:[%s6426_s24 + $0x158] sm:$0xf0]  ;;  %v5337_v45 = vld [vmem:[%s6426_s24 + $0x2cc] sm:$0xf] }
 0x1e7   : > { %v2082_v36 = vsel %vm2079_vm8, %v2081_v59, %v2077_v0  ;;  %2993 = vmatpush.bf16.msra.mxu3 %v4931_v57  ;;  %5586 = vrcp.f32 %v6958_v1  ;;  %v2095_v43 = vand.u32 2147483648, %v6958_v1  ;;  %v2093_v47 = vand.u32 2147483647, %v6958_v1  ;;  %v5295_v59 = vld [vmem:[%s6426_s24 + $0x174] sm:$0xf0] }
 0x1e8   : > { %v2115_v4 = vmul.f32 %v2082_v36, %v6897_v23  ;;  %v1185_v23 = vperm.slane %v6835_v48, 3  ;;  %v4678_v48 = vld [vmem:[%s6426_s24 + $0x1a8] sm:$0xf]  ;;  %vm2089_vm10 = vweird.f32 %v6958_v1  ;;  %v4568_v36 = vld [vmem:[%s6426_s24 + $0xd8] sm:$0xf0]  ;;  %v4647_v8 = vor.u32 %v5295_v59, %v4646_v54 }
 0x1e9   : > { %3007 = vmatpush.bf16.msrb.mxu0 %v4535_v60  ;;  %v4679_v41 = vor.u32 %v5303_v25, %v4678_v48  ;;  %v4838_v60 = vld [vmem:[%s6426_s24 + $0x2e8] sm:$0xf]  ;;  %v2096_v62 = vor.u32 1.1754944e-38, %v2095_v43  ;;  %vm2094_vm12 = vcmp.eq.f32.partialorder %v2093_v47, 8.507059e+37  ;;  %v4571_v12 = vor.u32 %v5273_v2, %v4568_v36  ;;  %v5287_v25 = vld [vmem:[%s6426_s24 + $0x134] sm:$0xf0] }
 0x1ea   : > { %v1995_v5 = vpop.f32.mrf.mxu0  ;;  %v6967_v37 = vpack.c.bf16 %v2115_v4, %v2115_v4  ;;  %v4848_v4 = vld [vmem:[%s6426_s24 + $0x310] sm:$0xf0]  ;;  %v4614_v48 = vld [vmem:[%s6426_s24 + $0x128] sm:$0xf]  ;;  %v4520_v43 = vld [vmem:[%s6426_s24 + $0x78] sm:$0xf0] }
 0x1eb   : > { %v2008_v6 = vpop.f32.mrf.mxu1  ;;  %2994 = vmatpush.bf16.msra.mxu3 %v4915_v9  ;;  %v1996_v27 = vadd.f32 %v1995_v5, %v1185_v23  ;;  %v4839_v9 = vor.u32 %v5343_v61, %v4838_v60  ;;  %v4822_v23 = vld [vmem:[%s6426_s24 + $0x2c8] sm:$0xf]  ;;  %v4615_v31 = vor.u32 %v5287_v25, %v4614_v48  ;;  %v4504_v54 = vld [vmem:[%s6426_s24 + $0x58] sm:$0xf0]  ;;  %v5301_v36 = vld [vmem:[%s6426_s24 + $0x1ac] sm:$0xf] }
 0x1ec   : > { %2921 = vmatmul.bf16.vlgmr.msrb.gmra.mxu1 %v6967_v37  ;;  %2960 = vmatmul.bf16.vlgmr.msra.gmra.mxu0 %v6930_v19  ;;  %v4758_v60 = vld [vmem:[%s6426_s24 + $0x248] sm:$0xf]  ;;  %v4488_v2 = vld [vmem:[%s6426_s24 + $0x38] sm:$0xf0] }
 0x1ed   : > { %3008 = vmatpush.bf16.msrb.mxu0 %v4519_v63  ;;  %3017 = vmatpush.bf16.msrb.mxu1 %v4711_v7  ;;  %v5587_v24 = vpop.eup %5586  ;;  %v2009_v49 = vadd.f32 %v2008_v6, %v1996_v27  ;;  %v4851_v6 = vor.u32 %v5344_v40, %v4848_v4  ;;  %v5335_v27 = vld [vmem:[%s6426_s24 + $0x2b4] sm:$0xf0] }
 0x1ee   : > { %v2085_v26 = vmul.f32 %v5587_v24, %v6958_v1  ;;  %vm2090_vm9 = vweird.f32 %v5587_v24 }
 0x1ef   : > { %2995 = vmatpush.bf16.msra.mxu3 %v4899_v21  ;;  %vm2091_vm11 = vmor %vm2089_vm10, %vm2090_vm9 }
 0x1f0   : > { %v2086_v35 = vsub.f32 1.0, %v2085_v26  ;;  %v4806_v26 = vld [vmem:[%s6426_s24 + $0x2a8] sm:$0xf] }
 0x1f1   : > { %3009 = vmatpush.bf16.msrb.mxu0 %v4503_v17  ;;  %3018 = vmatpush.bf16.msrb.mxu1 %v4695_v18  ;;  %v5269_v17 = vld [vmem:[%s6426_s24 + $0xac] sm:$0xf] }
 0x1f2   : > { %v1997_v30 = vpop.f32.mrf.mxu0  ;;  %v2087_v46 = vmul.f32 %v5587_v24, %v2086_v35  ;;  %v4807_v35 = vor.u32 %v5335_v27, %v4806_v26  ;;  %v5375_v26 = vld [vmem:[%s6426_s24 + $0x3f4] sm:$0xf0]  ;;  %v5293_v27 = vld [vmem:[%s6426_s24 + $0x16c] sm:$0xf] }
 0x1f3   : > { %v2010_v10 = vpop.f32.mrf.mxu1  ;;  %2996 = vmatpush.bf16.msra.mxu3 %v4883_v34 }
 0x1f4   : > { %v2088_v56 = vadd.f32 %v5587_v24, %v2087_v46  ;;  %v4539_v10 = vor.u32 %v5265_v28, %v4536_v29  ;;  %v4648_v29 = vld [vmem:[%s6426_s24 + $0x178] sm:$0xf0] }
 0x1f5   : > { %3010 = vmatpush.bf16.msrb.mxu0 %v4487_v39  ;;  %3019 = vmatpush.bf16.msrb.mxu1 %v4679_v41  ;;  %v5283_v39 = vld [vmem:[%s6426_s24 + $0x114] sm:$0xf0]  ;;  %v4790_v41 = vld [vmem:[%s6426_s24 + $0x288] sm:$0xf] }
 0x1f6   : > { %v2092_v3 = vsel %vm2091_vm11, %v5587_v24, %v2088_v56  ;;  %v4823_v24 = vor.u32 %v5339_v16, %v4822_v23  ;;  %v4599_v46 = vor.u32 %v5283_v39, %v4598_v33  ;;  %v4791_v47 = vor.u32 %v5331_v42, %v4790_v41  ;;  %v4696_v56 = vld [vmem:[%s6426_s24 + $0x1d8] sm:$0xf0]  ;;  %v5297_v23 = vld [vmem:[%s6426_s24 + $0x18c] sm:$0xf]  ;;  %v4950_v42 = vld [vmem:[%s6426_s24 + $0x3c8] sm:$0xf] }
 0x1f7   : > { %v2021_v52 = vpop.f32.mrf.mxu2  ;;  %2997 = vmatpush.bf16.msra.mxu3 %v4867_v55  ;;  %v2097_v5 = vsel %vm2094_vm12, %v2096_v62, %v2092_v3  ;;  %v5305_v55 = vld [vmem:[%s6426_s24 + $0x1cc] sm:$0xf]  ;;  %v4680_v3 = vld [vmem:[%s6426_s24 + $0x1b8] sm:$0xf0]  ;;  %v4651_v39 = vor.u32 %v5293_v27, %v4648_v29 }
 0x1f8   : > { %v2022_v57 = vadd.f32 %v2021_v52, %v2009_v49  ;;  %v2116_v63 = vmul.f32 %v2097_v5, %v6934_v22  ;;  %v4552_v22 = vld [vmem:[%s6426_s24 + $0xb8] sm:$0xf0]  ;;  %v4523_v49 = vor.u32 %v5261_v11, %v4520_v43  ;;  %v5327_v52 = vld [vmem:[%s6426_s24 + $0x274] sm:$0xf0]  ;;  %v4699_v62 = vor.u32 %v5305_v55, %v4696_v56  ;;  %v5289_v43 = vld [vmem:[%s6426_s24 + $0x14c] sm:$0xf] }
 0x1f9   : > { %v2034_v0 = vpop.f32.mrf.mxu3  ;;  %3011 = vmatpush.bf16.msrb.mxu0 %v4471_v53  ;;  %3020 = vmatpush.bf16.msrb.mxu1 %v4663_v58  ;;  %v4555_v32 = vor.u32 %v5269_v17, %v4552_v22  ;;  %v5257_v53 = vld [vmem:[%s6426_s24 + $0x4c] sm:$0xf]  ;;  %v4775_v58 = vor.u32 %v5327_v52, %v4774_v50  ;;  %v4664_v16 = vld [vmem:[%s6426_s24 + $0x198] sm:$0xf0]  ;;  %v4726_v22 = vld [vmem:[%s6426_s24 + $0x208] sm:$0xf] }
 0x1fa   : > { %v7002_v1 = vadd.f32 %v2034_v0, %v2022_v57  ;;  %v7011_v15 = vpack.c.bf16 %v2116_v63, %v2116_v63  ;;  %v4507_v59 = vor.u32 %v5257_v53, %v4504_v54  ;;  %v5323_v0 = vld [vmem:[%s6426_s24 + $0x254] sm:$0xf0]  ;;  %v4742_v63 = vld [vmem:[%s6426_s24 + $0x228] sm:$0xf]  ;;  %v4667_v25 = vor.u32 %v5297_v23, %v4664_v16  ;;  %v5285_v52 = vld [vmem:[%s6426_s24 + $0x12c] sm:$0xf] }
 0x1fb   : > { %2998 = vmatpush.bf16.msra.mxu3 %v4851_v6  ;;  %v4759_v5 = vor.u32 %v5323_v0, %v4758_v60  ;;  %v5371_v11 = vld [vmem:[%s6426_s24 + $0x3d4] sm:$0xf0]  ;;  %v4934_v50 = vld [vmem:[%s6426_s24 + $0x3a8] sm:$0xf]  ;;  %v4616_v53 = vld [vmem:[%s6426_s24 + $0x138] sm:$0xf0] }
 0x1fc   : > { %v4459_v7 = vmul.f32 -1.442695, %v7002_v1  ;;  %2973 = vmatmul.bf16.vlgmr.msra.gmra.mxu1 %v6967_v37  ;;  %3012 = vmatmul.bf16.vlgmr.msrb.gmra.mxu0 %v6930_v19  ;;  %v5333_v54 = vld [vmem:[%s6426_s24 + $0x2ac] sm:$0xf]  ;;  %v4808_v55 = vld [vmem:[%s6426_s24 + $0x2b8] sm:$0xf0]  ;;  %v4619_v56 = vor.u32 %v5285_v52, %v4616_v53 }
 0x1fd   : > { %3056 = vmatpush.bf16.msra.mxu0 %v4587_v38  ;;  %2934 = vmatmul.bf16.vlgmr.msrb.gmra.mxu2 %v7011_v15  ;;  %v5253_v38 = vld [vmem:[%s6426_s24 + $0x2c] sm:$0xf]  ;;  %v4792_v0 = vld [vmem:[%s6426_s24 + $0x298] sm:$0xf0]  ;;  %v4870_v23 = vld [vmem:[%s6426_s24 + $0x328] sm:$0xf] }
 0x1fe   : > { %5588 = vpow2.f32 %v4459_v7  ;;  %3021 = vmatpush.bf16.msrb.mxu1 %v4647_v8  ;;  %3030 = vmatpush.bf16.msrb.mxu2 %v4839_v9  ;;  %v4491_v6 = vor.u32 %v5253_v38, %v4488_v2  ;;  %v5319_v7 = vld [vmem:[%s6426_s24 + $0x234] sm:$0xf0]  ;;  %v5281_v60 = vld [vmem:[%s6426_s24 + $0x10c] sm:$0xf] }
 0x1ff   : > { %v2023_v18 = vpop.f32.mrf.mxu2  ;;  %v5351_v16 = vld [vmem:[%s6426_s24 + $0x334] sm:$0xf0]  ;;  %v5369_v29 = vld [vmem:[%s6426_s24 + $0x3cc] sm:$0xf] }
 0x201   : > { %v2036_v21 = vpop.f32.mrf.mxu3  ;;  %3057 = vmatpush.bf16.msra.mxu0 %v4571_v12  ;;  %v4683_v12 = vor.u32 %v5301_v36, %v4680_v3  ;;  %v4902_v3 = vld [vmem:[%s6426_s24 + $0x368] sm:$0xf] }
 0x202   : > { %3022 = vmatpush.bf16.msrb.mxu1 %v4631_v20  ;;  %3031 = vmatpush.bf16.msrb.mxu2 %v4823_v24  ;;  %v4743_v20 = vor.u32 %v5319_v7, %v4742_v63  ;;  %v4475_v21 = vor.u32 %v5249_v13, %v4472_v14  ;;  %v5315_v24 = vld [vmem:[%s6426_s24 + $0x214] sm:$0xf0]  ;;  %v4886_v7 = vld [vmem:[%s6426_s24 + $0x348] sm:$0xf] }
 0x204   : > { %v5589_v30 = vpop.eup %5588 }
 0x205   : > { %v7026_v34 = vadd.f32 1.0, %v5589_v30  ;;  %3058 = vmatpush.bf16.msra.mxu0 %v4555_v32  ;;  %v4966_v32 = vld [vmem:[%s6426_s24 + $0x3e8] sm:$0xf]  ;;  %v5341_v30 = vld [vmem:[%s6426_s24 + $0x2ec] sm:$0xf] }
 0x206   : > { %3023 = vmatpush.bf16.msrb.mxu1 %v4615_v31  ;;  %3032 = vmatpush.bf16.msrb.mxu2 %v4807_v35  ;;  %v4840_v31 = vld [vmem:[%s6426_s24 + $0x2f8] sm:$0xf0]  ;;  %v4967_v35 = vor.u32 %v5375_v26, %v4966_v32  ;;  %v5313_v32 = vld [vmem:[%s6426_s24 + $0x20c] sm:$0xf] }
 0x207   : > { %5590 = vrcp.f32 %v7026_v34  ;;  %v2110_v4 = vand.u32 2147483648, %v7026_v34  ;;  %v2108_v9 = vand.u32 2147483647, %v7026_v34  ;;  %vm2104_vm14 = vweird.f32 %v7026_v34 }
 0x208   : > { %v4843_v41 = vor.u32 %v5341_v30, %v4840_v31  ;;  %v4952_v30 = vld [vmem:[%s6426_s24 + $0x3d8] sm:$0xf0] }
 0x209   : > { %3059 = vmatpush.bf16.msra.mxu0 %v4539_v10  ;;  %v2111_v18 = vor.u32 1.1754944e-38, %v2110_v4  ;;  %vm2109_vm0 = vcmp.eq.f32.partialorder %v2108_v9, 8.507059e+37  ;;  %v5325_v4 = vld [vmem:[%s6426_s24 + $0x26c] sm:$0xf]  ;;  %v4955_v31 = vor.u32 %v5369_v29, %v4952_v30  ;;  %v5386_v29 = vld [vmem:[%s6434_s22 + $0x50] sm:$0xff] }
 0x20a   : > { %3024 = vmatpush.bf16.msrb.mxu1 %v4599_v46  ;;  %3033 = vmatpush.bf16.msrb.mxu2 %v4791_v47  ;;  %v4951_v46 = vor.u32 %v5371_v11, %v4950_v42  ;;  %v4635_v47 = vor.u32 %v5289_v43, %v4632_v44  ;;  %v5321_v9 = vld [vmem:[%s6426_s24 + $0x24c] sm:$0xf]  ;;  %v4904_v43 = vld [vmem:[%s6426_s24 + $0x378] sm:$0xf0] }
 0x20b   : > { %v5357_v11 = vld [vmem:[%s6426_s24 + $0x36c] sm:$0xf]  ;;  %v5398_v30 = vld [vmem:[%s6434_s22 + $0xb0] sm:$0xff] }
 0x20c   : > { %v4907_v44 = vor.u32 %v5357_v11, %v4904_v43 }
 0x20d   : > { %v5591_v57 = vpop.eup %5590  ;;  %3060 = vmatpush.bf16.msra.mxu0 %v4523_v49  ;;  %3025 = vmatmul.bf16.vlgmr.msrb.gmra.mxu1 %v6967_v37 }
 0x20e   : > { %v2100_v61 = vmul.f32 %v5591_v57, %v7026_v34  ;;  %3069 = vmatpush.bf16.msra.mxu1 %v4715_v51  ;;  %2986 = vmatmul.bf16.vlgmr.msra.gmra.mxu2 %v7011_v15  ;;  %vm2105_vm13 = vweird.f32 %v5591_v57  ;;  %v4727_v34 = vor.u32 %v5315_v24, %v4726_v22  ;;  %v5367_v51 = vld [vmem:[%s6426_s24 + $0x3b4] sm:$0xf0]  ;;  %v4744_v22 = vld [vmem:[%s6426_s24 + $0x238] sm:$0xf0] }
 0x20f   : > { %3034 = vmatpush.bf16.msrb.mxu2 %v4775_v58  ;;  %vm2106_vm15 = vmor %vm2104_vm14, %vm2105_vm13  ;;  %v4918_v58 = vld [vmem:[%s6426_s24 + $0x388] sm:$0xf]  ;;  %v5347_v24 = vld [vmem:[%s6426_s24 + $0x314] sm:$0xf0] }
 0x210   : > { %v2101_v40 = vsub.f32 1.0, %v2100_v61  ;;  %v4600_v61 = vld [vmem:[%s6426_s24 + $0x118] sm:$0xf0] }
 0x211   : > { %3061 = vmatpush.bf16.msra.mxu0 %v4507_v59  ;;  %v5363_v59 = vld [vmem:[%s6426_s24 + $0x394] sm:$0xf0]  ;;  %v4603_v2 = vor.u32 %v5281_v60, %v4600_v61  ;;  %v5383_v61 = vld [vmem:[%s6434_s22 + $0x38] sm:$0xff] }
 0x212   : > { %v2102_v8 = vmul.f32 %v5591_v57, %v2101_v40  ;;  %3070 = vmatpush.bf16.msra.mxu1 %v4699_v62  ;;  %v5329_v62 = vld [vmem:[%s6426_s24 + $0x28c] sm:$0xf]  ;;  %v4919_v38 = vor.u32 %v5363_v59, %v4918_v58  ;;  %v5359_v40 = vld [vmem:[%s6426_s24 + $0x374] sm:$0xf0] }
 0x213   : > { %3035 = vmatpush.bf16.msrb.mxu2 %v4759_v5  ;;  %v4795_v36 = vor.u32 %v5329_v62, %v4792_v0  ;;  %v4776_v5 = vld [vmem:[%s6426_s24 + $0x278] sm:$0xf0] }
 0x214   : > { %v2103_v17 = vadd.f32 %v5591_v57, %v2102_v8  ;;  %v4779_v63 = vor.u32 %v5325_v4, %v4776_v5  ;;  %v5355_v8 = vld [vmem:[%s6426_s24 + $0x354] sm:$0xf0]  ;;  %v5379_v5 = vld [vmem:[%s6434_s22 + $0x18] sm:$0xff] }
 0x215   : > { %3062 = vmatpush.bf16.msra.mxu0 %v4491_v6  ;;  %v4903_v6 = vor.u32 %v5359_v40, %v4902_v3  ;;  %v4887_v13 = vor.u32 %v5355_v8, %v4886_v7  ;;  %v5380_v3 = vld [vmem:[%s6434_s22 + $0x20] sm:$0xff]  ;;  %v7141_v40 = vld [vmem:[%s729_s3] sm:$0xf]  ;;  %v5378_v8 = vld [vmem:[%s6434_s22 + $0x10] sm:$0xff] }
 0x216   : > { %v2107_v48 = vsel %vm2106_vm15, %v5591_v57, %v2103_v17  ;;  %3071 = vmatpush.bf16.msra.mxu1 %v4683_v12  ;;  %v4811_v57 = vor.u32 %v5333_v54, %v4808_v55  ;;  %v4760_v12 = vld [vmem:[%s6426_s24 + $0x258] sm:$0xf0]  ;;  %v5317_v17 = vld [vmem:[%s6426_s24 + $0x22c] sm:$0xf]  ;;  %v2252_v7 = vperm.slane %v7141_v40, 0 }
 0x217   : > { %v2112_v28 = vsel %vm2109_vm0, %v2111_v18, %v2107_v48  ;;  %3036 = vmatpush.bf16.msrb.mxu2 %v4743_v20  ;;  %v4763_v14 = vor.u32 %v5321_v9, %v4760_v12  ;;  %v4871_v18 = vor.u32 %v5351_v16, %v4870_v23  ;;  %v4747_v20 = vor.u32 %v5317_v17, %v4744_v22  ;;  %v5373_v48 = vld [vmem:[%s6426_s24 + $0x3ec] sm:$0xf]  ;;  %v5390_v9 = vld [vmem:[%s6434_s22 + $0x70] sm:$0xff]  ;;  %v5377_v23 = vld [vmem:[%s6434_s22 + $0x8] sm:$0xff] }
 0x218   : > { %v2117_v33 = vmul.f32 %v2112_v28, %v7002_v1  ;;  %v4824_v1 = vld [vmem:[%s6426_s24 + $0x2d8] sm:$0xf0]  ;;  %v5389_v16 = vld [vmem:[%s6434_s22 + $0x68] sm:$0xff] }
 0x219   : > { %3063 = vmatpush.bf16.msra.mxu0 %v4475_v21  ;;  %v4827_v49 = vor.u32 %v5337_v45, %v4824_v1  ;;  %v4854_v21 = vld [vmem:[%s6426_s24 + $0x308] sm:$0xf]  ;;  %v5353_v45 = vld [vmem:[%s6426_s24 + $0x34c] sm:$0xf]  ;;  %v4888_v1 = vld [vmem:[%s6426_s24 + $0x358] sm:$0xf0] }
 0x21a   : > { %v7069_v10 = vpack.c.bf16 %v2117_v33, %v2117_v33  ;;  %3072 = vmatpush.bf16.msra.mxu1 %v4667_v25  ;;  %v4968_v25 = vld [vmem:[%s6426_s24 + $0x3f8] sm:$0xf0]  ;;  %v4855_v26 = vor.u32 %v5347_v24, %v4854_v21  ;;  %v5365_v33 = vld [vmem:[%s6426_s24 + $0x3ac] sm:$0xf] }
 0x21b   : > { %3037 = vmatpush.bf16.msrb.mxu2 %v4727_v34  ;;  %v4971_v28 = vor.u32 %v5373_v48, %v4968_v25  ;;  %v4936_v34 = vld [vmem:[%s6426_s24 + $0x3b8] sm:$0xf0]  ;;  %v5388_v21 = vld [vmem:[%s6434_s22 + $0x60] sm:$0xff]  ;;  %v5387_v25 = vld [vmem:[%s6434_s22 + $0x58] sm:$0xff] }
 0x21c   : > { %2947 = vmatmul.bf16.vlgmr.msrb.gmra.mxu3 %v7069_v10  ;;  %3064 = vmatmul.bf16.vlgmr.msra.gmra.mxu0 %v6930_v19  ;;  %v4935_v19 = vor.u32 %v5367_v51, %v4934_v50  ;;  %v5345_v50 = vld [vmem:[%s6426_s24 + $0x30c] sm:$0xf]  ;;  %v4856_v51 = vld [vmem:[%s6426_s24 + $0x318] sm:$0xf0] }
 0x21d   : > { %3043 = vmatpush.bf16.msrb.mxu3 %v4967_v35  ;;  %v4939_v35 = vor.u32 %v5365_v33, %v4936_v34  ;;  %v4859_v52 = vor.u32 %v5345_v50, %v4856_v51  ;;  %3452 = vmatpush.bf16.msrb.mxu0 %v5383_v61  ;;  %v5395_v50 = vld [vmem:[%s6434_s22 + $0x98] sm:$0xff] }
 0x21e   : > { %3073 = vmatpush.bf16.msra.mxu1 %v4651_v39  ;;  %3038 = vmatmul.bf16.vlgmr.msrb.gmra.mxu2 %v7011_v15  ;;  %v5361_v39 = vld [vmem:[%s6426_s24 + $0x38c] sm:$0xf] }
 0x21f   : > { %3082 = vmatpush.bf16.msra.mxu2 %v4843_v41  ;;  %v4920_v41 = vld [vmem:[%s6426_s24 + $0x398] sm:$0xf0] }
 0x220   : > { %v4923_v42 = vor.u32 %v5361_v39, %v4920_v41  ;;  %v5385_v41 = vld [vmem:[%s6434_s22 + $0x48] sm:$0xff] }
 0x221   : > { %3044 = vmatpush.bf16.msrb.mxu3 %v4951_v46  ;;  %v4891_v46 = vor.u32 %v5353_v45, %v4888_v1  ;;  %v5384_v45 = vld [vmem:[%s6434_s22 + $0x40] sm:$0xff] }
 0x222   : > { %3074 = vmatpush.bf16.msra.mxu1 %v4635_v47  ;;  %v5349_v47 = vld [vmem:[%s6426_s24 + $0x32c] sm:$0xf] }
 0x223   : > { %3083 = vmatpush.bf16.msra.mxu2 %v4827_v49  ;;  %v4872_v49 = vld [vmem:[%s6426_s24 + $0x338] sm:$0xf0]  ;;  %v5396_v1 = vld [vmem:[%s6434_s22 + $0xa0] sm:$0xff] }
 0x225   : > { %3045 = vmatpush.bf16.msrb.mxu3 %v4935_v19 }
 0x226   : > { %3075 = vmatpush.bf16.msra.mxu1 %v4619_v56 }
 0x227   : > { %3084 = vmatpush.bf16.msra.mxu2 %v4811_v57 }
 0x229   : > { %3046 = vmatpush.bf16.msrb.mxu3 %v4919_v38 }
 0x22a   : > { %3076 = vmatpush.bf16.msra.mxu1 %v4603_v2  ;;  %v5381_v2 = vld [vmem:[%s6434_s22 + $0x28] sm:$0xff] }
 0x22b   : > { %3085 = vmatpush.bf16.msra.mxu2 %v4795_v36 }
 0x22c   : > { %2999 = vmatmul.bf16.vlgmr.msra.gmra.mxu3 %v7069_v10 }
 0x22d   : > { %3047 = vmatpush.bf16.msrb.mxu3 %v4903_v6  ;;  %3077 = vmatmul.bf16.vlgmr.msra.gmra.mxu1 %v6967_v37  ;;  %v4728_v37 = vld [vmem:[%s6426_s24 + $0x218] sm:$0xf0]  ;;  %v5391_v6 = vld [vmem:[%s6434_s22 + $0x78] sm:$0xff] }
 0x22e   : > { %v4731_v27 = vor.u32 %v5313_v32, %v4728_v37  ;;  %3465 = vmatpush.bf16.msrb.mxu1 %v5391_v6  ;;  %v5392_v6 = vld [vmem:[%s6434_s22 + $0x80] sm:$0xff] }
 0x22f   : > { %3086 = vmatpush.bf16.msra.mxu2 %v4779_v63 }
 0x231   : > { %3048 = vmatpush.bf16.msrb.mxu3 %v4887_v13 }
 0x232   : > { %3466 = vmatpush.bf16.msrb.mxu1 %v5390_v9 }
 0x233   : > { %3087 = vmatpush.bf16.msra.mxu2 %v4763_v14 }
 0x235   : > { %3049 = vmatpush.bf16.msrb.mxu3 %v4871_v18 }
 0x236   : > { %3467 = vmatpush.bf16.msrb.mxu1 %v5389_v16 }
 0x237   : > { %3088 = vmatpush.bf16.msra.mxu2 %v4747_v20  ;;  %v5376_v20 = vld [vmem:[%s6434_s22] sm:$0xff] }
 0x239   : > { %3050 = vmatpush.bf16.msrb.mxu3 %v4855_v26  ;;  %v5399_v26 = vld [vmem:[%s6434_s22 + $0xb8] sm:$0xff] }
 0x23a   : > { %3468 = vmatpush.bf16.msrb.mxu1 %v5388_v21 }
 0x23b   : > { %3089 = vmatpush.bf16.msra.mxu2 %v4731_v27  ;;  %v2253_v27 = vperm.slane %v7141_v40, 1 }
 0x23c   : > { %3051 = vmatmul.bf16.vlgmr.msrb.gmra.mxu3 %v7069_v10 }
 0x23d   : > { %3095 = vmatpush.bf16.msra.mxu3 %v4971_v28 }
 0x23e   : > { %3090 = vmatmul.bf16.vlgmr.msra.gmra.mxu2 %v7011_v15  ;;  %v4875_v15 = vor.u32 %v5349_v47, %v4872_v49  ;;  %3469 = vmatpush.bf16.msrb.mxu1 %v5387_v25 }
 0x23f   : > { %3478 = vmatpush.bf16.msrb.mxu2 %v5399_v26  ;;  %v5404_v26 = vld [vmem:[%s6434_s22 + $0xe0] sm:$0xff] }
 0x241   : > { %3096 = vmatpush.bf16.msra.mxu3 %v4955_v31 }
 0x242   : > { %3470 = vmatpush.bf16.msrb.mxu1 %v5386_v29 }
 0x243   : > { %3479 = vmatpush.bf16.msrb.mxu2 %v5398_v30  ;;  %v5403_v30 = vld [vmem:[%s6434_s22 + $0xd8] sm:$0xff] }
 0x245   : > { %3097 = vmatpush.bf16.msra.mxu3 %v4939_v35 }
 0x246   : > { %3471 = vmatpush.bf16.msrb.mxu1 %v5385_v41 }
 0x249   : > { %3098 = vmatpush.bf16.msra.mxu3 %v4923_v42  ;;  %v5397_v42 = vld [vmem:[%s6434_s22 + $0xa8] sm:$0xff] }
 0x24a   : > { %3480 = vmatpush.bf16.msrb.mxu2 %v5397_v42  ;;  %3472 = vmatpush.bf16.msrb.mxu1 %v5384_v45 }
 0x24d   : > { %3099 = vmatpush.bf16.msra.mxu3 %v4907_v44 }
 0x24e   : > { %3481 = vmatpush.bf16.msrb.mxu2 %v5396_v1 }
 0x251   : > { %3100 = vmatpush.bf16.msra.mxu3 %v4891_v46 }
 0x252   : > { %3482 = vmatpush.bf16.msrb.mxu2 %v5395_v50 }
 0x255   : > { %3101 = vmatpush.bf16.msra.mxu3 %v4875_v15 }
 0x259   : > { %3102 = vmatpush.bf16.msra.mxu3 %v4859_v52  ;;  %v2909_v53 = vpop.f32.mrf.mxu0  ;;  %v2254_v52 = vperm.slane %v7141_v40, 2 }
 0x25a   : > { %v2910_v13 = vadd.f32 %v2909_v53, %v2252_v7 }
 0x25c   : > { %3103 = vmatmul.bf16.vlgmr.msra.gmra.mxu3 %v7069_v10  ;;  %v5382_v10 = vld [vmem:[%s6434_s22 + $0x30] sm:$0xff] }
 0x25d   : > { %3453 = vmatpush.bf16.msrb.mxu0 %v5382_v10  ;;  %v5393_v10 = vld [vmem:[%s6434_s22 + $0x88] sm:$0xff] }
 0x261   : > { %v2911_v54 = vpop.f32.mrf.mxu0  ;;  %3454 = vmatpush.bf16.msrb.mxu0 %v5381_v2 }
 0x265   : > { %3455 = vmatpush.bf16.msrb.mxu0 %v5380_v3 }
 0x269   : > { %v2922_v55 = vpop.f32.mrf.mxu1  ;;  %v2961_v19 = vpop.f32.mrf.mxu0  ;;  %3456 = vmatpush.bf16.msrb.mxu0 %v5379_v5 }
 0x26a   : > { %v2923_v17 = vadd.f32 %v2922_v55, %v2910_v13  ;;  %v2962_v33 = vadd.f32 %v2961_v19, %v2253_v27  ;;  %v5394_v19 = vld [vmem:[%s6434_s22 + $0x90] sm:$0xff] }
 0x26b   : > { %3483 = vmatpush.bf16.msrb.mxu2 %v5394_v19 }
 0x26d   : > { %3457 = vmatpush.bf16.msrb.mxu0 %v5378_v8 }
 0x26f   : > { %3484 = vmatpush.bf16.msrb.mxu2 %v5393_v10 }
 0x271   : > { %v2924_v56 = vpop.f32.mrf.mxu1  ;;  %v2963_v57 = vpop.f32.mrf.mxu0  ;;  %3458 = vmatpush.bf16.msrb.mxu0 %v5377_v23 }
 0x273   : > { %3485 = vmatpush.bf16.msrb.mxu2 %v5392_v6 }
 0x275   : > { %3459 = vmatpush.bf16.msrb.mxu0 %v5376_v20 }
 0x279   : > { %v7129_v58 = vpop.f32.mrf.mxu1  ;;  %v7131_v59 = vpop.f32.mrf.mxu0 }
 0x27a   : > { %v2975_v11 = vadd.f32 %v7129_v58, %v2962_v33 }
 0x280   : > { %v2935_v60 = vpop.f32.mrf.mxu2 }
 0x281   : > { %v2976_v62 = vpop.f32.mrf.mxu1  ;;  %v3015_v0 = vpop.f32.mrf.mxu0  ;;  %v2936_v22 = vadd.f32 %v2935_v60, %v2923_v17  ;;  %v3014_v60 = vadd.f32 %v7131_v59, %v2254_v52 }
 0x288   : > { %v2937_v38 = vpop.f32.mrf.mxu2 }
 0x28a   : > { %v7136_v36 = vpop.f32.mrf.mxu1 }
 0x28b   : > { %v3027_v38 = vadd.f32 %v7136_v36, %v3014_v60 }
 0x291   : > { %v2987_v4 = vpop.f32.mrf.mxu2 }
 0x292   : > { %v3028_v63 = vpop.f32.mrf.mxu1  ;;  %v2988_v43 = vadd.f32 %v2987_v4, %v2975_v11 }
 0x293   : > { %v5407_v63 = vld [vmem:[%s6434_s22 + $0xf8] sm:$0xff] }
 0x294   : > { %3491 = vmatpush.bf16.msrb.mxu3 %v5407_v63 }
 0x299   : > { %v7148_v12 = vpop.f32.mrf.mxu0  ;;  %v2989_v14 = vpop.f32.mrf.mxu2 }
 0x29a   : > { %v5406_v14 = vld [vmem:[%s6434_s22 + $0xf0] sm:$0xff] }
 0x29b   : > { %3492 = vmatpush.bf16.msrb.mxu3 %v5406_v14 }
 0x29f   : > { %v2948_v18 = vpop.f32.mrf.mxu3 }
 0x2a0   : > { %v7154_v24 = vadd.f32 %v2948_v18, %v2936_v22  ;;  %v5405_v18 = vld [vmem:[%s6434_s22 + $0xe8] sm:$0xff] }
 0x2a1   : > { %v3067_v32 = vpop.f32.mrf.mxu0  ;;  %v3039_v48 = vpop.f32.mrf.mxu2  ;;  %3493 = vmatpush.bf16.msrb.mxu3 %v5405_v18 }
 0x2a2   : > { %v4972_v37 = vmul.f32 -1.442695, %v7154_v24  ;;  %v3040_v5 = vadd.f32 %v3039_v48, %v3027_v38 }
 0x2a4   : > { %5592 = vpow2.f32 %v4972_v37 }
 0x2a5   : > { %3494 = vmatpush.bf16.msrb.mxu3 %v5404_v26 }
 0x2a7   : > { %v2950_v28 = vpop.f32.mrf.mxu3 }
 0x2a9   : > { %v3041_v39 = vpop.f32.mrf.mxu2  ;;  %3495 = vmatpush.bf16.msrb.mxu3 %v5403_v30 }
 0x2aa   : > { %v5593_v31 = vpop.eup %5592  ;;  %v7162_v34 = vpop.f32.mrf.mxu1  ;;  %v5402_v39 = vld [vmem:[%s6434_s22 + $0xd0] sm:$0xff] }
 0x2ab   : > { %v3120_v35 = vadd.f32 1.0, %v5593_v31 }
 0x2ad   : > { %5594 = vrcp.f32 %v3120_v35  ;;  %v3135_v54 = vand.u32 2147483648, %v3120_v35  ;;  %v3133_v57 = vand.u32 2147483647, %v3120_v35  ;;  %vm3129_vm2 = vweird.f32 %v3120_v35  ;;  %3496 = vmatpush.bf16.msrb.mxu3 %v5402_v39  ;;  %v5559_v39 = vld [vmem:[#allocation22] ss:$0 sm:$0xff] }
 0x2af   : > { %v3000_v44 = vpop.f32.mrf.mxu3  ;;  %v3136_v62 = vor.u32 1.1754944e-38, %v3135_v54  ;;  %vm3134_vm4 = vcmp.eq.f32.partialorder %v3133_v57, 8.507059e+37 }
 0x2b0   : > { %v7169_v46 = vadd.f32 %v3000_v44, %v2988_v43  ;;  %v5401_v44 = vld [vmem:[%s6434_s22 + $0xc8] sm:$0xff] }
 0x2b1   : > { %3497 = vmatpush.bf16.msrb.mxu3 %v5401_v44 }
 0x2b2   : > { %v4973_v47 = vmul.f32 -1.442695, %v7169_v46  ;;  %v3080_v49 = vpop.f32.mrf.mxu1 }
 0x2b3   : > { %v5595_v15 = vpop.eup %5594 }
 0x2b4   : > { %v3125_v51 = vmul.f32 %v5595_v15, %v3120_v35  ;;  %5596 = vpow2.f32 %v4973_v47  ;;  %vm3130_vm1 = vweird.f32 %v5595_v15  ;;  %v2255_v35 = vperm.slane %v7141_v40, 3 }
 0x2b5   : > { %vm3131_vm3 = vmor %vm3129_vm2, %vm3130_vm1 }
 0x2b6   : > { %v3126_v53 = vsub.f32 1.0, %v3125_v51  ;;  %v3066_v11 = vadd.f32 %v7148_v12, %v2255_v35 }
 0x2b7   : > { %v3002_v55 = vpop.f32.mrf.mxu3 }
 0x2b8   : > { %v3127_v56 = vmul.f32 %v5595_v15, %v3126_v53 }
 0x2ba   : > { %v5597_v58 = vpop.eup %5596  ;;  %v3128_v61 = vadd.f32 %v5595_v15, %v3127_v56 }
 0x2bb   : > { %v3121_v0 = vadd.f32 1.0, %v5597_v58 }
 0x2bc   : > { %v3132_v2 = vsel %vm3131_vm3, %v5595_v15, %v3128_v61  ;;  %v5400_v15 = vld [vmem:[%s6434_s22 + $0xc0] sm:$0xff] }
 0x2bd   : > { %v3137_v3 = vsel %vm3134_vm4, %v3136_v62, %v3132_v2  ;;  %5598 = vrcp.f32 %v3121_v0  ;;  %v3150_v17 = vand.u32 2147483648, %v3121_v0  ;;  %v3148_v21 = vand.u32 2147483647, %v3121_v0  ;;  %3498 = vmatpush.bf16.msrb.mxu3 %v5400_v15 }
 0x2be   : > { %v3184_v4 = vmul.f32 %v3137_v3, %v7154_v24  ;;  %vm3144_vm6 = vweird.f32 %v3121_v0 }
 0x2bf   : > { %v3052_v59 = vpop.f32.mrf.mxu3  ;;  %v3151_v48 = vor.u32 1.1754944e-38, %v3150_v17  ;;  %vm3149_vm8 = vcmp.eq.f32.partialorder %v3148_v21, 8.507059e+37 }
 0x2c0   : > { %v3188_v7 = vpack.c.bf16 %v3184_v4, %v3184_v4  ;;  %v7181_v8 = vadd.f32 %v3052_v59, %v3040_v5 }
 0x2c1   : > { %v3091_v9 = vpop.f32.mrf.mxu2 }
 0x2c2   : > { %v4974_v36 = vmul.f32 -1.442695, %v7181_v8  ;;  %3460 = vmatmul.bf16.vlgmr.msrb.gmra.mxu0 %v3188_v7 }
 0x2c3   : > { %v5599_v13 = vpop.eup %5598 }
 0x2c4   : > { %v3140_v23 = vmul.f32 %v5599_v13, %v3121_v0  ;;  %5600 = vpow2.f32 %v4974_v36  ;;  %vm3145_vm5 = vweird.f32 %v5599_v13  ;;  %v5557_v36 = vld [vmem:[%s748_s14] ss:$0 sm:$0xff] }
 0x2c5   : > { %vm3146_vm7 = vmor %vm3144_vm6, %vm3145_vm5 }
 0x2c6   : > { %v3141_v16 = vsub.f32 1.0, %v3140_v23 }
 0x2c7   : > { %v3054_v22 = vpop.f32.mrf.mxu3 }
 0x2c8   : > { %v3142_v20 = vmul.f32 %v5599_v13, %v3141_v16  ;;  %v5558_v16 = vld [vmem:[#allocation20] ss:$0 sm:$0xff] }
 0x2c9   : > { %v3093_v24 = vpop.f32.mrf.mxu2 }
 0x2ca   : > { %v5601_v32 = vpop.eup %5600  ;;  %v3143_v37 = vadd.f32 %v5599_v13, %v3142_v20 }
 0x2cb   : > { %v3122_v25 = vadd.f32 1.0, %v5601_v32 }
 0x2cc   : > { %v3147_v27 = vsel %vm3146_vm7, %v5599_v13, %v3143_v37 }
 0x2cd   : > { %v3152_v28 = vsel %vm3149_vm8, %v3151_v48, %v3147_v27  ;;  %5602 = vrcp.f32 %v3122_v25  ;;  %v3165_v43 = vand.u32 2147483648, %v3122_v25  ;;  %v3163_v1 = vand.u32 2147483647, %v3122_v25 }
 0x2ce   : > { %v3185_v29 = vmul.f32 %v3152_v28, %v7169_v46  ;;  %v3079_v46 = vadd.f32 %v7162_v34, %v3066_v11  ;;  %vm3159_vm10 = vweird.f32 %v3122_v25 }
 0x2cf   : > { %v3166_v49 = vor.u32 1.1754944e-38, %v3165_v43  ;;  %vm3164_vm12 = vcmp.eq.f32.partialorder %v3163_v1, 8.507059e+37 }
 0x2d0   : > { %v3189_v31 = vpack.c.bf16 %v3185_v29, %v3185_v29  ;;  %v3092_v40 = vadd.f32 %v3091_v9, %v3079_v46 }
 0x2d2   : > { %3473 = vmatmul.bf16.vlgmr.msrb.gmra.mxu1 %v3189_v31 }
 0x2d3   : > { %v5603_v33 = vpop.eup %5602 }
 0x2d4   : > { %v3155_v41 = vmul.f32 %v5603_v33, %v3122_v25  ;;  %vm3160_vm9 = vweird.f32 %v5603_v33 }
 0x2d5   : > { %vm3161_vm11 = vmor %vm3159_vm10, %vm3160_vm9 }
 0x2d6   : > { %v3156_v42 = vsub.f32 1.0, %v3155_v41 }
 0x2d8   : > { %v3157_v45 = vmul.f32 %v5603_v33, %v3156_v42 }
 0x2da   : > { %v3158_v47 = vadd.f32 %v5603_v33, %v3157_v45 }
 0x2dc   : > { %v3162_v50 = vsel %vm3161_vm11, %v5603_v33, %v3158_v47 }
 0x2dd   : > { %v3167_v52 = vsel %vm3164_vm12, %v3166_v49, %v3162_v50  ;;  %v3552_v49 = vlaneseq }
 0x2de   : > { %v3186_v12 = vmul.f32 %v3167_v52, %v7181_v8 }
 0x2df   : > { %v3104_v51 = vpop.f32.mrf.mxu3  ;;  %v3553_v50 = vand.u32 127, %v3552_v49 }
 0x2e0   : > { %v3105_v53 = vadd.f32 %v3104_v51, %v3092_v40  ;;  %v3190_v55 = vpack.c.bf16 %v3186_v12, %v3186_v12 }
 0x2e1   : > { %vm3554_vm4 = vcmp.ge.s32.totalorder %v3553_v50, 8  ;;  %vm3555_vm5 = vcmp.lt.s32.totalorder %v3553_v50, 16 }
 0x2e2   : > { %v4975_v54 = vmul.f32 -1.442695, %v3105_v53  ;;  %3486 = vmatmul.bf16.vlgmr.msrb.gmra.mxu2 %v3190_v55  ;;  %vm3556_vm7 = vmand %vm3554_vm4, %vm3555_vm5 }
 0x2e4   : > { %5604 = vpow2.f32 %v4975_v54 }
 0x2e7   : > { %v3106_v34 = vpop.f32.mrf.mxu3 }
 0x2ea   : > { %v5605_v19 = vpop.eup %5604 }
 0x2eb   : > { %v3123_v56 = vadd.f32 1.0, %v5605_v19 }
 0x2ed   : > { %5606 = vrcp.f32 %v3123_v56  ;;  %v3180_v61 = vand.u32 2147483648, %v3123_v56  ;;  %v3178_v0 = vand.u32 2147483647, %v3123_v56  ;;  %vm3174_vm14 = vweird.f32 %v3123_v56 }
 0x2ef   : > { %v3181_v38 = vor.u32 1.1754944e-38, %v3180_v61  ;;  %vm3179_vm0 = vcmp.eq.f32.partialorder %v3178_v0, 8.507059e+37 }
 0x2f3   : > { %v5607_v57 = vpop.eup %5606 }
 0x2f4   : > { %v3170_v58 = vmul.f32 %v5607_v57, %v3123_v56  ;;  %vm3175_vm13 = vweird.f32 %v5607_v57 }
 0x2f5   : > { %vm3176_vm15 = vmor %vm3174_vm14, %vm3175_vm13 }
 0x2f6   : > { %v3171_v60 = vsub.f32 1.0, %v3170_v58 }
 0x2f8   : > { %v3172_v62 = vmul.f32 %v5607_v57, %v3171_v60 }
 0x2fa   : > { %v3173_v10 = vadd.f32 %v5607_v57, %v3172_v62 }
 0x2fc   : > { %v3177_v2 = vsel %vm3176_vm15, %v5607_v57, %v3173_v10 }
 0x2fd   : > { %v3182_v3 = vsel %vm3179_vm0, %v3181_v38, %v3177_v2 }
 0x2fe   : > { %v3187_v4 = vmul.f32 %v3182_v3, %v3105_v53 }
 0x300   : > { %v3191_v5 = vpack.c.bf16 %v3187_v4, %v3187_v4 }
 0x302   : > { %3499 = vmatmul.bf16.vlgmr.msrb.gmra.mxu3 %v3191_v5 }
 0x33f   : > { %v3461_v59 = vpop.f32.mrf.mxu0 }
 0x340   : > { %v3462_v13 = vadd.f32 %v5557_v36, %v3461_v59 }
 0x347   : > { %v3463_v6 = vpop.f32.mrf.mxu0 }
 0x34f   : > { %v3474_v63 = vpop.f32.mrf.mxu1 }
 0x350   : > { %v3475_v14 = vadd.f32 %v3474_v63, %v3462_v13 }
 0x357   : > { %v3476_v7 = vpop.f32.mrf.mxu1 }
 0x365   : > { %v3487_v8 = vpop.f32.mrf.mxu2 }
 0x366   : > { %v3488_v23 = vadd.f32 %v3487_v8, %v3475_v14 }
 0x36d   : > { %v3489_v9 = vpop.f32.mrf.mxu2 }
 0x385   : > { %v3500_v17 = vpop.f32.mrf.mxu3 }
 0x386   : > { %v3501_v22 = vadd.f32 %v3500_v17, %v3488_v23 }
 0x388   : > { %v3509_v18 = vsub.f32 %v5558_v16, %v3501_v22 }
 0x38a   : > { %v3513_v20 = vand.u32 2147483647, %v3509_v18  ;;  %v3510_v31 = vmax.f32 %v3509_v18, 0.0  ;;  %vm3511_vm2 = vcmp.ne.f32.partialorder %v3509_v18, %v3509_v18 }
 0x38c   : > { %v3514_v21 = vsub.f32 0.0, %v3513_v20 }
 0x38d   : > { %v3502_v24 = vpop.f32.mrf.mxu3 }
 0x38e   : > { %v3515_v32 = vmul.f32 1.442695, %v3514_v21 }
 0x390   : > { %5608 = vpow2.f32 %v3515_v32 }
 0x396   : > { %v5609_v37 = vpop.eup %5608 }
 0x397   : > { %v3517_v48 = vadd.f32 1.0, %v5609_v37  ;;  %v3520_v25 = vmul.f32 -0.5, %v5609_v37  ;;  %v3523_v27 = vand.u32 2147483647, %v5609_v37 }
 0x399   : > { %5610 = vlog2.f32 %v3517_v48  ;;  %v3521_v26 = vadd.f32 1.0, %v3520_v25  ;;  %vm3524_vm1 = vcmp.lt.f32.partialorder %v3523_v27, 0.0004427343 }
 0x39b   : > { %v3522_v30 = vmul.f32 %v5609_v37, %v3521_v26 }
 0x39f   : > { %v5611_v28 = vpop.eup %5610 }
 0x3a0   : > { %v3519_v29 = vmul.f32 0.6931472, %v5611_v28 }
 0x3a2   : > { %v3525_v33 = vsel %vm3524_vm1, %v3522_v30, %v3519_v29 }
 0x3a3   : > { %v3526_v35 = vadd.f32 %v3525_v33, %v3510_v31 }
 0x3a5   : > { %v3527_v41 = vsel %vm3511_vm2, %v3509_v18, %v3526_v35 }
 0x3a6   : > { %v3528_v42 = vsub.f32 %v5558_v16, %v3527_v41 }
 0x3a8   : > { %v3532_v11 = vsub.f32 %v3528_v42, %v5559_v39 }
 0x3aa   : > { %v3536_v43 = vand.u32 2147483647, %v3532_v11  ;;  %v3533_v12 = vmax.f32 %v3532_v11, 0.0  ;;  %vm3534_vm6 = vcmp.ne.f32.partialorder %v3532_v11, %v3532_v11 }
 0x3ac   : > { %v3537_v44 = vsub.f32 0.0, %v3536_v43 }
 0x3ae   : > { %v3538_v45 = vmul.f32 1.442695, %v3537_v44 }
 0x3b0   : > { %5612 = vpow2.f32 %v3538_v45 }
 0x3b6   : > { %v5613_v1 = vpop.eup %5612 }
 0x3b7   : > { %v3540_v46 = vadd.f32 1.0, %v5613_v1  ;;  %v3543_v47 = vmul.f32 -0.5, %v5613_v1  ;;  %v3546_v15 = vand.u32 2147483647, %v5613_v1 }
 0x3b9   : > { %5614 = vlog2.f32 %v3540_v46  ;;  %v3544_v40 = vadd.f32 1.0, %v3543_v47  ;;  %vm3547_vm3 = vcmp.lt.f32.partialorder %v3546_v15, 0.0004427343 }
 0x3bb   : > { %v3545_v53 = vmul.f32 %v5613_v1, %v3544_v40 }
 0x3bf   : > { %v5615_v51 = vpop.eup %5614 }
 0x3c0   : > { %v3542_v52 = vmul.f32 0.6931472, %v5615_v51 }
 0x3c2   : > { %v3548_v54 = vsel %vm3547_vm3, %v3545_v53, %v3542_v52 }
 0x3c3   : > { %v3549_v55 = vadd.f32 %v3548_v54, %v3533_v12 }
 0x3c5   : > { %v3550_v34 = vsel %vm3534_vm6, %v3532_v11, %v3549_v55 }
 0x3c6   : > { %v3551_v19 = vadd.f32 %v5559_v39, %v3550_v34 }
 0x3c8   : > { %v3557_v56 = vsel %vm3556_vm7, %v3551_v19, %v3501_v22 }
 0x3c9   : > { %3558 = vst [vmem:[%s840_s21] sm:$0xff] %v3557_v56 }
 0x3ca   : > { %6033 = shalt.err (!%p6030_p13)
}
 0x3cb   : > { %5442 = dma.vmem_to_hbm [thread:$0]  (%p6244_p8), %s3574_s11, 128, %s3576_s1, %s3560_s28  }
 0x3cc PF: > { %s7308_s17 = sld [smem:[#allocation35_spill]] }
 0x3cd   : > { %s7309_s18 = sld [smem:[#allocation32_spill]] }
 0x3d2   : > { %p5498_p0 = scmp.ge.s32.totalorder %s7308_s17, 2 }
 0x3d3   : > { %s3587_s14 = sand.u32 1, %s7309_s18  }
 0x3d4   : > { %p5486_p1 = pnand %p5498_p0, %p6248_p9  ;;  %s3588_s19 = scalar_lea.sflag [#allocation4], %s3587_s14 }
 0x3d6   : > { %p5487_p2 = pneg %p5486_p1 }
 0x3d8   : > { %6087 = dma.done.wait (%p5487_p2), %s3588_s19, 128  }
 0x3d9   : > { %6089 = vsyncadd (%p5487_p2), %s3588_s19, 4294967168  ;;  %s43_s30 = sadd.s32 1, %s7308_s17   ;;  %s7311_s25 = sld [smem:[#allocation33_spill]] }
 0x3da   : > { %p40_p4 = scmp.ge.s32.totalorder %s43_s30, 6   ;;  %s7312_s0 = sld [smem:[#allocation42_spill]] }
 0x3db   : > { %s7313_s15 = sld [smem:[#allocation41_spill]]  ;;  %s7314_s26 = smov %s6100_s27 }
 0x3dc   : > { %s7316_s28 = smov %s6108_s29 }
 0x3dd   :  { %42 = sbr.rel (!%p40_p4) target bundleno = 24 (0x18), region = 229 }
 0x3e0   : > { %s7315_s27 = smov %s7312_s0 }
 0x3e1   : > { %s7317_s29 = smov %s7313_s15 }
 0x3e2   :  { %3594 = vsyncpa [#allocation3], 1 }
 0x3e3   :  { %3596 = vsyncpa [#allocation3 + $0x1], 1 }
 0x3e4   :  { %3597 = vsyncpa [#allocation6], 1 }
 0x3e5   :  { %3598 = vsyncpa [#allocation9], 1 }
 0x3e6   :  { %3600 = vsyncpa [#allocation9 + $0x1], 1 }
 0x3e7   :  { %3601 = vsyncpa [#allocation12], 1 }
 0x3e8   :  { %3603 = vsyncpa [#allocation12 + $0x1], 1 }
 0x3e9   :  { %3604 = vsyncpa [#allocation15], 1 }
 0x3ea   :  { %3606 = vsyncpa [#allocation15 + $0x1], 1 }
 0x3eb   :  { %3607 = vsyncpa [#allocation18], 1 }
 0x3ec   :  { %3609 = vsyncpa [#allocation18 + $0x1], 1 }
 0x3ed   :  { %3610 = vsyncpa [#allocation21], 1 }
 0x3ee   :  { %3611 = vsyncpa [#allocation4], 1 }
 0x3ef   :  { %3613 = vsyncpa [#allocation4 + $0x1], 1 }

</bundles_post_ra>
